<compile_context>
chip_gen: v5e
topology: v5e:2x2
jax: 0.10.0
libtpu: 0.0.40
codegen_flags: <defaults>
</compile_context>

<pallas_src>
import jax
import jax.numpy as jnp
from jax.experimental import pallas as pl
from jax.experimental.pallas import tpu as pltpu

# Hyperparameters mirroring the module's __init__ shapes (small demo sizes).
VOCAB_SIZE = 64
MAX_POS = 32          # MaxPos
DIM_WE = 32           # dimWE  (word embedding dim)
DIM_WPE = 8           # dimWPE (position embedding dim)
DIM_C = 32            # dimC   (hidden_dim / #conv filters)
FILTER_SIZE = 3       # filter_size
SEN_LEN = 16          # SenLen
LEN = 2               # batch of sentences (Len = inp.size(0))
EMB_DIM = DIM_WE + 2 * DIM_WPE          # conv input channels (48)
L_OUT = SEN_LEN - FILTER_SIZE + 1       # valid conv output length (14)

ONEHOT_DIM = VOCAB_SIZE + 2 * MAX_POS   # 64 + 32 + 32 = 128 (one lane tile)
K_FUSED = FILTER_SIZE * ONEHOT_DIM      # 384 = fused contraction dim
LEN_TILE = 8                            # batch rows per grid step (raise for real batches)


def encoder_cnn_kernel(inp_ref, pos1_ref, pos2_ref, p_ref, b_ref, o_ref):
    # inp_ref / pos1_ref / pos2_ref: (LEN_TILE, SEN_LEN, 1) int32 token / position ids
    # p_ref: (K_FUSED, DIM_C) f32 folded (block-diag embedding @ conv-tap) weight
    # b_ref: (1, DIM_C)       f32 conv bias
    # o_ref: (LEN_TILE, DIM_C) f32 tanh(maxpool(conv(embed(...))))
    lanes = jax.lax.broadcasted_iota(jnp.int32, (LEN_TILE, L_OUT, K_FUSED), 2)
    hot = None
    for k in range(FILTER_SIZE):  # static unroll over the 3 conv taps
        base = k * ONEHOT_DIM     # each tap owns its own 128-lane segment of K
        w_ids = inp_ref[:, k:k + L_OUT, :] + base                       # (T, L_OUT, 1)
        p1_ids = pos1_ref[:, k:k + L_OUT, :] + (base + VOCAB_SIZE)
        p2_ids = pos2_ref[:, k:k + L_OUT, :] + (base + VOCAB_SIZE + MAX_POS)
        m = (lanes == w_ids) | (lanes == p1_ids) | (lanes == p2_ids)
        hot = m if hot is None else (hot | m)
    lhs = jnp.where(hot, 1.0, 0.0)                                      # 9-hot rows, f32
    # One MXU contraction (K=384) == embedding lookup + concat + all conv taps.
    conv = jax.lax.dot_general(
        lhs, p_ref[...],
        dimension_numbers=(((2,), (0,)), ((), ())),
        preferred_element_type=jnp.float32)                             # (T, L_OUT, DIM_C)
    pooled = jnp.max(conv, axis=1)                                      # MaxPool1d over time
    o_ref[...] = jnp.tanh(pooled + b_ref[...]).astype(o_ref.dtype)      # bias after pool


def prepare_params(params):
    """One-time parameter prep (hoisted out of the per-call path, review item #3)."""
    word_emb, pos1_emb, pos2_emb, conv_w, conv_b = params
    # Block-diagonal embedding table: rows 0:64 -> word cols 0:32,
    # rows 64:96 -> pos1 cols 32:40, rows 96:128 -> pos2 cols 40:48.
    tbl = jnp.zeros((ONEHOT_DIM, EMB_DIM), jnp.float32)
    tbl = tbl.at[:VOCAB_SIZE, :DIM_WE].set(word_emb.astype(jnp.float32))
    tbl = tbl.at[VOCAB_SIZE:VOCAB_SIZE + MAX_POS, DIM_WE:DIM_WE + DIM_WPE].set(
        pos1_emb.astype(jnp.float32))
    tbl = tbl.at[VOCAB_SIZE + MAX_POS:, DIM_WE + DIM_WPE:].set(
        pos2_emb.astype(jnp.float32))
    # PyTorch conv weight (C_out, C_in, K) -> per-tap (K, C_in, C_out), folded into table.
    w_taps = jnp.transpose(conv_w.astype(jnp.float32), (2, 1, 0))       # (K, C_in, C_out)
    p_fused = jnp.einsum("re,kec->krc", tbl, w_taps,
                         precision=jax.lax.Precision.HIGHEST)           # (K, 128, C_out)
    p_fused = p_fused.reshape(K_FUSED, DIM_C)
    bias = conv_b.reshape(1, DIM_C).astype(jnp.float32)
    return p_fused, bias


@jax.jit
def encoder_cnn_forward(inp, pos1, pos2, p_fused, bias):
    length = inp.shape[0]
    pad = (-length) % LEN_TILE

    def prep(idx):
        idx = idx.astype(jnp.int32)
        if pad:
            idx = jnp.concatenate([idx, jnp.zeros((pad, SEN_LEN), jnp.int32)], axis=0)
        return idx[..., None]                                           # (Lp, SEN_LEN, 1)

    inp3, pos13, pos23 = prep(inp), prep(pos1), prep(pos2)
    len_padded = length + pad

    out = pl.pallas_call(
        encoder_cnn_kernel,
        out_shape=jax.ShapeDtypeStruct((len_padded, DIM_C), jnp.float32),
        grid=(len_padded // LEN_TILE,),
        in_specs=[
            pl.BlockSpec((LEN_TILE, SEN_LEN, 1), lambda i: (i, 0, 0)),
            pl.BlockSpec((LEN_TILE, SEN_LEN, 1), lambda i: (i, 0, 0)),
            pl.BlockSpec((LEN_TILE, SEN_LEN, 1), lambda i: (i, 0, 0)),
            pl.BlockSpec((K_FUSED, DIM_C), lambda i: (0, 0)),   # weight stays resident
            pl.BlockSpec((1, DIM_C), lambda i: (0, 0)),
        ],
        out_specs=pl.BlockSpec((LEN_TILE, DIM_C), lambda i: (i, 0)),
        compiler_params=pltpu.CompilerParams(
            dimension_semantics=("parallel",)),                 # both v7x TCs split batch
    )(inp3, pos13, pos23, p_fused, bias)
    return out[:length]


if __name__ == "__main__":
    key = jax.random.PRNGKey(0)
    k_we, k_p1, k_p2, k_cw, k_cb, k_i, k_q1, k_q2 = jax.random.split(key, 8)

    # Deterministic synthetic parameters (same shapes as the module __init__).
    word_emb = jax.random.normal(k_we, (VOCAB_SIZE, DIM_WE), jnp.float32) * 0.1
    pos1_emb = jax.random.normal(k_p1, (MAX_POS, DIM_WPE), jnp.float32) * 0.1
    pos2_emb = jax.random.normal(k_p2, (MAX_POS, DIM_WPE), jnp.float32) * 0.1
    conv_w = jax.random.normal(k_cw, (DIM_C, EMB_DIM, FILTER_SIZE), jnp.float32) * 0.1
    conv_b = jax.random.normal(k_cb, (DIM_C,), jnp.float32) * 0.1
    params = (word_emb, pos1_emb, pos2_emb, conv_w, conv_b)

    # Inputs: integer token / position-feature indices of shape (Len, SenLen).
    inp = jax.random.randint(k_i, (LEN, SEN_LEN), 0, VOCAB_SIZE, jnp.int32)
    pos1 = jax.random.randint(k_q1, (LEN, SEN_LEN), 0, MAX_POS, jnp.int32)
    pos2 = jax.random.randint(k_q2, (LEN, SEN_LEN), 0, MAX_POS, jnp.int32)

    p_fused, bias = prepare_params(params)   # one-time prep, not per forward call
    out = jax.block_until_ready(encoder_cnn_forward(inp, pos1, pos2, p_fused, bias))
    assert out.shape == (LEN, DIM_C)

    # Pure-JAX reference matching PyTorch semantics (NCL conv, valid padding, f32).
    embd_ncl = jnp.concatenate(
        [word_emb[inp], pos1_emb[pos1], pos2_emb[pos2]], axis=2
    ).transpose(0, 2, 1)
    conved = jax.lax.conv_general_dilated(
        embd_ncl, conv_w, window_strides=(1,), padding="VALID",
        dimension_numbers=("NCH", "OIH", "NCH"),
        precision=jax.lax.Precision.HIGHEST) + conv_b[None, :, None]
    ref = jnp.tanh(jnp.max(conved, axis=2))
    # Tolerance covers f32 summation-order / MXU pass differences only.
    assert jnp.allclose(out, ref, atol=2e-5), "Pallas kernel mismatch vs reference"

    print("KERNEL_OK")
</pallas_src>

<mosaic_0001>
module attributes {stable_mosaic.version = 11 : i64} {
  func.func @encoder_cnn_kernel(%arg0: i32, %arg1: memref<8x16x1xi32, #tpu.memory_space<vmem>>, %arg2: memref<8x16x1xi32, #tpu.memory_space<vmem>>, %arg3: memref<8x16x1xi32, #tpu.memory_space<vmem>>, %arg4: memref<384x32xf32, #tpu.memory_space<vmem>>, %arg5: memref<1x32xf32, #tpu.memory_space<vmem>>, %arg6: memref<8x32xf32, #tpu.memory_space<vmem>>) attributes {dimension_semantics = [#tpu.dimension_semantics<parallel>], iteration_bounds = array<i64: 1>, scalar_prefetch = 0 : i64, scratch_operands = 0 : i64, tpu.core_type = #tpu.core_type<tc>, window_params = [{transform_indices = @transform_0, window_bounds = array<i64: 8, 16, 1>}, {transform_indices = @transform_1, window_bounds = array<i64: 8, 16, 1>}, {transform_indices = @transform_2, window_bounds = array<i64: 8, 16, 1>}, {pipeline_mode = #tpu.pipeline_mode<synchronous>, transform_indices = @transform_3, window_bounds = array<i64: 384, 32>}, {pipeline_mode = #tpu.pipeline_mode<synchronous>, transform_indices = @transform_4, window_bounds = array<i64: 1, 32>}, {transform_indices = @transform_5, window_bounds = array<i64: 8, 32>}]} {
    %0 = tpu.iota {dimensions = array<i32: 2>} : vector<8x14x384xi32>
    %c0 = arith.constant 0 : index
    %c0_0 = arith.constant 0 : index
    %c0_1 = arith.constant 0 : index
    %1 = vector.load %arg1[%c0, %c0_0, %c0_1] : memref<8x16x1xi32, #tpu.memory_space<vmem>>, vector<8x14x1xi32>
    %c0_i32 = arith.constant 0 : i32
    %2 = vector.broadcast %c0_i32 : i32 to vector<8x14x1xi32>
    %3 = arith.addi %1, %2 : vector<8x14x1xi32>
    %c0_2 = arith.constant 0 : index
    %c0_3 = arith.constant 0 : index
    %c0_4 = arith.constant 0 : index
    %4 = vector.load %arg2[%c0_2, %c0_3, %c0_4] : memref<8x16x1xi32, #tpu.memory_space<vmem>>, vector<8x14x1xi32>
    %c64_i32 = arith.constant 64 : i32
    %5 = vector.broadcast %c64_i32 : i32 to vector<8x14x1xi32>
    %6 = arith.addi %4, %5 : vector<8x14x1xi32>
    %c0_5 = arith.constant 0 : index
    %c0_6 = arith.constant 0 : index
    %c0_7 = arith.constant 0 : index
    %7 = vector.load %arg3[%c0_5, %c0_6, %c0_7] : memref<8x16x1xi32, #tpu.memory_space<vmem>>, vector<8x14x1xi32>
    %c96_i32 = arith.constant 96 : i32
    %8 = vector.broadcast %c96_i32 : i32 to vector<8x14x1xi32>
    %9 = arith.addi %7, %8 : vector<8x14x1xi32>
    %10 = vector.broadcast %3 : vector<8x14x1xi32> to vector<8x14x384xi32>
    %11 = arith.cmpi eq, %0, %10 : vector<8x14x384xi32>
    %12 = vector.broadcast %6 : vector<8x14x1xi32> to vector<8x14x384xi32>
    %13 = arith.cmpi eq, %0, %12 : vector<8x14x384xi32>
    %14 = arith.ori %11, %13 : vector<8x14x384xi1>
    %15 = vector.broadcast %9 : vector<8x14x1xi32> to vector<8x14x384xi32>
    %16 = arith.cmpi eq, %0, %15 : vector<8x14x384xi32>
    %17 = arith.ori %14, %16 : vector<8x14x384xi1>
    %c0_8 = arith.constant 0 : index
    %c1 = arith.constant 1 : index
    %c0_9 = arith.constant 0 : index
    %18 = vector.load %arg1[%c0_8, %c1, %c0_9] : memref<8x16x1xi32, #tpu.memory_space<vmem>>, vector<8x14x1xi32>
    %c128_i32 = arith.constant 128 : i32
    %19 = vector.broadcast %c128_i32 : i32 to vector<8x14x1xi32>
    %20 = arith.addi %18, %19 : vector<8x14x1xi32>
    %c0_10 = arith.constant 0 : index
    %c1_11 = arith.constant 1 : index
    %c0_12 = arith.constant 0 : index
    %21 = vector.load %arg2[%c0_10, %c1_11, %c0_12] : memref<8x16x1xi32, #tpu.memory_space<vmem>>, vector<8x14x1xi32>
    %c192_i32 = arith.constant 192 : i32
    %22 = vector.broadcast %c192_i32 : i32 to vector<8x14x1xi32>
    %23 = arith.addi %21, %22 : vector<8x14x1xi32>
    %c0_13 = arith.constant 0 : index
    %c1_14 = arith.constant 1 : index
    %c0_15 = arith.constant 0 : index
    %24 = vector.load %arg3[%c0_13, %c1_14, %c0_15] : memref<8x16x1xi32, #tpu.memory_space<vmem>>, vector<8x14x1xi32>
    %c224_i32 = arith.constant 224 : i32
    %25 = vector.broadcast %c224_i32 : i32 to vector<8x14x1xi32>
    %26 = arith.addi %24, %25 : vector<8x14x1xi32>
    %27 = vector.broadcast %20 : vector<8x14x1xi32> to vector<8x14x384xi32>
    %28 = arith.cmpi eq, %0, %27 : vector<8x14x384xi32>
    %29 = vector.broadcast %23 : vector<8x14x1xi32> to vector<8x14x384xi32>
    %30 = arith.cmpi eq, %0, %29 : vector<8x14x384xi32>
    %31 = arith.ori %28, %30 : vector<8x14x384xi1>
    %32 = vector.broadcast %26 : vector<8x14x1xi32> to vector<8x14x384xi32>
    %33 = arith.cmpi eq, %0, %32 : vector<8x14x384xi32>
    %34 = arith.ori %31, %33 : vector<8x14x384xi1>
    %35 = arith.ori %17, %34 : vector<8x14x384xi1>
    %c0_16 = arith.constant 0 : index
    %c2 = arith.constant 2 : index
    %c0_17 = arith.constant 0 : index
    %36 = vector.load %arg1[%c0_16, %c2, %c0_17] : memref<8x16x1xi32, #tpu.memory_space<vmem>>, vector<8x14x1xi32>
    %c256_i32 = arith.constant 256 : i32
    %37 = vector.broadcast %c256_i32 : i32 to vector<8x14x1xi32>
    %38 = arith.addi %36, %37 : vector<8x14x1xi32>
    %c0_18 = arith.constant 0 : index
    %c2_19 = arith.constant 2 : index
    %c0_20 = arith.constant 0 : index
    %39 = vector.load %arg2[%c0_18, %c2_19, %c0_20] : memref<8x16x1xi32, #tpu.memory_space<vmem>>, vector<8x14x1xi32>
    %c320_i32 = arith.constant 320 : i32
    %40 = vector.broadcast %c320_i32 : i32 to vector<8x14x1xi32>
    %41 = arith.addi %39, %40 : vector<8x14x1xi32>
    %c0_21 = arith.constant 0 : index
    %c2_22 = arith.constant 2 : index
    %c0_23 = arith.constant 0 : index
    %42 = vector.load %arg3[%c0_21, %c2_22, %c0_23] : memref<8x16x1xi32, #tpu.memory_space<vmem>>, vector<8x14x1xi32>
    %c352_i32 = arith.constant 352 : i32
    %43 = vector.broadcast %c352_i32 : i32 to vector<8x14x1xi32>
    %44 = arith.addi %42, %43 : vector<8x14x1xi32>
    %45 = vector.broadcast %38 : vector<8x14x1xi32> to vector<8x14x384xi32>
    %46 = arith.cmpi eq, %0, %45 : vector<8x14x384xi32>
    %47 = vector.broadcast %41 : vector<8x14x1xi32> to vector<8x14x384xi32>
    %48 = arith.cmpi eq, %0, %47 : vector<8x14x384xi32>
    %49 = arith.ori %46, %48 : vector<8x14x384xi1>
    %50 = vector.broadcast %44 : vector<8x14x1xi32> to vector<8x14x384xi32>
    %51 = arith.cmpi eq, %0, %50 : vector<8x14x384xi32>
    %52 = arith.ori %49, %51 : vector<8x14x384xi1>
    %53 = arith.ori %35, %52 : vector<8x14x384xi1>
    %cst = arith.constant 1.000000e+00 : f32
    %cst_24 = arith.constant 0.000000e+00 : f32
    %54 = vector.broadcast %cst : f32 to vector<8x14x384xf32>
    %55 = vector.broadcast %cst_24 : f32 to vector<8x14x384xf32>
    %56 = arith.select %53, %54, %55 : vector<8x14x384xi1>, vector<8x14x384xf32>
    %c0_25 = arith.constant 0 : index
    %c0_26 = arith.constant 0 : index
    %57 = vector.load %arg4[%c0_25, %c0_26] : memref<384x32xf32, #tpu.memory_space<vmem>>, vector<384x32xf32>
    %cst_27 = arith.constant dense<0.000000e+00> : vector<8x14x32xf32>
    %58 = tpu.matmul %56, %57, %cst_27 {dimension_numbers = #tpu.dot_dimension_numbers<[2], [0], [0, 1], [1], [0, 0, 0, 1, 1, 1], [], []>} : vector<8x14x384xf32>, vector<384x32xf32>, vector<8x14x32xf32> -> vector<8x14x32xf32>
    %cst_28 = arith.constant dense<0xFF800000> : vector<8x32xf32>
    %59 = vector.multi_reduction <maximumf>, %58, %cst_28 [1] : vector<8x14x32xf32> to vector<8x32xf32>
    %c0_29 = arith.constant 0 : index
    %c0_30 = arith.constant 0 : index
    %60 = vector.load %arg5[%c0_29, %c0_30] : memref<1x32xf32, #tpu.memory_space<vmem>>, vector<1x32xf32>
    %61 = vector.broadcast %60 : vector<1x32xf32> to vector<8x32xf32>
    %62 = arith.addf %59, %61 : vector<8x32xf32>
    %63 = math.tanh %62 : vector<8x32xf32>
    %c0_31 = arith.constant 0 : index
    %c0_32 = arith.constant 0 : index
    %64 = vector.load %arg6[%c0_31, %c0_32] : memref<8x32xf32, #tpu.memory_space<vmem>>, vector<8x32xf32>
    tpu.vector_store %arg6[%c0_31, %c0_32], %63 {strides = array<i32>} : memref<8x32xf32, #tpu.memory_space<vmem>>, vector<8x32xf32>,
    return
  }
  func.func @transform_0(%arg0: i32) -> (i32, i32, i32) {
    %c0_i32 = arith.constant 0 : i32
    %c0_i32_0 = arith.constant 0 : i32
    %c0_i32_1 = arith.constant 0 : i32
    return %arg0, %c0_i32, %c0_i32_0 : i32, i32, i32
  }
  func.func @transform_1(%arg0: i32) -> (i32, i32, i32) {
    %c0_i32 = arith.constant 0 : i32
    %c0_i32_0 = arith.constant 0 : i32
    %c0_i32_1 = arith.constant 0 : i32
    return %arg0, %c0_i32, %c0_i32_0 : i32, i32, i32
  }
  func.func @transform_2(%arg0: i32) -> (i32, i32, i32) {
    %c0_i32 = arith.constant 0 : i32
    %c0_i32_0 = arith.constant 0 : i32
    %c0_i32_1 = arith.constant 0 : i32
    return %arg0, %c0_i32, %c0_i32_0 : i32, i32, i32
  }
  func.func @transform_3(%arg0: i32) -> (i32, i32) {
    %c0_i32 = arith.constant 0 : i32
    %c0_i32_0 = arith.constant 0 : i32
    %c0_i32_1 = arith.constant 0 : i32
    return %c0_i32, %c0_i32_0 : i32, i32
  }
  func.func @transform_4(%arg0: i32) -> (i32, i32) {
    %c0_i32 = arith.constant 0 : i32
    %c0_i32_0 = arith.constant 0 : i32
    %c0_i32_1 = arith.constant 0 : i32
    return %c0_i32, %c0_i32_0 : i32, i32
  }
  func.func @transform_5(%arg0: i32) -> (i32, i32) {
    %c0_i32 = arith.constant 0 : i32
    %c0_i32_0 = arith.constant 0 : i32
    return %arg0, %c0_i32 : i32, i32
  }
}

</mosaic_0001>

<bundles_post_ra>
// kernel: encoder_cnn_forward.1
= control target key start
LH: loop header
LB: loop body
LE: loop exit
PB: predicated region body
PF: predicated region fallthrough
CT: control target
= control target key end

     0   :  { %v2567_v0 = vmov 0   ;;  %s6169_s0 = inlined_call_operand.vmem [shape: s32[8,16,1], index: 0, kind: input, shape index: {}]   ;;  %s6170_s1 = inlined_call_operand.vmem [shape: s32[8,16,1], index: 1, kind: input, shape index: {}]   ;;  %s6171_s2 = inlined_call_operand.vmem [shape: s32[8,16,1], index: 2, kind: input, shape index: {}]   ;;  %s6172_s3 = inlined_call_operand.vmem [shape: f32[384,32], index: 3, kind: input, shape index: {}]   ;;  %s6173_s4 = inlined_call_operand.vmem [shape: f32[1,32], index: 4, kind: input, shape index: {}]   ;;  %s6174_s5 = inlined_call_operand.vmem [shape: f32[8,32], index: 5, kind: output, shape index: {}]  }
   0x1   :  { %2533 = vset.pattern.permute.xlu2 %v2567_v0  ;;  %2532 = vset.pattern.permute.xlu1 %v2567_v0  ;;  %v28_v1 = vld [vmem:[%s6169_s0 + $0x20] sm:$0xff]  ;;  %v26_v2 = vld [vmem:[%s6169_s0 + $0x10] sm:$0xff]  ;;  %v29_v4 = vld [vmem:[%s6169_s0 + $0x28] sm:$0x3f] }
   0x2   :  { %v24_v3 = vld [vmem:[%s6169_s0] sm:$0xff]  ;;  %2531 = vset.pattern.permute.xlu0 %v2567_v0  ;;  %117 = vperm.xlu2 %2533, %v28_v1   ;;  %v27_v5 = vld [vmem:[%s6169_s0 + $0x18] sm:$0x3f]  ;;  %v25_v6 = vld [vmem:[%s6169_s0 + $0x8] sm:$0x3f] }
   0x3   :  { %111 = vperm.xlu1 %2532, %v26_v2   ;;  %105 = vperm.xlu0 %2531, %v24_v3   ;;  %v32_v7 = vld [vmem:[%s6169_s0 + $0x40] sm:$0xff]  ;;  %v31_v8 = vld [vmem:[%s6169_s0 + $0x38] sm:$0x3f]  ;;  %v30_v9 = vld [vmem:[%s6169_s0 + $0x30] sm:$0xff] }
   0x4   :  { %v35_v10 = vld [vmem:[%s6169_s0 + $0x58] sm:$0x3f]  ;;  %v34_v11 = vld [vmem:[%s6169_s0 + $0x50] sm:$0xff]  ;;  %v33_v12 = vld [vmem:[%s6169_s0 + $0x48] sm:$0x3f] }
   0x5   :  { %v38_v13 = vld [vmem:[%s6169_s0 + $0x70] sm:$0xff]  ;;  %v37_v14 = vld [vmem:[%s6169_s0 + $0x68] sm:$0x3f]  ;;  %v36_v15 = vld [vmem:[%s6169_s0 + $0x60] sm:$0xff] }
   0x6   :  { %v41_v16 = vld [vmem:[%s6170_s1 + $0x8] sm:$0x3f]  ;;  %v40_v17 = vld [vmem:[%s6170_s1] sm:$0xff]  ;;  %v39_v20 = vld [vmem:[%s6169_s0 + $0x78] sm:$0x3f] }
   0x7   :  { %v57_v18 = vadd.s32 64, %v41_v16  ;;  %v56_v19 = vadd.s32 64, %v40_v17  ;;  %v44_v21 = vld [vmem:[%s6170_s1 + $0x20] sm:$0xff]  ;;  %v43_v22 = vld [vmem:[%s6170_s1 + $0x18] sm:$0x3f]  ;;  %v42_v23 = vld [vmem:[%s6170_s1 + $0x10] sm:$0xff] }
   0x8   :  { %v60_v24 = vadd.s32 64, %v44_v21  ;;  %v59_v25 = vadd.s32 64, %v43_v22  ;;  %v58_v26 = vadd.s32 64, %v42_v23  ;;  %v47_v27 = vld [vmem:[%s6170_s1 + $0x38] sm:$0x3f]  ;;  %v46_v28 = vld [vmem:[%s6170_s1 + $0x30] sm:$0xff]  ;;  %v20_v23 = vlaneseq }
   0x9   :  { %v45_v29 = vld [vmem:[%s6170_s1 + $0x28] sm:$0x3f]  ;;  %v63_v30 = vadd.s32 64, %v47_v27  ;;  %v62_v31 = vadd.s32 64, %v46_v28  ;;  %v50_v33 = vld [vmem:[%s6170_s1 + $0x50] sm:$0xff]  ;;  %v48_v35 = vld [vmem:[%s6170_s1 + $0x40] sm:$0xff] }
   0xa   :  { %120 = vperm.xlu2 %2533, %v29_v4   ;;  %v61_v32 = vadd.s32 64, %v45_v29  ;;  %v49_v34 = vld [vmem:[%s6170_s1 + $0x48] sm:$0x3f]  ;;  %v66_v36 = vadd.s32 64, %v50_v33  ;;  %v64_v38 = vadd.s32 64, %v48_v35  ;;  %v52_v40 = vld [vmem:[%s6170_s1 + $0x60] sm:$0xff] }
   0xb   :  { %114 = vperm.xlu1 %2532, %v27_v5   ;;  %108 = vperm.xlu0 %2531, %v25_v6   ;;  %v65_v37 = vadd.s32 64, %v49_v34  ;;  %v53_v39 = vld [vmem:[%s6170_s1 + $0x68] sm:$0x3f]  ;;  %v51_v41 = vld [vmem:[%s6170_s1 + $0x58] sm:$0x3f]  ;;  %v68_v43 = vadd.s32 64, %v52_v40 }
   0xc   :  { %v69_v42 = vadd.s32 64, %v53_v39  ;;  %v67_v44 = vadd.s32 64, %v51_v41  ;;  %v72_v45 = vld [vmem:[%s6171_s2] sm:$0xff]  ;;  %v55_v46 = vld [vmem:[%s6170_s1 + $0x78] sm:$0x3f]  ;;  %v54_v47 = vld [vmem:[%s6170_s1 + $0x70] sm:$0xff] }
   0xd   :  { %v88_v48 = vadd.s32 96, %v72_v45  ;;  %v71_v49 = vadd.s32 64, %v55_v46  ;;  %v70_v50 = vadd.s32 64, %v54_v47  ;;  %v75_v51 = vld [vmem:[%s6171_s2 + $0x18] sm:$0x3f]  ;;  %v74_v52 = vld [vmem:[%s6171_s2 + $0x10] sm:$0xff] }
   0xe   :  { %v73_v53 = vld [vmem:[%s6171_s2 + $0x8] sm:$0x3f]  ;;  %v91_v54 = vadd.s32 96, %v75_v51  ;;  %v90_v55 = vadd.s32 96, %v74_v52  ;;  %v78_v57 = vld [vmem:[%s6171_s2 + $0x30] sm:$0xff]  ;;  %v76_v60 = vld [vmem:[%s6171_s2 + $0x20] sm:$0xff] }
   0xf   :  { %v89_v56 = vadd.s32 96, %v73_v53  ;;  %v77_v59 = vld [vmem:[%s6171_s2 + $0x28] sm:$0x3f]  ;;  %v94_v61 = vadd.s32 96, %v78_v57  ;;  %v92_v63 = vadd.s32 96, %v76_v60  ;;  %v80_v2 = vld [vmem:[%s6171_s2 + $0x40] sm:$0xff] }
  0x10   :  { %v93_v62 = vadd.s32 96, %v77_v59  ;;  %v81_v0 = vld [vmem:[%s6171_s2 + $0x48] sm:$0x3f]  ;;  %v79_v3 = vld [vmem:[%s6171_s2 + $0x38] sm:$0x3f]  ;;  %v96_v5 = vadd.s32 96, %v80_v2 }
  0x11   :  { %v97_v4 = vadd.s32 96, %v81_v0  ;;  %v95_v6 = vadd.s32 96, %v79_v3  ;;  %v86_v16 = vld [vmem:[%s6171_s2 + $0x70] sm:$0xff]  ;;  %v85_v17 = vld [vmem:[%s6171_s2 + $0x68] sm:$0x3f]  ;;  %v6375_v47 = vmov 0 }
  0x12   :  { %129 = vperm.xlu2 %2533, %v32_v7   ;;  %v84_v7 = vld [vmem:[%s6171_s2 + $0x60] sm:$0xff]  ;;  %v102_v21 = vadd.s32 96, %v86_v16  ;;  %v101_v22 = vadd.s32 96, %v85_v17  ;;  %v491_v39 = vld [vmem:[%s6169_s0 + $0x19] sm:$0x3f]  ;;  %v494_v51 = vld [vmem:[%s6169_s0 + $0x31] sm:$0xff] }
  0x13   :  { %126 = vperm.xlu1 %2532, %v31_v8   ;;  %123 = vperm.xlu0 %2531, %v30_v9   ;;  %v83_v9 = vld [vmem:[%s6171_s2 + $0x58] sm:$0x3f]  ;;  %v488_v27 = vld [vmem:[%s6169_s0 + $0x1] sm:$0xff]  ;;  %v507_v46 = vadd.s32 128, %v491_v39  ;;  %v510_v59 = vadd.s32 128, %v494_v51  ;;  %v6381_v60 = vmov 0 }
  0x14   :  { %v504_v33 = vadd.s32 128, %v488_v27  ;;  %v6383_v3 = vmov 0  ;;  %v6389_v17 = vmov 0  ;;  %v6413_v51 = vmov 0 }
  0x15   :  { %v6434_v27 = vmov 0 }
  0x1a   :  { %138 = vperm.xlu2 %2533, %v35_v10   ;;  %v82_v10 = vld [vmem:[%s6171_s2 + $0x50] sm:$0xff] }
  0x1b   :  { %135 = vperm.xlu1 %2532, %v34_v11   ;;  %132 = vperm.xlu0 %2531, %v33_v12   ;;  %v100_v11 = vadd.s32 96, %v84_v7  ;;  %v99_v12 = vadd.s32 96, %v83_v9  ;;  %v6387_v9 = vmov 0 }
  0x22   :  { %147 = vperm.xlu2 %2533, %v38_v13   ;;  %v98_v13 = vadd.s32 96, %v82_v10  ;;  %v502_v10 = vld [vmem:[%s6169_s0 + $0x71] sm:$0xff] }
  0x23   :  { %144 = vperm.xlu1 %2532, %v37_v14   ;;  %141 = vperm.xlu0 %2531, %v36_v15   ;;  %v87_v14 = vld [vmem:[%s6171_s2 + $0x78] sm:$0x3f] }
  0x2a   :  { %204 = vperm.xlu2 %2533, %v57_v18  }
  0x2b   :  { %201 = vperm.xlu1 %2532, %v56_v19   ;;  %150 = vperm.xlu0 %2531, %v39_v20   ;;  %v103_v20 = vadd.s32 96, %v87_v14 }
  0x32   :  { %213 = vperm.xlu2 %2533, %v60_v24   ;;  %v490_v24 = vld [vmem:[%s6169_s0 + $0x11] sm:$0xff] }
  0x33   :  { %210 = vperm.xlu1 %2532, %v59_v25   ;;  %207 = vperm.xlu0 %2531, %v58_v26   ;;  %v489_v26 = vld [vmem:[%s6169_s0 + $0x9] sm:$0x3f] }
  0x3a   :  { %222 = vperm.xlu2 %2533, %v63_v30   ;;  %v506_v30 = vadd.s32 128, %v490_v24  ;;  %v6393_v24 = vmov 0 }
  0x3b   :  { %219 = vperm.xlu1 %2532, %v62_v31   ;;  %216 = vperm.xlu0 %2531, %v61_v32   ;;  %v2768_v31 = vand.u32 127, %v20_v23  ;;  %v505_v32 = vadd.s32 128, %v489_v26 }
  0x3d   :  { %v2771_v34 = vadd.s32 128, %v2768_v31  ;;  %v2774_v35 = vadd.s32 256, %v2768_v31 }
  0x42   :  { %231 = vperm.xlu2 %2533, %v66_v36   ;;  %v493_v36 = vld [vmem:[%s6169_s0 + $0x29] sm:$0x3f] }
  0x43   :  { %228 = vperm.xlu1 %2532, %v65_v37   ;;  %225 = vperm.xlu0 %2531, %v64_v38   ;;  %v492_v38 = vld [vmem:[%s6169_s0 + $0x21] sm:$0xff] }
  0x44   :  { %v508_v45 = vadd.s32 128, %v492_v38  ;;  %v6401_v38 = vmov 0 }
  0x4a   :  { %240 = vperm.xlu2 %2533, %v69_v42   ;;  %v6371_v42 = vmov 0 }
  0x4b   :  { %237 = vperm.xlu1 %2532, %v68_v43   ;;  %234 = vperm.xlu0 %2531, %v67_v44   ;;  %v509_v43 = vadd.s32 128, %v493_v36  ;;  %v6373_v44 = vmov 0 }
  0x52   :  { %345 = vperm.xlu2 %2533, %v88_v48   ;;  %v496_v48 = vld [vmem:[%s6169_s0 + $0x41] sm:$0xff] }
  0x53   :  { %246 = vperm.xlu1 %2532, %v71_v49   ;;  %243 = vperm.xlu0 %2531, %v70_v50   ;;  %v495_v50 = vld [vmem:[%s6169_s0 + $0x39] sm:$0x3f] }
  0x54   :  { %v511_v57 = vadd.s32 128, %v495_v50 }
  0x5a   :  { %354 = vperm.xlu2 %2533, %v91_v54   ;;  %v6377_v54 = vmov 0 }
  0x5b   :  { %351 = vperm.xlu1 %2532, %v90_v55   ;;  %348 = vperm.xlu0 %2531, %v89_v56   ;;  %v512_v55 = vadd.s32 128, %v496_v48  ;;  %v6379_v56 = vmov 0  ;;  %v529_v48 = vld [vmem:[%s6170_s1 + $0x49] sm:$0x3f] }
  0x5c   :  { %v2710_v58 = vpop.permute.xlu2 %117 }
  0x5d   :  { %vm164_vm9 = vcmp.eq.s32.totalorder %v2768_v31, %v2710_v58  ;;  %vm165_vm13 = vcmp.eq.s32.totalorder %v2771_v34, %v2710_v58  ;;  %vm166_vm15 = vcmp.eq.s32.totalorder %v2774_v35, %v2710_v58  ;;  %v498_v58 = vld [vmem:[%s6169_s0 + $0x51] sm:$0xff] }
  0x62   :  { %363 = vperm.xlu2 %2533, %v94_v61   ;;  %v499_v61 = vld [vmem:[%s6169_s0 + $0x59] sm:$0x3f] }
  0x63   :  { %360 = vperm.xlu1 %2532, %v93_v62   ;;  %357 = vperm.xlu0 %2531, %v92_v63   ;;  %v497_v63 = vld [vmem:[%s6169_s0 + $0x49] sm:$0x3f] }
  0x64   :  { %v2721_v1 = vpop.permute.xlu2 %120  ;;  %v513_v7 = vadd.s32 128, %v497_v63 }
  0x6a   :  { %372 = vperm.xlu2 %2533, %v97_v4   ;;  %v515_v4 = vadd.s32 128, %v499_v61 }
  0x6b   :  { %369 = vperm.xlu1 %2532, %v96_v5   ;;  %366 = vperm.xlu0 %2531, %v95_v6   ;;  %v6385_v5 = vmov 0  ;;  %v514_v6 = vadd.s32 128, %v498_v58  ;;  %v6417_v58 = vmov 0 }
  0x6c   :  { %v2732_v8 = vpop.permute.xlu2 %129 }
  0x72   :  { %381 = vperm.xlu2 %2533, %v100_v11  }
  0x73   :  { %378 = vperm.xlu1 %2532, %v99_v12   ;;  %375 = vperm.xlu0 %2531, %v98_v13   ;;  %v501_v12 = vld [vmem:[%s6169_s0 + $0x69] sm:$0x3f]  ;;  %v500_v13 = vld [vmem:[%s6169_s0 + $0x61] sm:$0xff] }
  0x74   :  { %v2743_v15 = vpop.permute.xlu2 %138  ;;  %v516_v23 = vadd.s32 128, %v500_v13  ;;  %v532_v13 = vld [vmem:[%s6170_s1 + $0x61] sm:$0xff] }
  0x75   :  { %v2751_v18 = vpop.permute.xlu1 %111  ;;  %v2753_v19 = vpop.permute.xlu0 %105 }
  0x7a   :  { %390 = vperm.xlu2 %2533, %v103_v20   ;;  %v518_v20 = vadd.s32 128, %v502_v10  ;;  %v533_v10 = vld [vmem:[%s6170_s1 + $0x69] sm:$0x3f] }
  0x7b   :  { %387 = vperm.xlu1 %2532, %v102_v21   ;;  %384 = vperm.xlu0 %2531, %v101_v22   ;;  %v6391_v21 = vmov 0  ;;  %v517_v22 = vadd.s32 128, %v501_v12  ;;  %v527_v12 = vld [vmem:[%s6170_s1 + $0x39] sm:$0x3f] }
  0x7c   :  { %v2758_v25 = vpop.permute.xlu2 %147 }
  0x7d   :  { %v2766_v28 = vpop.permute.xlu1 %114  ;;  %v109_v29 = vpop.permute.xlu0 %108 }
  0x7e   :  { %vm155_vm0 = vcmp.eq.s32.totalorder %v2768_v31, %v109_v29  ;;  %vm156_vm4 = vcmp.eq.s32.totalorder %v2771_v34, %v109_v29  ;;  %vm157_vm6 = vcmp.eq.s32.totalorder %v2774_v35, %v109_v29  ;;  %v543_v29 = vadd.s32 192, %v527_v12 }
  0x82   :  { %591 = vperm.xlu2 %2533, %v506_v30   ;;  %v521_v30 = vld [vmem:[%s6170_s1 + $0x9] sm:$0x3f] }
  0x83   :  { %588 = vperm.xlu1 %2532, %v505_v32   ;;  %585 = vperm.xlu0 %2531, %v504_v33   ;;  %v503_v33 = vld [vmem:[%s6169_s0 + $0x79] sm:$0x3f]  ;;  %v537_v39 = vadd.s32 192, %v521_v30  ;;  %v6436_v30 = vmov 0 }
  0x84   :  { %v205_v37 = vpop.permute.xlu2 %204 }
  0x85   :  { %vm251_vm1 = vcmp.eq.s32.totalorder %v2768_v31, %v205_v37  ;;  %vm252_vm2 = vcmp.eq.s32.totalorder %v2771_v34, %v205_v37  ;;  %vm253_vm3 = vcmp.eq.s32.totalorder %v2774_v35, %v205_v37  ;;  %v127_v40 = vpop.permute.xlu1 %126  ;;  %v2789_v41 = vpop.permute.xlu0 %123 }
  0x86   :  { %vm2792_vm5 = vmor %vm155_vm0, %vm251_vm1 }
  0x87   :  { %v6372_v42 = vsel %vm2792_vm5, 4294967295, %v6371_v42  ;;  %vm2797_vm7 = vmor %vm156_vm4, %vm252_vm2  ;;  %vm173_vm2 = vcmp.eq.s32.totalorder %v2768_v31, %v127_v40 }
  0x88   :  { %v6374_v44 = vsel %vm2797_vm7, 4294967295, %v6373_v44  ;;  %vm2801_vm8 = vmor %vm157_vm6, %vm253_vm3 }
  0x89   :  { %v6376_v47 = vsel %vm2801_vm8, 4294967295, %v6375_v47  ;;  %vm162_vm8 = vcmp.eq.s32.totalorder %v2771_v34, %v2766_v28 }
  0x8a   :  { %600 = vperm.xlu2 %2533, %v509_v43  }
  0x8b   :  { %597 = vperm.xlu1 %2532, %v508_v45   ;;  %594 = vperm.xlu0 %2531, %v507_v46   ;;  %v519_v45 = vadd.s32 128, %v503_v33  ;;  %v6405_v46 = vmov 0  ;;  %v6440_v33 = vmov 0 }
  0x8c   :  { %v214_v49 = vpop.permute.xlu2 %213 }
  0x8d   :  { %vm260_vm10 = vcmp.eq.s32.totalorder %v2768_v31, %v214_v49  ;;  %vm261_vm11 = vcmp.eq.s32.totalorder %v2771_v34, %v214_v49  ;;  %vm262_vm12 = vcmp.eq.s32.totalorder %v2774_v35, %v214_v49  ;;  %v136_v52 = vpop.permute.xlu1 %135  ;;  %v2819_v53 = vpop.permute.xlu0 %132  ;;  %v528_v49 = vld [vmem:[%s6170_s1 + $0x41] sm:$0xff] }
  0x8e   :  { %vm2823_vm14 = vmor %vm164_vm9, %vm260_vm10  ;;  %vm174_vm9 = vcmp.eq.s32.totalorder %v2771_v34, %v127_v40 }
  0x8f   :  { %v6378_v54 = vsel %vm2823_vm14, 4294967295, %v6377_v54  ;;  %vm2829_vm0 = vmor %vm165_vm13, %vm261_vm11  ;;  %vm175_vm11 = vcmp.eq.s32.totalorder %v2774_v35, %v127_v40  ;;  %v6403_v40 = vmov 0 }
  0x90   :  { %v6380_v56 = vsel %vm2829_vm0, 4294967295, %v6379_v56  ;;  %vm2833_vm1 = vmor %vm166_vm15, %vm262_vm12  ;;  %vm182_vm15 = vcmp.eq.s32.totalorder %v2768_v31, %v136_v52 }
  0x91   :  { %v6382_v60 = vsel %vm2833_vm1, 4294967295, %v6381_v60  ;;  %vm152_vm1 = vcmp.eq.s32.totalorder %v2768_v31, %v2753_v19 }
  0x92   :  { %609 = vperm.xlu2 %2533, %v512_v55   ;;  %v523_v55 = vld [vmem:[%s6170_s1 + $0x19] sm:$0x3f] }
  0x93   :  { %606 = vperm.xlu1 %2532, %v511_v57   ;;  %603 = vperm.xlu0 %2531, %v510_v59   ;;  %v522_v57 = vld [vmem:[%s6170_s1 + $0x11] sm:$0xff]  ;;  %v6415_v59 = vmov 0 }
  0x94   :  { %v223_v62 = vpop.permute.xlu2 %222 }
  0x95   :  { %vm269_vm3 = vcmp.eq.s32.totalorder %v2768_v31, %v223_v62  ;;  %vm270_vm4 = vcmp.eq.s32.totalorder %v2771_v34, %v223_v62  ;;  %vm271_vm6 = vcmp.eq.s32.totalorder %v2774_v35, %v223_v62  ;;  %v2850_v0 = vpop.permute.xlu1 %144  ;;  %v2852_v2 = vpop.permute.xlu0 %141 }
  0x96   :  { %vm2855_vm10 = vmor %vm173_vm2, %vm269_vm3 }
  0x97   :  { %v6384_v3 = vsel %vm2855_vm10, 4294967295, %v6383_v3  ;;  %vm2860_vm12 = vmor %vm174_vm9, %vm270_vm4 }
  0x98   :  { %v6386_v5 = vsel %vm2860_vm12, 4294967295, %v6385_v5  ;;  %vm2864_vm13 = vmor %vm175_vm11, %vm271_vm6  ;;  %vm183_vm6 = vcmp.eq.s32.totalorder %v2771_v34, %v136_v52 }
  0x99   :  { %v6388_v9 = vsel %vm2864_vm13, 4294967295, %v6387_v9  ;;  %vm184_vm13 = vcmp.eq.s32.totalorder %v2774_v35, %v136_v52 }
  0x9a   :  { %618 = vperm.xlu2 %2533, %v515_v4   ;;  %v538_v4 = vadd.s32 192, %v522_v57  ;;  %v6455_v57 = vmov 0 }
  0x9b   :  { %615 = vperm.xlu1 %2532, %v514_v6   ;;  %612 = vperm.xlu0 %2531, %v513_v7   ;;  %v6421_v6 = vmov 0  ;;  %v6423_v7 = vmov 0 }
  0x9c   :  { %v232_v11 = vpop.permute.xlu2 %231 }
  0x9d   :  { %vm278_vm2 = vcmp.eq.s32.totalorder %v2768_v31, %v232_v11  ;;  %vm279_vm3 = vcmp.eq.s32.totalorder %v2771_v34, %v232_v11  ;;  %vm280_vm4 = vcmp.eq.s32.totalorder %v2774_v35, %v232_v11  ;;  %v202_v14 = vpop.permute.xlu1 %201  ;;  %v2881_v16 = vpop.permute.xlu0 %150 }
  0x9e   :  { %vm2884_vm9 = vmor %vm182_vm15, %vm278_vm2  ;;  %vm248_vm11 = vcmp.eq.s32.totalorder %v2768_v31, %v202_v14  ;;  %vm249_vm10 = vcmp.eq.s32.totalorder %v2771_v34, %v202_v14  ;;  %vm250_vm2 = vcmp.eq.s32.totalorder %v2774_v35, %v202_v14  ;;  %v526_v14 = vld [vmem:[%s6170_s1 + $0x31] sm:$0xff] }
  0x9f   :  { %v6390_v17 = vsel %vm2884_vm9, 4294967295, %v6389_v17  ;;  %vm2890_vm12 = vmor %vm183_vm6, %vm279_vm3  ;;  %vm153_vm9 = vcmp.eq.s32.totalorder %v2771_v34, %v2753_v19  ;;  %vm154_vm6 = vcmp.eq.s32.totalorder %v2774_v35, %v2753_v19  ;;  %v520_v19 = vld [vmem:[%s6170_s1 + $0x1] sm:$0xff] }
  0xa0   :  { %v6392_v21 = vsel %vm2890_vm12, 4294967295, %v6391_v21  ;;  %vm2897_vm15 = vmor %vm184_vm13, %vm280_vm4  ;;  %v536_v43 = vadd.s32 192, %v520_v19 }
  0xa1   :  { %v6394_v24 = vsel %vm2897_vm15, 4294967295, %v6393_v24  ;;  %vm2904_vm3 = vmor %vm152_vm1, %vm248_vm11  ;;  %vm191_vm1 = vcmp.eq.s32.totalorder %v2768_v31, %v2850_v0  ;;  %vm192_vm11 = vcmp.eq.s32.totalorder %v2771_v34, %v2850_v0  ;;  %vm193_vm15 = vcmp.eq.s32.totalorder %v2774_v35, %v2850_v0 }
  0xa2   :  { %vm2910_vm12 = vmor %vm153_vm9, %vm249_vm10  ;;  %627 = vperm.xlu2 %2533, %v518_v20   ;;  %v539_v0 = vadd.s32 192, %v523_v55  ;;  %v525_v20 = vld [vmem:[%s6170_s1 + $0x29] sm:$0x3f] }
  0xa3   :  { %vm2914_vm13 = vmor %vm154_vm6, %vm250_vm2  ;;  %624 = vperm.xlu1 %2532, %v517_v22   ;;  %621 = vperm.xlu0 %2531, %v516_v23   ;;  %v6432_v22 = vmov 0  ;;  %v541_v19 = vadd.s32 192, %v525_v20 }
  0xa4   :  { %v241_v32 = vpop.permute.xlu2 %240 }
  0xa5   :  { %vm287_vm10 = vcmp.eq.s32.totalorder %v2768_v31, %v241_v32  ;;  %vm288_vm4 = vcmp.eq.s32.totalorder %v2771_v34, %v241_v32  ;;  %vm289_vm9 = vcmp.eq.s32.totalorder %v2774_v35, %v241_v32  ;;  %v211_v36 = vpop.permute.xlu1 %210  ;;  %v208_v37 = vpop.permute.xlu0 %207  ;;  %v542_v32 = vadd.s32 192, %v526_v14 }
  0xa6   :  { %vm2934_vm2 = vmor %vm191_vm1, %vm287_vm10  ;;  %vm257_vm6 = vcmp.eq.s32.totalorder %v2768_v31, %v211_v36  ;;  %vm258_vm14 = vcmp.eq.s32.totalorder %v2771_v34, %v211_v36  ;;  %vm161_vm1 = vcmp.eq.s32.totalorder %v2768_v31, %v2766_v28 }
  0xa7   :  { %v6402_v38 = vsel %vm2934_vm2, 4294967295, %v6401_v38  ;;  %vm2941_vm0 = vmor %vm192_vm11, %vm288_vm4  ;;  %vm259_vm2 = vcmp.eq.s32.totalorder %v2774_v35, %v211_v36  ;;  %vm254_vm11 = vcmp.eq.s32.totalorder %v2768_v31, %v208_v37  ;;  %v6443_v36 = vmov 0 }
  0xa8   :  { %v6404_v40 = vsel %vm2941_vm0, 4294967295, %v6403_v40  ;;  %vm2948_vm10 = vmor %vm193_vm15, %vm289_vm9  ;;  %vm163_vm0 = vcmp.eq.s32.totalorder %v2774_v35, %v2766_v28  ;;  %vm255_vm15 = vcmp.eq.s32.totalorder %v2771_v34, %v208_v37  ;;  %vm158_vm9 = vcmp.eq.s32.totalorder %v2768_v31, %v2751_v18  ;;  %v524_v28 = vld [vmem:[%s6170_s1 + $0x21] sm:$0xff] }
  0xa9   :  { %v6406_v46 = vsel %vm2948_vm10, 4294967295, %v6405_v46  ;;  %vm2955_vm4 = vmor %vm161_vm1, %vm257_vm6  ;;  %vm256_vm6 = vcmp.eq.s32.totalorder %v2774_v35, %v208_v37  ;;  %v540_v63 = vadd.s32 192, %v524_v28  ;;  %v552_v37 = vld [vmem:[%s6171_s2 + $0x1] sm:$0xff] }
  0xaa   :  { %vm2962_vm7 = vmor %vm162_vm8, %vm258_vm14  ;;  %684 = vperm.xlu2 %2533, %v537_v39   ;;  %vm159_vm8 = vcmp.eq.s32.totalorder %v2771_v34, %v2751_v18  ;;  %v530_v39 = vld [vmem:[%s6170_s1 + $0x51] sm:$0xff] }
  0xab   :  { %vm2969_vm10 = vmor %vm163_vm0, %vm259_vm2  ;;  %681 = vperm.xlu1 %2532, %v536_v43   ;;  %630 = vperm.xlu0 %2531, %v519_v45   ;;  %vm160_vm0 = vcmp.eq.s32.totalorder %v2774_v35, %v2751_v18  ;;  %v6419_v18 = vmov 0  ;;  %v546_v55 = vadd.s32 192, %v530_v39  ;;  %v6477_v39 = vmov 0 }
  0xac   :  { %vm2979_vm14 = vmor %vm158_vm9, %vm254_vm11  ;;  %v346_v52 = vpop.permute.xlu2 %345 }
  0xad   :  { %v6414_v51 = vsel %vm2979_vm14, 4294967295, %v6413_v51  ;;  %vm2991_vm2 = vmor %vm159_vm8, %vm255_vm15  ;;  %vm392_vm1 = vcmp.eq.s32.totalorder %v2768_v31, %v346_v52  ;;  %vm393_vm11 = vcmp.eq.s32.totalorder %v2771_v34, %v346_v52  ;;  %v220_v61 = vpop.permute.xlu1 %219  ;;  %v217_v62 = vpop.permute.xlu0 %216  ;;  %vm394_vm5 = vcmp.eq.s32.totalorder %v2774_v35, %v346_v52 }
  0xae   :  { %v6416_v59 = vsel %vm2991_vm2, 4294967295, %v6415_v59  ;;  %vm2999_vm9 = vmor %vm160_vm0, %vm256_vm6  ;;  %vm266_vm8 = vcmp.eq.s32.totalorder %v2768_v31, %v220_v61  ;;  %vm267_vm6 = vcmp.eq.s32.totalorder %v2771_v34, %v220_v61  ;;  %vm170_vm0 = vcmp.eq.s32.totalorder %v2768_v31, %v2789_v41 }
  0xaf   :  { %v6418_v58 = vsel %vm2999_vm9, 4294967295, %v6417_v58  ;;  %vm3006_vm15 = vmor %vm2904_vm3, %vm392_vm1  ;;  %vm268_vm1 = vcmp.eq.s32.totalorder %v2774_v35, %v220_v61  ;;  %v6453_v52 = vmov 0  ;;  %v545_v61 = vadd.s32 192, %v529_v48 }
  0xb0   :  { %v6420_v18 = vsel %vm3006_vm15, 4294967295, %v6419_v18  ;;  %vm3013_vm2 = vmor %vm2910_vm12, %vm393_vm11  ;;  %vm171_vm15 = vcmp.eq.s32.totalorder %v2771_v34, %v2789_v41  ;;  %vm263_vm11 = vcmp.eq.s32.totalorder %v2768_v31, %v217_v62  ;;  %v6481_v48 = vmov 0 }
  0xb1   :  { %v6422_v6 = vsel %vm3013_vm2, 4294967295, %v6421_v6  ;;  %vm3022_vm3 = vmor %vm2914_vm13, %vm394_vm5  ;;  %vm172_vm2 = vcmp.eq.s32.totalorder %v2774_v35, %v2789_v41  ;;  %vm264_vm5 = vcmp.eq.s32.totalorder %v2771_v34, %v217_v62  ;;  %vm167_vm13 = vcmp.eq.s32.totalorder %v2768_v31, %v2721_v1 }
  0xb2   :  { %v6424_v7 = vsel %vm3022_vm3, 4294967295, %v6423_v7  ;;  %vm3029_vm12 = vmor %vm170_vm0, %vm266_vm8  ;;  %693 = vperm.xlu2 %2533, %v540_v63   ;;  %v6457_v63 = vmov 0 }
  0xb3   :  { %6425 = vst [vmem:[#allocation2_spill] sm:$0xff] %v6424_v7  ;;  %vm3036_vm9 = vmor %vm171_vm15, %vm267_vm6  ;;  %690 = vperm.xlu1 %2532, %v539_v0   ;;  %687 = vperm.xlu0 %2531, %v538_v4   ;;  %vm265_vm15 = vcmp.eq.s32.totalorder %v2774_v35, %v217_v62  ;;  %vm168_vm6 = vcmp.eq.s32.totalorder %v2771_v34, %v2721_v1  ;;  %v544_v62 = vadd.s32 192, %v528_v49  ;;  %v6459_v0 = vmov 0 }
  0xb4   :  { %vm3046_vm8 = vmor %vm172_vm2, %vm268_vm1  ;;  %v355_v41 = vpop.permute.xlu2 %354  ;;  %vm169_vm1 = vcmp.eq.s32.totalorder %v2774_v35, %v2721_v1  ;;  %v6438_v1 = vmov 0  ;;  %v6465_v4 = vmov 0  ;;  %v6488_v49 = vmov 0 }
  0xb5   :  { %vm3061_vm2 = vmor %vm167_vm13, %vm263_vm11  ;;  %vm401_vm0 = vcmp.eq.s32.totalorder %v2768_v31, %v355_v41  ;;  %v229_v23 = vpop.permute.xlu1 %228  ;;  %v226_v26 = vpop.permute.xlu0 %225  ;;  %vm402_vm14 = vcmp.eq.s32.totalorder %v2771_v34, %v355_v41  ;;  %vm403_vm13 = vcmp.eq.s32.totalorder %v2774_v35, %v355_v41  ;;  %v531_v41 = vld [vmem:[%s6170_s1 + $0x59] sm:$0x3f]  ;;  %v6710_v7 = vmov 0 }
  0xb6   :  { %v6433_v22 = vsel %vm3061_vm2, 4294967295, %v6432_v22  ;;  %vm3070_vm3 = vmor %vm168_vm6, %vm264_vm5  ;;  %vm275_vm5 = vcmp.eq.s32.totalorder %v2768_v31, %v229_v23 }
  0xb7   :  { %v6435_v27 = vsel %vm3070_vm3, 4294967295, %v6434_v27  ;;  %vm3075_vm11 = vmor %vm169_vm1, %vm265_vm15  ;;  %vm276_vm15 = vcmp.eq.s32.totalorder %v2771_v34, %v229_v23  ;;  %vm179_vm1 = vcmp.eq.s32.totalorder %v2768_v31, %v2819_v53 }
  0xb8   :  { %v6437_v30 = vsel %vm3075_vm11, 4294967295, %v6436_v30  ;;  %vm3082_vm2 = vmor %vm2955_vm4, %vm401_vm0  ;;  %vm277_vm4 = vcmp.eq.s32.totalorder %v2774_v35, %v229_v23  ;;  %vm177_vm0 = vcmp.eq.s32.totalorder %v2771_v34, %v2732_v8 }
  0xb9   :  { %v6439_v1 = vsel %vm3082_vm2, 4294967295, %v6438_v1  ;;  %vm3089_vm6 = vmor %vm2962_vm7, %vm402_vm14  ;;  %vm180_vm7 = vcmp.eq.s32.totalorder %v2771_v34, %v2819_v53 }
  0xba   :  { %v6441_v33 = vsel %vm3089_vm6, 4294967295, %v6440_v33  ;;  %vm3098_vm11 = vmor %vm2969_vm10, %vm403_vm13  ;;  %702 = vperm.xlu2 %2533, %v543_v29   ;;  %vm181_vm10 = vcmp.eq.s32.totalorder %v2774_v35, %v2819_v53  ;;  %v6450_v53 = vmov 0  ;;  %v6475_v29 = vmov 0 }
  0xbb   :  { %6442 = vst [vmem:[#allocation3_spill] sm:$0xff] %v6441_v33  ;;  %v6444_v36 = vsel %vm3098_vm11, 4294967295, %v6443_v36  ;;  %vm3105_vm14 = vmor %vm179_vm1, %vm275_vm5  ;;  %699 = vperm.xlu1 %2532, %v542_v32   ;;  %696 = vperm.xlu0 %2531, %v541_v19   ;;  %vm273_vm5 = vcmp.eq.s32.totalorder %v2771_v34, %v226_v26  ;;  %vm176_vm1 = vcmp.eq.s32.totalorder %v2768_v31, %v2732_v8  ;;  %v548_v32 = vadd.s32 192, %v532_v13  ;;  %v566_v33 = vld [vmem:[%s6171_s2 + $0x71] sm:$0xff] }
  0xbc   :  { %6445 = vst [vmem:[#allocation4_spill] sm:$0xff] %v6444_v36  ;;  %vm3115_vm13 = vmor %vm180_vm7, %vm276_vm15  ;;  %v364_v45 = vpop.permute.xlu2 %363  ;;  %vm274_vm7 = vcmp.eq.s32.totalorder %v2774_v35, %v226_v26  ;;  %vm6452_vm11 = vcmp.eq.s32.totalorder %v2768_v31, %v226_v26  ;;  %v547_v19 = vadd.s32 192, %v531_v41  ;;  %v6516_v26 = vmov 0  ;;  %v1018_v41 = vld [vmem:[%s6169_s0 + $0x12] sm:$0xff] }
  0xbd   :  { %vm3130_vm15 = vmor %vm181_vm10, %vm277_vm4  ;;  %v238_v50 = vpop.permute.xlu1 %237  ;;  %v235_v28 = vpop.permute.xlu0 %234  ;;  %vm410_vm2 = vcmp.eq.s32.totalorder %v2768_v31, %v364_v45  ;;  %vm178_vm4 = vcmp.eq.s32.totalorder %v2774_v35, %v2732_v8  ;;  %vm411_vm3 = vcmp.eq.s32.totalorder %v2771_v34, %v364_v45  ;;  %v6462_v8 = vmov 0 }
  0xbe   :  { %v6451_v53 = vsel %vm3130_vm15, 4294967295, %v6450_v53  ;;  %vm3139_vm6 = vmor %vm176_vm1, %vm6452_vm11  ;;  %vm412_vm11 = vcmp.eq.s32.totalorder %v2774_v35, %v364_v45  ;;  %v6479_v45 = vmov 0 }
  0xbf   :  { %v6454_v52 = vsel %vm3139_vm6, 4294967295, %v6453_v52  ;;  %vm3146_vm10 = vmor %vm177_vm0, %vm273_vm5  ;;  %vm284_vm0 = vcmp.eq.s32.totalorder %v2768_v31, %v238_v50 }
  0xc0   :  { %v6456_v57 = vsel %vm3146_vm10, 4294967295, %v6455_v57  ;;  %vm3151_vm15 = vmor %vm178_vm4, %vm274_vm7  ;;  %vm285_vm7 = vcmp.eq.s32.totalorder %v2771_v34, %v238_v50  ;;  %vm188_vm4 = vcmp.eq.s32.totalorder %v2768_v31, %v2852_v2 }
  0xc1   :  { %v6458_v63 = vsel %vm3151_vm15, 4294967295, %v6457_v63  ;;  %vm3158_vm1 = vmor %vm3029_vm12, %vm410_vm2  ;;  %vm185_vm2 = vcmp.eq.s32.totalorder %v2768_v31, %v2743_v15 }
  0xc2   :  { %v6460_v0 = vsel %vm3158_vm1, 4294967295, %v6459_v0  ;;  %vm3165_vm5 = vmor %vm3036_vm9, %vm411_vm3  ;;  %711 = vperm.xlu2 %2533, %v546_v55   ;;  %vm189_vm9 = vcmp.eq.s32.totalorder %v2771_v34, %v2852_v2  ;;  %vm283_vm1 = vcmp.eq.s32.totalorder %v2774_v35, %v235_v28 }
  0xc3   :  { %6461 = vst [vmem:[#allocation5_spill] sm:$0xff] %v6460_v0  ;;  %v6463_v8 = vsel %vm3165_vm5, 4294967295, %v6462_v8  ;;  %vm3174_vm12 = vmor %vm3046_vm8, %vm412_vm11  ;;  %708 = vperm.xlu1 %2532, %v545_v61   ;;  %705 = vperm.xlu0 %2531, %v544_v62   ;;  %vm281_vm8 = vcmp.eq.s32.totalorder %v2768_v31, %v235_v28  ;;  %vm190_vm11 = vcmp.eq.s32.totalorder %v2774_v35, %v2852_v2  ;;  %v549_v2 = vadd.s32 192, %v533_v10  ;;  %v1030_v0 = vld [vmem:[%s6169_s0 + $0x72] sm:$0xff] }
  0xc4   :  { %6464 = vst [vmem:[#allocation6_spill] sm:$0xff] %v6463_v8  ;;  %v6466_v4 = vsel %vm3174_vm12, 4294967295, %v6465_v4  ;;  %vm3184_vm3 = vmor %vm188_vm4, %vm284_vm0  ;;  %v373_v12 = vpop.permute.xlu2 %372  ;;  %vm282_vm4 = vcmp.eq.s32.totalorder %v2771_v34, %v235_v28  ;;  %vm6472_vm12 = vcmp.eq.s32.totalorder %v2774_v35, %v238_v50  ;;  %v535_v50 = vld [vmem:[%s6170_s1 + $0x79] sm:$0x3f]  ;;  %v534_v28 = vld [vmem:[%s6170_s1 + $0x71] sm:$0xff]  ;;  %v568_v10 = vadd.s32 224, %v552_v37 }
  0xc5   :  { %6467 = vst [vmem:[#allocation7_spill] sm:$0xff] %v6466_v4  ;;  %vm3199_vm0 = vmor %vm189_vm9, %vm285_vm7  ;;  %v247_v20 = vpop.permute.xlu1 %246  ;;  %v244_v23 = vpop.permute.xlu0 %243  ;;  %vm186_vm7 = vcmp.eq.s32.totalorder %v2771_v34, %v2743_v15  ;;  %vm419_vm15 = vcmp.eq.s32.totalorder %v2768_v31, %v373_v12  ;;  %vm420_vm10 = vcmp.eq.s32.totalorder %v2771_v34, %v373_v12  ;;  %v551_v13 = vadd.s32 192, %v535_v50  ;;  %v553_v37 = vld [vmem:[%s6171_s2 + $0x9] sm:$0x3f]  ;;  %v4343_v8 = vld [vmem:[%s6172_s3 + $0xd0] sm:$0xff] }
  0xc6   :  { %vm3208_vm5 = vmor %vm190_vm11, %vm6472_vm12  ;;  %vm187_vm12 = vcmp.eq.s32.totalorder %v2774_v35, %v2743_v15  ;;  %v6484_v15 = vmov 0  ;;  %v6541_v62 = vmov 0 }
  0xc7   :  { %vm3215_vm9 = vmor %vm185_vm2, %vm281_vm8  ;;  %vm421_vm2 = vcmp.eq.s32.totalorder %v2774_v35, %v373_v12  ;;  %v6495_v12 = vmov 0 }
  0xc8   :  { %v6476_v29 = vsel %vm3215_vm9, 4294967295, %v6475_v29  ;;  %vm3222_vm11 = vmor %vm186_vm7, %vm282_vm4  ;;  %vm293_vm9 = vcmp.eq.s32.totalorder %v2768_v31, %v247_v20 }
  0xc9   :  { %v6478_v39 = vsel %vm3222_vm11, 4294967295, %v6477_v39  ;;  %vm3227_vm6 = vmor %vm187_vm12, %vm283_vm1  ;;  %vm294_vm1 = vcmp.eq.s32.totalorder %v2771_v34, %v247_v20  ;;  %vm196_vm11 = vcmp.eq.s32.totalorder %v2774_v35, %v2758_v25 }
  0xca   :  { %v6480_v45 = vsel %vm3227_vm6, 4294967295, %v6479_v45  ;;  %vm3234_vm8 = vmor %vm3105_vm14, %vm419_vm15  ;;  %720 = vperm.xlu2 %2533, %v549_v2   ;;  %vm197_vm14 = vcmp.eq.s32.totalorder %v2768_v31, %v2881_v16  ;;  %vm6487_vm15 = vnez %v6451_v53  ;;  %v6503_v2 = vmov 0 }
  0xcb   :  { %v6482_v48 = vsel %vm3234_vm8, 4294967295, %v6481_v48  ;;  %vm3241_vm4 = vmor %vm3115_vm13, %vm420_vm10  ;;  %717 = vperm.xlu1 %2532, %v548_v32   ;;  %714 = vperm.xlu0 %2531, %v547_v19   ;;  %vm295_vm13 = vcmp.eq.s32.totalorder %v2774_v35, %v247_v20  ;;  %vm198_vm10 = vcmp.eq.s32.totalorder %v2771_v34, %v2881_v16  ;;  %vm292_vm8 = vcmp.eq.s32.totalorder %v2774_v35, %v244_v23  ;;  %v554_v19 = vld [vmem:[%s6171_s2 + $0x11] sm:$0xff] }
  0xcc   :  { %6483 = vst [vmem:[#allocation8_spill] sm:$0xff] %v6482_v48  ;;  %v6485_v15 = vsel %vm3241_vm4, 4294967295, %v6484_v15  ;;  %vm3253_vm7 = vmor %vm6487_vm15, %vm421_vm2  ;;  %v382_v43 = vpop.permute.xlu2 %381  ;;  %vm290_vm2 = vcmp.eq.s32.totalorder %v2768_v31, %v244_v23  ;;  %vm199_vm15 = vcmp.eq.s32.totalorder %v2774_v35, %v2881_v16  ;;  %vm291_vm4 = vcmp.eq.s32.totalorder %v2771_v34, %v244_v23  ;;  %v1081_v23 = vld [vmem:[%s6171_s2 + $0xa] sm:$0x3f] }
  0xcd   :  { %6486 = vst [vmem:[#allocation9_spill] sm:$0xff] %v6485_v15  ;;  %v6489_v49 = vsel %vm3253_vm7, 4294967295, %v6488_v49  ;;  %vm3266_vm12 = vmor %vm197_vm14, %vm293_vm9  ;;  %v352_v55 = vpop.permute.xlu1 %351  ;;  %v349_v61 = vpop.permute.xlu0 %348  ;;  %vm194_vm9 = vcmp.eq.s32.totalorder %v2768_v31, %v2758_v25  ;;  %v550_v16 = vadd.s32 192, %v534_v28  ;;  %vm428_vm6 = vcmp.eq.s32.totalorder %v2768_v31, %v382_v43 }
  0xce   :  { %6490 = vst [vmem:[#allocation10_spill] sm:$0xff] %v6489_v49  ;;  %vm3275_vm7 = vmor %vm198_vm10, %vm294_vm1  ;;  %vm195_vm1 = vcmp.eq.s32.totalorder %v2771_v34, %v2758_v25  ;;  %v555_v25 = vld [vmem:[%s6171_s2 + $0x19] sm:$0x3f]  ;;  %v6506_v32 = vmov 0  ;;  %v6513_v28 = vmov 0  ;;  %v6533_v53 = vmov 0 }
  0xcf   :  { %vm3282_vm14 = vmor %vm199_vm15, %vm295_vm13  ;;  %vm429_vm15 = vcmp.eq.s32.totalorder %v2771_v34, %v382_v43  ;;  %v6618_v20 = vmov 0  ;;  %v6653_v49 = vmov 0  ;;  %v6668_v48 = vmov 0 }
  0xd0   :  { %v6496_v12 = vsel %vm3282_vm14, 4294967295, %v6495_v12  ;;  %vm3289_vm10 = vmor %vm194_vm9, %vm290_vm2  ;;  %vm430_vm2 = vcmp.eq.s32.totalorder %v2774_v35, %v382_v43  ;;  %v6509_v43 = vmov 0 }
  0xd1   :  { %vm3296_vm13 = vmor %vm195_vm1, %vm291_vm4  ;;  %vm398_vm4 = vcmp.eq.s32.totalorder %v2768_v31, %v352_v55 }
  0xd2   :  { %vm3301_vm14 = vmor %vm196_vm11, %vm292_vm8  ;;  %825 = vperm.xlu2 %2533, %v568_v10   ;;  %vm399_vm8 = vcmp.eq.s32.totalorder %v2771_v34, %v352_v55  ;;  %v571_v10 = vadd.s32 224, %v555_v25  ;;  %v556_v25 = vld [vmem:[%s6171_s2 + $0x21] sm:$0xff] }
  0xd3   :  { %vm3308_vm9 = vmor %vm3184_vm3, %vm428_vm6  ;;  %726 = vperm.xlu1 %2532, %v551_v13   ;;  %723 = vperm.xlu0 %2531, %v550_v16   ;;  %vm400_vm3 = vcmp.eq.s32.totalorder %v2774_v35, %v352_v55  ;;  %v570_v55 = vadd.s32 224, %v554_v19  ;;  %v569_v13 = vadd.s32 224, %v553_v37  ;;  %v6525_v16 = vmov 0 }
  0xd4   :  { %v6504_v2 = vsel %vm3308_vm9, 4294967295, %v6503_v2  ;;  %vm3318_vm11 = vmor %vm3199_vm0, %vm429_vm15  ;;  %v391_v11 = vpop.permute.xlu2 %390  ;;  %vm6512_vm0 = vnez %v6414_v51  ;;  %vm395_vm15 = vcmp.eq.s32.totalorder %v2768_v31, %v349_v61  ;;  %v6519_v51 = vmov 0 }
  0xd5   :  { %6505 = vst [vmem:[#allocation11_spill] sm:$0xff] %v6504_v2  ;;  %v6507_v32 = vsel %vm3318_vm11, 4294967295, %v6506_v32  ;;  %vm3331_vm6 = vmor %vm3208_vm5, %vm430_vm2  ;;  %v361_v14 = vpop.permute.xlu1 %360  ;;  %v358_v50 = vpop.permute.xlu0 %357  ;;  %vm6515_vm11 = vnez %v6416_v59  ;;  %vm396_vm5 = vcmp.eq.s32.totalorder %v2771_v34, %v349_v61  ;;  %vm6518_vm2 = vnez %v6418_v58 }
  0xd6   :  { %6508 = vst [vmem:[#allocation12_spill] sm:$0xff] %v6507_v32  ;;  %v6510_v43 = vsel %vm3331_vm6, 4294967295, %v6509_v43  ;;  %vm3338_vm1 = vmor %vm6512_vm0, %vm398_vm4  ;;  %vm397_vm4 = vcmp.eq.s32.totalorder %v2774_v35, %v349_v61  ;;  %vm6521_vm0 = vnez %v6372_v42  ;;  %v6522_v59 = vmov 0  ;;  %v558_v42 = vld [vmem:[%s6171_s2 + $0x31] sm:$0xff]  ;;  %v557_v61 = vld [vmem:[%s6171_s2 + $0x29] sm:$0x3f] }
  0xd7   :  { %6511 = vst [vmem:[#allocation13_spill] sm:$0xff] %v6510_v43  ;;  %v6514_v28 = vsel %vm3338_vm1, 4294967295, %v6513_v28  ;;  %vm3345_vm9 = vmor %vm6515_vm11, %vm399_vm8  ;;  %vm437_vm11 = vcmp.eq.s32.totalorder %v2768_v31, %v391_v11  ;;  %vm6524_vm8 = vnez %v6374_v44  ;;  %v6528_v58 = vmov 0  ;;  %v1023_v43 = vld [vmem:[%s6169_s0 + $0x3a] sm:$0x3f] }
  0xd8   :  { %v6517_v26 = vsel %vm3345_vm9, 4294967295, %v6516_v26  ;;  %vm3352_vm6 = vmor %vm6518_vm2, %vm400_vm3  ;;  %vm438_vm3 = vcmp.eq.s32.totalorder %v2771_v34, %v391_v11  ;;  %vm6527_vm2 = vnez %v6376_v47  ;;  %v6530_v44 = vmov 0 }
  0xd9   :  { %v6520_v51 = vsel %vm3352_vm6, 4294967295, %v6519_v51  ;;  %vm3359_vm1 = vmor %vm6521_vm0, %vm395_vm15  ;;  %vm439_vm15 = vcmp.eq.s32.totalorder %v2774_v35, %v391_v11  ;;  %vm407_vm0 = vcmp.eq.s32.totalorder %v2768_v31, %v361_v14  ;;  %v6537_v37 = vmov 0 }
  0xda   :  { %v6523_v59 = vsel %vm3359_vm1, 4294967295, %v6522_v59  ;;  %vm3366_vm9 = vmor %vm6524_vm8, %vm396_vm5  ;;  %834 = vperm.xlu2 %2533, %v571_v10   ;;  %v574_v10 = vadd.s32 224, %v558_v42  ;;  %v559_v42 = vld [vmem:[%s6171_s2 + $0x39] sm:$0x3f]  ;;  %v6650_v32 = vmov 0 }
  0xdb   :  { %v6526_v16 = vsel %vm3366_vm9, 4294967295, %v6525_v16  ;;  %vm3373_vm6 = vmor %vm6527_vm2, %vm397_vm4  ;;  %831 = vperm.xlu1 %2532, %v570_v55   ;;  %828 = vperm.xlu0 %2531, %v569_v13   ;;  %vm409_vm2 = vcmp.eq.s32.totalorder %v2774_v35, %v361_v14  ;;  %v573_v55 = vadd.s32 224, %v557_v61  ;;  %v572_v13 = vadd.s32 224, %v556_v25 }
  0xdc   :  { %v6529_v58 = vsel %vm3373_vm6, 4294967295, %v6528_v58  ;;  %vm3383_vm5 = vmor %vm3266_vm12, %vm437_vm11  ;;  %v3388_v47 = vpop.permute.xlu2 %591  ;;  %vm408_vm12 = vcmp.eq.s32.totalorder %v2771_v34, %v361_v14  ;;  %vm6536_vm11 = vnez %v6496_v12  ;;  %v6544_v12 = vmov 0 }
  0xdd   :  { %v6531_v44 = vsel %vm3383_vm5, 4294967295, %v6530_v44  ;;  %vm3398_vm4 = vmor %vm3275_vm7, %vm438_vm3  ;;  %v370_v11 = vpop.permute.xlu1 %369  ;;  %v367_v19 = vpop.permute.xlu0 %366  ;;  %vm6540_vm5 = vnez %v6433_v22  ;;  %vm404_vm7 = vcmp.eq.s32.totalorder %v2768_v31, %v358_v50  ;;  %vm6543_vm3 = vnez %v6435_v27 }
  0xde   :  { %6532 = vst [vmem:[#allocation14_spill] sm:$0xff] %v6531_v44  ;;  %v6534_v53 = vsel %vm3398_vm4, 4294967295, %v6533_v53  ;;  %vm3405_vm8 = vmor %vm6536_vm11, %vm439_vm15  ;;  %vm405_vm15 = vcmp.eq.s32.totalorder %v2771_v34, %v358_v50  ;;  %vm6547_vm11 = vnez %v6437_v30  ;;  %v6548_v22 = vmov 0 }
  0xdf   :  { %6535 = vst [vmem:[#allocation15_spill] sm:$0xff] %v6534_v53  ;;  %v6538_v37 = vsel %vm3405_vm8, 4294967295, %v6537_v37  ;;  %vm3412_vm6 = vmor %vm6540_vm5, %vm407_vm0  ;;  %vm406_vm5 = vcmp.eq.s32.totalorder %v2774_v35, %v358_v50  ;;  %vm6551_vm0 = vnez %v6378_v54  ;;  %v6552_v14 = vmov 0  ;;  %v1016_v54 = vld [vmem:[%s6169_s0 + $0x2] sm:$0xff]  ;;  %v1021_v53 = vld [vmem:[%s6169_s0 + $0x2a] sm:$0x3f] }
  0xe0   :  { %6539 = vst [vmem:[#allocation16_spill] sm:$0xff] %v6538_v37  ;;  %v6542_v62 = vsel %vm3412_vm6, 4294967295, %v6541_v62  ;;  %vm3419_vm4 = vmor %vm6543_vm3, %vm408_vm12  ;;  %vm416_vm12 = vcmp.eq.s32.totalorder %v2768_v31, %v370_v11  ;;  %vm6554_vm3 = vnez %v6380_v56  ;;  %v6555_v27 = vmov 0  ;;  %v560_v50 = vld [vmem:[%s6171_s2 + $0x41] sm:$0xff] }
  0xe1   :  { %v6545_v12 = vsel %vm3419_vm4, 4294967295, %v6544_v12  ;;  %vm3426_vm8 = vmor %vm6547_vm11, %vm409_vm2  ;;  %vm417_vm2 = vcmp.eq.s32.totalorder %v2771_v34, %v370_v11  ;;  %v6558_v30 = vmov 0  ;;  %v6637_v44 = vmov 0 }
  0xe2   :  { %6546 = vst [vmem:[#allocation17_spill] sm:$0xff] %v6545_v12  ;;  %v6549_v22 = vsel %vm3426_vm8, 4294967295, %v6548_v22  ;;  %vm3433_vm6 = vmor %vm6551_vm0, %vm404_vm7  ;;  %843 = vperm.xlu2 %2533, %v574_v10   ;;  %vm6557_vm7 = vnez %v6382_v60  ;;  %vm418_vm0 = vcmp.eq.s32.totalorder %v2774_v35, %v370_v11  ;;  %v6561_v60 = vmov 0  ;;  %v1624_v12 = vld [vmem:[%s6172_s3 + $0x100] sm:$0xff] }
  0xe3   :  { %6550 = vst [vmem:[#allocation18_spill] sm:$0xff] %v6549_v22  ;;  %v6553_v14 = vsel %vm3433_vm6, 4294967295, %v6552_v14  ;;  %vm3440_vm4 = vmor %vm6554_vm3, %vm405_vm15  ;;  %840 = vperm.xlu1 %2532, %v573_v55   ;;  %837 = vperm.xlu0 %2531, %v572_v13   ;;  %vm6560_vm15 = vnez %v6454_v52  ;;  %v6565_v11 = vmov 0  ;;  %v1032_v10 = vadd.s32 256, %v1016_v54  ;;  %v1048_v54 = vld [vmem:[%s6170_s1 + $0x2] sm:$0xff]  ;;  %v4516_v22 = vld [vmem:[%s6172_s3 + $0xb0] sm:$0xff] }
  0xe4   :  { %v6556_v27 = vsel %vm3440_vm4, 4294967295, %v6555_v27  ;;  %vm3450_vm11 = vmor %vm6557_vm7, %vm406_vm5  ;;  %v3455_v56 = vpop.permute.xlu2 %600  ;;  %vm413_vm5 = vcmp.eq.s32.totalorder %v2768_v31, %v367_v19  ;;  %vm6564_vm7 = vnez %v6456_v57  ;;  %vm414_vm4 = vcmp.eq.s32.totalorder %v2771_v34, %v367_v19 }
  0xe5   :  { %v6559_v30 = vsel %vm3450_vm11, 4294967295, %v6558_v30  ;;  %vm3465_vm3 = vmor %vm6560_vm15, %vm416_vm12  ;;  %v379_v61 = vpop.permute.xlu1 %378  ;;  %v376_v25 = vpop.permute.xlu0 %375  ;;  %vm6568_vm6 = vnez %v6458_v63  ;;  %v6569_v52 = vmov 0  ;;  %vm415_vm12 = vcmp.eq.s32.totalorder %v2774_v35, %v367_v19 }
  0xe6   :  { %v6562_v60 = vsel %vm3465_vm3, 4294967295, %v6561_v60  ;;  %vm3472_vm11 = vmor %vm6564_vm7, %vm417_vm2  ;;  %v576_v55 = vadd.s32 224, %v560_v50  ;;  %v575_v13 = vadd.s32 224, %v559_v42  ;;  %vm6572_vm15 = vnez %v6384_v3  ;;  %v1017_v50 = vld [vmem:[%s6169_s0 + $0xa] sm:$0x3f] }
  0xe7   :  { %6563 = vst [vmem:[#allocation19_spill] sm:$0xff] %v6562_v60  ;;  %v6566_v11 = vsel %vm3472_vm11, 4294967295, %v6565_v11  ;;  %vm3479_vm8 = vmor %vm6568_vm6, %vm418_vm0  ;;  %v6573_v57 = vmov 0  ;;  %vm425_vm2 = vcmp.eq.s32.totalorder %v2768_v31, %v379_v61  ;;  %vm6576_vm7 = vnez %v6386_v5  ;;  %v1049_v5 = vld [vmem:[%s6170_s1 + $0xa] sm:$0x3f] }
  0xe8   :  { %6567 = vst [vmem:[#allocation20_spill] sm:$0xff] %v6566_v11  ;;  %v6570_v52 = vsel %vm3479_vm8, 4294967295, %v6569_v52  ;;  %vm3486_vm3 = vmor %vm6572_vm15, %vm413_vm5  ;;  %v6577_v63 = vmov 0  ;;  %vm426_vm6 = vcmp.eq.s32.totalorder %v2771_v34, %v379_v61  ;;  %vm6580_vm0 = vnez %v6388_v9  ;;  %v4652_v11 = vld [vmem:[%s6172_s3 + $0x90] sm:$0xff] }
  0xe9   :  { %6571 = vst [vmem:[#allocation21_spill] sm:$0xff] %v6570_v52  ;;  %v6574_v57 = vsel %vm3486_vm3, 4294967295, %v6573_v57  ;;  %vm3493_vm11 = vmor %vm6576_vm7, %vm414_vm4  ;;  %v6581_v19 = vmov 0  ;;  %vm427_vm5 = vcmp.eq.s32.totalorder %v2774_v35, %v379_v61  ;;  %vm6584_vm15 = vnez %v6476_v29  ;;  %v4647_v52 = vld [vmem:[%s6172_s3 + $0x10] sm:$0xff] }
  0xea   :  { %6575 = vst [vmem:[#allocation22_spill] sm:$0xff] %v6574_v57  ;;  %v6578_v63 = vsel %vm3493_vm11, 4294967295, %v6577_v63  ;;  %vm3500_vm8 = vmor %vm6580_vm0, %vm415_vm12  ;;  %1113 = vperm.xlu2 %2533, %v1032_v10   ;;  %v6585_v3 = vmov 0  ;;  %vm422_vm4 = vcmp.eq.s32.totalorder %v2768_v31, %v376_v25  ;;  %vm6588_vm12 = vnez %v6478_v39 }
  0xeb   :  { %6579 = vst [vmem:[#allocation23_spill] sm:$0xff] %v6578_v63  ;;  %v6582_v19 = vsel %vm3500_vm8, 4294967295, %v6581_v19  ;;  %vm3507_vm3 = vmor %vm6584_vm15, %vm425_vm2  ;;  %849 = vperm.xlu1 %2532, %v576_v55   ;;  %846 = vperm.xlu0 %2531, %v575_v13   ;;  %v6589_v9 = vmov 0  ;;  %vm423_vm0 = vcmp.eq.s32.totalorder %v2771_v34, %v376_v25  ;;  %vm6592_vm2 = vnez %v6480_v45 }
  0xec   :  { %6583 = vst [vmem:[#allocation24_spill] sm:$0xff] %v6582_v19  ;;  %v6586_v3 = vsel %vm3507_vm3, 4294967295, %v6585_v3  ;;  %vm3517_vm7 = vmor %vm6588_vm12, %vm426_vm6  ;;  %v3522_v29 = vpop.permute.xlu2 %609  ;;  %v6593_v39 = vmov 0  ;;  %vm424_vm6 = vcmp.eq.s32.totalorder %v2774_v35, %v376_v25  ;;  %vm6596_vm12 = vnez %v6390_v17 }
  0xed   :  { %6587 = vst [vmem:[#allocation25_spill] sm:$0xff] %v6586_v3  ;;  %v6590_v9 = vsel %vm3517_vm7, 4294967295, %v6589_v9  ;;  %vm3532_vm15 = vmor %vm6592_vm2, %vm427_vm5  ;;  %v388_v42 = vpop.permute.xlu1 %387  ;;  %v385_v61 = vpop.permute.xlu0 %384  ;;  %v6597_v10 = vmov 0  ;;  %v1065_v55 = vadd.s32 320, %v1049_v5  ;;  %vm6600_vm8 = vnez %v6392_v21  ;;  %v1054_v3 = vld [vmem:[%s6170_s1 + $0x32] sm:$0xff] }
  0xee   :  { %6591 = vst [vmem:[#allocation26_spill] sm:$0xff] %v6590_v9  ;;  %v6594_v39 = vsel %vm3532_vm15, 4294967295, %v6593_v39  ;;  %vm3539_vm7 = vmor %vm6596_vm12, %vm422_vm4  ;;  %vm434_vm3 = vcmp.eq.s32.totalorder %v2768_v31, %v388_v42  ;;  %v6601_v45 = vmov 0  ;;  %vm435_vm5 = vcmp.eq.s32.totalorder %v2771_v34, %v388_v42 }
  0xef   :  { %6595 = vst [vmem:[#allocation27_spill] sm:$0xff] %v6594_v39  ;;  %v6598_v10 = vsel %vm3539_vm7, 4294967295, %v6597_v10  ;;  %vm3546_vm11 = vmor %vm6600_vm8, %vm423_vm0  ;;  %v1064_v25 = vadd.s32 320, %v1048_v54  ;;  %v1033_v13 = vadd.s32 256, %v1017_v50  ;;  %vm6604_vm2 = vnez %v6394_v24  ;;  %v1080_v50 = vld [vmem:[%s6171_s2 + $0x2] sm:$0xff] }
  0xf0   :  { %6599 = vst [vmem:[#allocation28_spill] sm:$0xff] %v6598_v10  ;;  %v6602_v45 = vsel %vm3546_vm11, 4294967295, %v6601_v45  ;;  %vm3553_vm15 = vmor %vm6604_vm2, %vm424_vm6  ;;  %v6605_v17 = vmov 0  ;;  %vm436_vm4 = vcmp.eq.s32.totalorder %v2774_v35, %v388_v42  ;;  %v6608_v21 = vmov 0 }
  0xf1   :  { %6603 = vst [vmem:[#allocation29_spill] sm:$0xff] %v6602_v45  ;;  %v6606_v17 = vsel %vm3553_vm15, 4294967295, %v6605_v17  ;;  %vm3560_vm12 = vmor %vm3289_vm10, %vm434_vm3  ;;  %vm431_vm8 = vcmp.eq.s32.totalorder %v2768_v31, %v385_v61  ;;  %v6611_v5 = vmov 0  ;;  %vm432_vm6 = vcmp.eq.s32.totalorder %v2771_v34, %v385_v61 }
  0xf2   :  { %6607 = vst [vmem:[#allocation30_spill] sm:$0xff] %v6606_v17  ;;  %v6609_v21 = vsel %vm3560_vm12, 4294967295, %v6608_v21  ;;  %vm3567_vm0 = vmor %vm3296_vm13, %vm435_vm5  ;;  %1212 = vperm.xlu2 %2533, %v1065_v55   ;;  %v6614_v24 = vmov 0  ;;  %vm433_vm10 = vcmp.eq.s32.totalorder %v2774_v35, %v385_v61  ;;  %vm6617_vm13 = vnez %v6402_v38 }
  0xf3   :  { %6610 = vst [vmem:[#allocation31_spill] sm:$0xff] %v6609_v21  ;;  %v6612_v5 = vsel %vm3567_vm0, 4294967295, %v6611_v5  ;;  %vm3574_vm2 = vmor %vm3301_vm14, %vm436_vm4  ;;  %1209 = vperm.xlu1 %2532, %v1064_v25   ;;  %1116 = vperm.xlu0 %2531, %v1033_v13   ;;  %vm6621_vm14 = vnez %v6404_v40  ;;  %v6622_v42 = vmov 0  ;;  %vm6625_vm4 = vnez %v6406_v46  ;;  %v1019_v40 = vld [vmem:[%s6169_s0 + $0x1a] sm:$0x3f]  ;;  %v1082_v46 = vld [vmem:[%s6171_s2 + $0x12] sm:$0xff] }
  0xf4   :  { %6613 = vst [vmem:[#allocation32_spill] sm:$0xff] %v6612_v5  ;;  %v6615_v24 = vsel %vm3574_vm2, 4294967295, %v6614_v24  ;;  %vm3584_vm3 = vmor %vm6617_vm13, %vm431_vm8  ;;  %v3588_v54 = vpop.permute.xlu2 %618  ;;  %v6626_v55 = vmov 0  ;;  %v1034_v25 = vadd.s32 256, %v1018_v41  ;;  %v1097_v13 = vadd.s32 352, %v1081_v23  ;;  %v1050_v21 = vld [vmem:[%s6170_s1 + $0x12] sm:$0xff] }
  0xf5   :  { %6616 = vst [vmem:[#allocation33_spill] sm:$0xff] %v6615_v24  ;;  %v6619_v20 = vsel %vm3584_vm3, 4294967295, %v6618_v20  ;;  %vm3598_vm5 = vmor %vm6621_vm14, %vm432_vm6  ;;  %v589_v38 = vpop.permute.xlu1 %588  ;;  %v3602_v61 = vpop.permute.xlu0 %585  ;;  %v1096_v24 = vadd.s32 352, %v1080_v50  ;;  %v1035_v50 = vadd.s32 256, %v1019_v40  ;;  %v6643_v17 = vmov 0 }
  0xf6   :  { %6620 = vst [vmem:[#allocation34_spill] sm:$0xff] %v6619_v20  ;;  %v6623_v42 = vsel %vm3598_vm5, 4294967295, %v6622_v42  ;;  %vm3606_vm8 = vmor %vm6625_vm4, %vm433_vm10  ;;  %v1020_v20 = vld [vmem:[%s6169_s0 + $0x22] sm:$0xff]  ;;  %vm635_vm6 = vcmp.eq.s32.totalorder %v2768_v31, %v589_v38  ;;  %vm636_vm4 = vcmp.eq.s32.totalorder %v2771_v34, %v589_v38  ;;  %vm637_vm0 = vcmp.eq.s32.totalorder %v2774_v35, %v589_v38 }
  0xf7   :  { %6624 = vst [vmem:[#allocation35_spill] sm:$0xff] %v6623_v42  ;;  %v6627_v55 = vsel %vm3606_vm8, 4294967295, %v6626_v55  ;;  %v1051_v42 = vld [vmem:[%s6170_s1 + $0x1a] sm:$0x3f]  ;;  %v1036_v37 = vadd.s32 256, %v1020_v20  ;;  %v1084_v38 = vld [vmem:[%s6171_s2 + $0x22] sm:$0xff] }
  0xf8   :  { %6628 = vst [vmem:[#allocation36_spill] sm:$0xff] %v6627_v55  ;;  %v1083_v20 = vld [vmem:[%s6171_s2 + $0x1a] sm:$0x3f]  ;;  %v1100_v39 = vadd.s32 352, %v1084_v38  ;;  %v1022_v38 = vld [vmem:[%s6169_s0 + $0x32] sm:$0xff]  ;;  %v6685_v57 = vmov 0 }
  0xf9   :  { %v1099_v9 = vadd.s32 352, %v1083_v20  ;;  %v6641_v20 = vmov 0  ;;  %v1038_v10 = vadd.s32 256, %v1022_v38  ;;  %v6647_v38 = vmov 0 }
  0xfa   :  { %1119 = vperm.xlu2 %2533, %v1034_v25   ;;  %v1098_v25 = vadd.s32 352, %v1082_v46  ;;  %v6629_v46 = vmov 0 }
  0xfb   :  { %1356 = vperm.xlu1 %2532, %v1097_v13   ;;  %1353 = vperm.xlu0 %2531, %v1096_v24   ;;  %v1066_v24 = vadd.s32 320, %v1050_v21  ;;  %v1052_v13 = vld [vmem:[%s6170_s1 + $0x22] sm:$0xff] }
  0xfc   :  { %v3613_v5 = vpop.permute.xlu2 %627 }
  0xfd   :  { %v598_v41 = vpop.permute.xlu1 %597  ;;  %v3621_v23 = vpop.permute.xlu0 %594 }
  0xfe   :  { %vm646_vm5 = vcmp.eq.s32.totalorder %v2774_v35, %v598_v41 }
 0x102   :  { %1122 = vperm.xlu2 %2533, %v1035_v50   ;;  %v1068_v50 = vadd.s32 320, %v1052_v13 }
 0x103   :  { %1359 = vperm.xlu1 %2532, %v1098_v25   ;;  %1215 = vperm.xlu0 %2531, %v1066_v24   ;;  %v6631_v25 = vmov 0  ;;  %v1067_v24 = vadd.s32 320, %v1051_v42 }
 0x104   :  { %v685_v55 = vpop.permute.xlu2 %684 }
 0x105   :  { %vm731_vm10 = vcmp.eq.s32.totalorder %v2768_v31, %v685_v55  ;;  %vm732_vm13 = vcmp.eq.s32.totalorder %v2771_v34, %v685_v55  ;;  %vm733_vm14 = vcmp.eq.s32.totalorder %v2774_v35, %v685_v55  ;;  %v607_v21 = vpop.permute.xlu1 %606  ;;  %v3636_v40 = vpop.permute.xlu0 %603  ;;  %v6633_v55 = vmov 0 }
 0x106   :  { %vm3639_vm2 = vmor %vm635_vm6, %vm731_vm10  ;;  %vm655_vm11 = vcmp.eq.s32.totalorder %v2774_v35, %v607_v21 }
 0x107   :  { %v6630_v46 = vsel %vm3639_vm2, 4294967295, %v6629_v46  ;;  %vm3644_vm12 = vmor %vm636_vm4, %vm732_vm13 }
 0x108   :  { %v6632_v25 = vsel %vm3644_vm12, 4294967295, %v6631_v25  ;;  %vm3648_vm8 = vmor %vm637_vm0, %vm733_vm14  ;;  %vm644_vm0 = vcmp.eq.s32.totalorder %v2768_v31, %v598_v41  ;;  %vm645_vm14 = vcmp.eq.s32.totalorder %v2771_v34, %v598_v41  ;;  %v1053_v41 = vld [vmem:[%s6170_s1 + $0x2a] sm:$0x3f] }
 0x109   :  { %v6634_v55 = vsel %vm3648_vm8, 4294967295, %v6633_v55  ;;  %v1069_v45 = vadd.s32 320, %v1053_v41  ;;  %v1085_v41 = vld [vmem:[%s6171_s2 + $0x2a] sm:$0x3f]  ;;  %vm642_vm8 = vcmp.eq.s32.totalorder %v2771_v34, %v3621_v23 }
 0x10a   :  { %1221 = vperm.xlu2 %2533, %v1068_v50   ;;  %v6635_v50 = vmov 0  ;;  %v1101_v2 = vadd.s32 352, %v1085_v41  ;;  %v1056_v41 = vld [vmem:[%s6170_s1 + $0x42] sm:$0xff] }
 0x10b   :  { %1218 = vperm.xlu1 %2532, %v1067_v24   ;;  %1125 = vperm.xlu0 %2531, %v1036_v37   ;;  %v1037_v24 = vadd.s32 256, %v1021_v53 }
 0x10c   :  { %v694_v13 = vpop.permute.xlu2 %693 }
 0x10d   :  { %vm740_vm6 = vcmp.eq.s32.totalorder %v2768_v31, %v694_v13  ;;  %vm741_vm10 = vcmp.eq.s32.totalorder %v2771_v34, %v694_v13  ;;  %vm742_vm13 = vcmp.eq.s32.totalorder %v2774_v35, %v694_v13  ;;  %v616_v37 = vpop.permute.xlu1 %615  ;;  %v3665_v42 = vpop.permute.xlu0 %612  ;;  %v6639_v13 = vmov 0 }
 0x10e   :  { %vm3668_vm4 = vmor %vm644_vm0, %vm740_vm6 }
 0x10f   :  { %v6636_v50 = vsel %vm3668_vm4, 4294967295, %v6635_v50  ;;  %vm3673_vm3 = vmor %vm645_vm14, %vm741_vm10  ;;  %vm632_vm4 = vcmp.eq.s32.totalorder %v2768_v31, %v3602_v61 }
 0x110   :  { %v6638_v44 = vsel %vm3673_vm3, 4294967295, %v6637_v44  ;;  %vm3677_vm15 = vmor %vm646_vm5, %vm742_vm13  ;;  %vm653_vm5 = vcmp.eq.s32.totalorder %v2768_v31, %v607_v21  ;;  %vm654_vm13 = vcmp.eq.s32.totalorder %v2771_v34, %v607_v21  ;;  %v1086_v21 = vld [vmem:[%s6171_s2 + $0x32] sm:$0xff] }
 0x111   :  { %v6640_v13 = vsel %vm3677_vm15, 4294967295, %v6639_v13 }
 0x112   :  { %1128 = vperm.xlu2 %2533, %v1037_v24   ;;  %v1070_v24 = vadd.s32 320, %v1054_v3 }
 0x113   :  { %1365 = vperm.xlu1 %2532, %v1100_v39   ;;  %1362 = vperm.xlu0 %2531, %v1099_v9  }
 0x114   :  { %v703_v53 = vpop.permute.xlu2 %702 }
 0x115   :  { %vm749_vm0 = vcmp.eq.s32.totalorder %v2768_v31, %v703_v53  ;;  %vm750_vm6 = vcmp.eq.s32.totalorder %v2771_v34, %v703_v53  ;;  %vm751_vm10 = vcmp.eq.s32.totalorder %v2774_v35, %v703_v53  ;;  %v3694_v9 = vpop.permute.xlu1 %624  ;;  %v3696_v39 = vpop.permute.xlu0 %621  ;;  %v6645_v53 = vmov 0 }
 0x116   :  { %vm3699_vm14 = vmor %vm653_vm5, %vm749_vm0 }
 0x117   :  { %v6642_v20 = vsel %vm3699_vm14, 4294967295, %v6641_v20  ;;  %vm3704_vm7 = vmor %vm654_vm13, %vm750_vm6 }
 0x118   :  { %v6644_v17 = vsel %vm3704_vm7, 4294967295, %v6643_v17  ;;  %vm3708_vm15 = vmor %vm655_vm11, %vm751_vm10  ;;  %vm662_vm11 = vcmp.eq.s32.totalorder %v2768_v31, %v616_v37  ;;  %vm663_vm10 = vcmp.eq.s32.totalorder %v2771_v34, %v616_v37  ;;  %vm664_vm7 = vcmp.eq.s32.totalorder %v2774_v35, %v616_v37 }
 0x119   :  { %v6646_v53 = vsel %vm3708_vm15, 4294967295, %v6645_v53 }
 0x11a   :  { %1227 = vperm.xlu2 %2533, %v1070_v24   ;;  %v1039_v24 = vadd.s32 256, %v1023_v43  ;;  %v1026_v43 = vld [vmem:[%s6169_s0 + $0x52] sm:$0xff] }
 0x11b   :  { %1224 = vperm.xlu1 %2532, %v1069_v45   ;;  %1131 = vperm.xlu0 %2531, %v1038_v10  }
 0x11c   :  { %v712_v3 = vpop.permute.xlu2 %711 }
 0x11d   :  { %vm758_vm5 = vcmp.eq.s32.totalorder %v2768_v31, %v712_v3  ;;  %vm759_vm0 = vcmp.eq.s32.totalorder %v2771_v34, %v712_v3  ;;  %vm760_vm6 = vcmp.eq.s32.totalorder %v2774_v35, %v712_v3  ;;  %v682_v10 = vpop.permute.xlu1 %681  ;;  %v3725_v45 = vpop.permute.xlu0 %630  ;;  %v1102_v3 = vadd.s32 352, %v1086_v21 }
 0x11e   :  { %vm3728_vm13 = vmor %vm662_vm11, %vm758_vm5  ;;  %vm728_vm15 = vcmp.eq.s32.totalorder %v2768_v31, %v682_v10  ;;  %vm729_vm3 = vcmp.eq.s32.totalorder %v2771_v34, %v682_v10  ;;  %vm730_vm5 = vcmp.eq.s32.totalorder %v2774_v35, %v682_v10 }
 0x11f   :  { %v6648_v38 = vsel %vm3728_vm13, 4294967295, %v6647_v38  ;;  %vm3734_vm14 = vmor %vm663_vm10, %vm759_vm0  ;;  %vm633_vm13 = vcmp.eq.s32.totalorder %v2771_v34, %v3602_v61  ;;  %vm634_vm10 = vcmp.eq.s32.totalorder %v2774_v35, %v3602_v61  ;;  %v1055_v61 = vld [vmem:[%s6170_s1 + $0x3a] sm:$0x3f] }
 0x120   :  { %6649 = vst [vmem:[#allocation37_spill] sm:$0xff] %v6648_v38  ;;  %v6651_v32 = vsel %vm3734_vm14, 4294967295, %v6650_v32  ;;  %vm3741_vm11 = vmor %vm664_vm7, %vm760_vm6  ;;  %v6665_v38 = vmov 0 }
 0x121   :  { %6652 = vst [vmem:[#allocation38_spill] sm:$0xff] %v6651_v32  ;;  %v6654_v49 = vsel %vm3741_vm11, 4294967295, %v6653_v49  ;;  %vm3748_vm0 = vmor %vm632_vm4, %vm728_vm15  ;;  %vm671_vm15 = vcmp.eq.s32.totalorder %v2768_v31, %v3694_v9  ;;  %v1072_v32 = vadd.s32 320, %v1056_v41  ;;  %vm673_vm11 = vcmp.eq.s32.totalorder %v2774_v35, %v3694_v9 }
 0x122   :  { %6655 = vst [vmem:[#allocation39_spill] sm:$0xff] %v6654_v49  ;;  %vm3754_vm14 = vmor %vm633_vm13, %vm729_vm3  ;;  %1134 = vperm.xlu2 %2533, %v1039_v24   ;;  %v1024_v49 = vld [vmem:[%s6169_s0 + $0x42] sm:$0xff]  ;;  %vm672_vm13 = vcmp.eq.s32.totalorder %v2771_v34, %v3694_v9  ;;  %v1058_v9 = vld [vmem:[%s6170_s1 + $0x52] sm:$0xff] }
 0x123   :  { %vm3758_vm7 = vmor %vm634_vm10, %vm730_vm5  ;;  %1371 = vperm.xlu1 %2532, %v1102_v3   ;;  %1368 = vperm.xlu0 %2531, %v1101_v2   ;;  %v6662_v3 = vmov 0  ;;  %v1040_v15 = vadd.s32 256, %v1024_v49 }
 0x124   :  { %v721_v10 = vpop.permute.xlu2 %720 }
 0x125   :  { %vm767_vm3 = vcmp.eq.s32.totalorder %v2768_v31, %v721_v10  ;;  %vm768_vm4 = vcmp.eq.s32.totalorder %v2771_v34, %v721_v10  ;;  %vm769_vm6 = vcmp.eq.s32.totalorder %v2774_v35, %v721_v10  ;;  %v691_v2 = vpop.permute.xlu1 %690  ;;  %v688_v24 = vpop.permute.xlu0 %687  ;;  %v1071_v10 = vadd.s32 320, %v1055_v61 }
 0x126   :  { %vm3778_vm5 = vmor %vm671_vm15, %vm767_vm3  ;;  %vm737_vm10 = vcmp.eq.s32.totalorder %v2768_v31, %v691_v2  ;;  %vm738_vm1 = vcmp.eq.s32.totalorder %v2771_v34, %v691_v2  ;;  %vm641_vm15 = vcmp.eq.s32.totalorder %v2768_v31, %v3621_v23 }
 0x127   :  { %v6663_v3 = vsel %vm3778_vm5, 4294967295, %v6662_v3  ;;  %vm3785_vm9 = vmor %vm672_vm13, %vm768_vm4  ;;  %vm739_vm5 = vcmp.eq.s32.totalorder %v2774_v35, %v691_v2  ;;  %vm734_vm13 = vcmp.eq.s32.totalorder %v2768_v31, %v688_v24  ;;  %v1088_v2 = vld [vmem:[%s6171_s2 + $0x42] sm:$0xff] }
 0x128   :  { %6664 = vst [vmem:[#allocation40_spill] sm:$0xff] %v6663_v3  ;;  %v6666_v38 = vsel %vm3785_vm9, 4294967295, %v6665_v38  ;;  %vm3792_vm3 = vmor %vm673_vm11, %vm769_vm6  ;;  %vm643_vm9 = vcmp.eq.s32.totalorder %v2774_v35, %v3621_v23  ;;  %vm735_vm11 = vcmp.eq.s32.totalorder %v2771_v34, %v688_v24  ;;  %vm638_vm6 = vcmp.eq.s32.totalorder %v2768_v31, %v3388_v47  ;;  %v561_v23 = vld [vmem:[%s6171_s2 + $0x49] sm:$0x3f] }
 0x129   :  { %6667 = vst [vmem:[#allocation41_spill] sm:$0xff] %v6666_v38  ;;  %v6669_v48 = vsel %vm3792_vm3, 4294967295, %v6668_v48  ;;  %vm3799_vm4 = vmor %vm641_vm15, %vm737_vm10  ;;  %vm736_vm10 = vcmp.eq.s32.totalorder %v2774_v35, %v688_v24  ;;  %v6679_v24 = vmov 0  ;;  %v577_v38 = vadd.s32 224, %v561_v23  ;;  %v1091_v23 = vld [vmem:[%s6171_s2 + $0x5a] sm:$0x3f] }
 0x12a   :  { %6670 = vst [vmem:[#allocation42_spill] sm:$0xff] %v6669_v48  ;;  %vm3806_vm12 = vmor %vm642_vm8, %vm738_vm1  ;;  %1233 = vperm.xlu2 %2533, %v1072_v32   ;;  %vm639_vm1 = vcmp.eq.s32.totalorder %v2771_v34, %v3388_v47  ;;  %v6677_v32 = vmov 0  ;;  %v6681_v48 = vmov 0  ;;  %v1104_v19 = vadd.s32 352, %v1088_v2 }
 0x12b   :  { %vm3813_vm3 = vmor %vm643_vm9, %vm739_vm5  ;;  %1230 = vperm.xlu1 %2532, %v1071_v10   ;;  %1137 = vperm.xlu0 %2531, %v1040_v15   ;;  %v1087_v15 = vld [vmem:[%s6171_s2 + $0x3a] sm:$0x3f]  ;;  %vm640_vm9 = vcmp.eq.s32.totalorder %v2774_v35, %v3388_v47  ;;  %v6683_v47 = vmov 0  ;;  %v1042_v2 = vadd.s32 256, %v1026_v43  ;;  %v6819_v43 = vmov 0 }
 0x12c   :  { %vm3823_vm8 = vmor %vm638_vm6, %vm734_vm13  ;;  %v826_v61 = vpop.permute.xlu2 %825  ;;  %v1103_v63 = vadd.s32 352, %v1087_v15  ;;  %v6699_v15 = vmov 0 }
 0x12d   :  { %v6678_v32 = vsel %vm3823_vm8, 4294967295, %v6677_v32  ;;  %vm3835_vm5 = vmor %vm639_vm1, %vm735_vm11  ;;  %vm872_vm15 = vcmp.eq.s32.totalorder %v2768_v31, %v826_v61  ;;  %vm873_vm13 = vcmp.eq.s32.totalorder %v2771_v34, %v826_v61  ;;  %v700_v10 = vpop.permute.xlu1 %699  ;;  %vm874_vm2 = vcmp.eq.s32.totalorder %v2774_v35, %v826_v61  ;;  %v697_v3 = vpop.permute.xlu0 %696 }
 0x12e   :  { %v6680_v24 = vsel %vm3835_vm5, 4294967295, %v6679_v24  ;;  %vm3841_vm6 = vmor %vm640_vm9, %vm736_vm10  ;;  %v6688_v61 = vmov 0  ;;  %vm746_vm9 = vcmp.eq.s32.totalorder %v2768_v31, %v700_v10  ;;  %vm652_vm1 = vcmp.eq.s32.totalorder %v2774_v35, %v3636_v40 }
 0x12f   :  { %v6682_v48 = vsel %vm3841_vm6, 4294967295, %v6681_v48  ;;  %vm3848_vm8 = vmor %vm3748_vm0, %vm872_vm15  ;;  %vm651_vm15 = vcmp.eq.s32.totalorder %v2771_v34, %v3636_v40  ;;  %vm745_vm0 = vcmp.eq.s32.totalorder %v2774_v35, %v697_v3  ;;  %vm649_vm5 = vcmp.eq.s32.totalorder %v2774_v35, %v3455_v56 }
 0x130   :  { %v6684_v47 = vsel %vm3848_vm8, 4294967295, %v6683_v47  ;;  %vm3854_vm11 = vmor %vm3754_vm14, %vm873_vm13  ;;  %vm748_vm8 = vcmp.eq.s32.totalorder %v2774_v35, %v700_v10  ;;  %vm744_vm14 = vcmp.eq.s32.totalorder %v2771_v34, %v697_v3 }
 0x131   :  { %v6686_v57 = vsel %vm3854_vm11, 4294967295, %v6685_v57  ;;  %vm3860_vm10 = vmor %vm3758_vm7, %vm874_vm2  ;;  %vm650_vm2 = vcmp.eq.s32.totalorder %v2768_v31, %v3636_v40  ;;  %vm743_vm11 = vcmp.eq.s32.totalorder %v2768_v31, %v697_v3 }
 0x132   :  { %6687 = vst [vmem:[#allocation43_spill] sm:$0xff] %v6686_v57  ;;  %v6689_v61 = vsel %vm3860_vm10, 4294967295, %v6688_v61  ;;  %852 = vperm.xlu2 %2533, %v577_v38   ;;  %v1025_v38 = vld [vmem:[%s6169_s0 + $0x4a] sm:$0x3f]  ;;  %vm3892_vm13 = vmor %vm650_vm2, %vm746_vm9  ;;  %vm6696_vm10 = vcmp.eq.s32.totalorder %v2771_v34, %v700_v10  ;;  %vm647_vm9 = vcmp.eq.s32.totalorder %v2768_v31, %v3455_v56  ;;  %v6814_v10 = vmov 0 }
 0x133   :  { %6690 = vst [vmem:[#allocation44_spill] sm:$0xff] %v6689_v61  ;;  %1377 = vperm.xlu1 %2532, %v1104_v19   ;;  %1374 = vperm.xlu0 %2531, %v1103_v63   ;;  %v562_v63 = vld [vmem:[%s6171_s2 + $0x51] sm:$0xff]  ;;  %vm3901_vm7 = vmor %vm651_vm15, %vm6696_vm10  ;;  %v1041_v61 = vadd.s32 256, %v1025_v38  ;;  %vm648_vm10 = vcmp.eq.s32.totalorder %v2771_v34, %v3455_v56  ;;  %v6705_v38 = vmov 0  ;;  %v1089_v56 = vld [vmem:[%s6171_s2 + $0x4a] sm:$0x3f] }
 0x134   :  { %v835_v37 = vpop.permute.xlu2 %834  ;;  %vm3908_vm2 = vmor %vm652_vm1, %vm748_vm8  ;;  %v578_v40 = vadd.s32 224, %v562_v63  ;;  %v6707_v63 = vmov 0  ;;  %v1105_v49 = vadd.s32 352, %v1089_v56  ;;  %v6719_v56 = vmov 0  ;;  %v564_v19 = vld [vmem:[%s6171_s2 + $0x61] sm:$0xff] }
 0x135   :  { %v709_v21 = vpop.permute.xlu1 %708  ;;  %v6700_v15 = vsel %vm3908_vm2, 4294967295, %v6699_v15  ;;  %vm3915_vm15 = vmor %vm647_vm9, %vm743_vm11  ;;  %vm881_vm6 = vcmp.eq.s32.totalorder %v2768_v31, %v835_v37  ;;  %vm882_vm1 = vcmp.eq.s32.totalorder %v2771_v34, %v835_v37  ;;  %v706_v3 = vpop.permute.xlu0 %705  ;;  %vm883_vm11 = vcmp.eq.s32.totalorder %v2774_v35, %v835_v37  ;;  %v1057_v37 = vld [vmem:[%s6170_s1 + $0x4a] sm:$0x3f] }
 0x136   :  { %vm3922_vm8 = vmor %vm648_vm10, %vm744_vm14  ;;  %v1073_v57 = vadd.s32 320, %v1057_v37  ;;  %vm752_vm10 = vcmp.eq.s32.totalorder %v2768_v31, %v706_v3 }
 0x137   :  { %vm3927_vm2 = vmor %vm649_vm5, %vm745_vm0  ;;  %vm755_vm0 = vcmp.eq.s32.totalorder %v2768_v31, %v709_v21 }
 0x138   :  { %v6706_v38 = vsel %vm3927_vm2, 4294967295, %v6705_v38  ;;  %vm3934_vm9 = vmor %vm3799_vm4, %vm881_vm6  ;;  %vm753_vm6 = vcmp.eq.s32.totalorder %v2771_v34, %v706_v3 }
 0x139   :  { %v6708_v63 = vsel %vm3934_vm9, 4294967295, %v6707_v63  ;;  %vm3943_vm5 = vmor %vm3806_vm12, %vm882_vm1  ;;  %vm659_vm1 = vcmp.eq.s32.totalorder %v2768_v31, %v3665_v42  ;;  %vm757_vm9 = vcmp.eq.s32.totalorder %v2774_v35, %v709_v21  ;;  %vm660_vm12 = vcmp.eq.s32.totalorder %v2771_v34, %v3665_v42 }
 0x13a   :  { %1143 = vperm.xlu2 %2533, %v1042_v2   ;;  %6709 = vst [vmem:[#allocation45_spill] sm:$0xff] %v6708_v63  ;;  %v6711_v7 = vsel %vm3943_vm5, 4294967295, %v6710_v7  ;;  %vm3955_vm4 = vmor %vm3813_vm3, %vm883_vm11  ;;  %vm756_vm3 = vcmp.eq.s32.totalorder %v2771_v34, %v709_v21  ;;  %vm661_vm5 = vcmp.eq.s32.totalorder %v2774_v35, %v3665_v42  ;;  %v6725_v21 = vmov 0  ;;  %v1027_v42 = vld [vmem:[%s6169_s0 + $0x5a] sm:$0x3f] }
 0x13b   :  { %1140 = vperm.xlu1 %2532, %v1041_v61   ;;  %855 = vperm.xlu0 %2531, %v578_v40   ;;  %6712 = vst [vmem:[#allocation46_spill] sm:$0xff] %v6711_v7  ;;  %v6713_v61 = vmov 0  ;;  %v1074_v40 = vadd.s32 320, %v1058_v9  ;;  %vm3980_vm2 = vmor %vm659_vm1, %vm755_vm0  ;;  %v6722_v9 = vmov 0  ;;  %vm754_vm0 = vcmp.eq.s32.totalorder %v2774_v35, %v706_v3 }
 0x13c   :  { %v6714_v61 = vsel %vm3955_vm4, 4294967295, %v6713_v61  ;;  %v844_v41 = vpop.permute.xlu2 %843  ;;  %v6720_v56 = vsel %vm3980_vm2, 4294967295, %v6719_v56  ;;  %vm3987_vm14 = vmor %vm660_vm12, %vm756_vm3  ;;  %vm656_vm4 = vcmp.eq.s32.totalorder %v2768_v31, %v3522_v29  ;;  %vm657_vm12 = vcmp.eq.s32.totalorder %v2771_v34, %v3522_v29 }
 0x13d   :  { %6715 = vst [vmem:[#allocation47_spill] sm:$0xff] %v6714_v61  ;;  %v3959_v2 = vpop.permute.xlu1 %717  ;;  %v6723_v9 = vsel %vm3987_vm14, 4294967295, %v6722_v9  ;;  %vm3994_vm11 = vmor %vm661_vm5, %vm757_vm9  ;;  %v715_v37 = vpop.permute.xlu0 %714  ;;  %vm890_vm9 = vcmp.eq.s32.totalorder %v2768_v31, %v844_v41  ;;  %vm658_vm5 = vcmp.eq.s32.totalorder %v2774_v35, %v3522_v29  ;;  %v1043_v61 = vadd.s32 256, %v1027_v42 }
 0x13e   :  { %6721 = vst [vmem:[#allocation48_spill] sm:$0xff] %v6720_v56  ;;  %v6726_v21 = vsel %vm3994_vm11, 4294967295, %v6725_v21  ;;  %vm4004_vm3 = vmor %vm656_vm4, %vm752_vm10  ;;  %vm891_vm4 = vcmp.eq.s32.totalorder %v2771_v34, %v844_v41  ;;  %vm892_vm11 = vcmp.eq.s32.totalorder %v2774_v35, %v844_v41  ;;  %v6734_v29 = vmov 0 }
 0x13f   :  { %6724 = vst [vmem:[#allocation49_spill] sm:$0xff] %v6723_v9  ;;  %vm4019_vm1 = vmor %vm657_vm12, %vm753_vm6  ;;  %v6732_v9 = vmov 0  ;;  %v6737_v7 = vmov 0  ;;  %v6741_v41 = vmov 0  ;;  %vm665_vm2 = vcmp.eq.s32.totalorder %v2768_v31, %v3588_v54 }
 0x140   :  { %6727 = vst [vmem:[#allocation50_spill] sm:$0xff] %v6726_v21  ;;  %v563_v21 = vld [vmem:[%s6171_s2 + $0x59] sm:$0x3f]  ;;  %vm4024_vm10 = vmor %vm658_vm5, %vm754_vm0  ;;  %vm6740_vm0 = vnez %v6700_v15  ;;  %vm764_vm5 = vcmp.eq.s32.totalorder %v2768_v31, %v3959_v2  ;;  %v6747_v15 = vmov 0 }
 0x141   :  { %v6733_v9 = vsel %vm4024_vm10, 4294967295, %v6732_v9  ;;  %vm4031_vm14 = vmor %vm3892_vm13, %vm890_vm9  ;;  %v579_v3 = vadd.s32 224, %v563_v21  ;;  %vm762_vm13 = vcmp.eq.s32.totalorder %v2771_v34, %v715_v37  ;;  %v580_v21 = vadd.s32 224, %v564_v19 }
 0x142   :  { %1380 = vperm.xlu2 %2533, %v1105_v49   ;;  %v6735_v29 = vsel %vm4031_vm14, 4294967295, %v6734_v29  ;;  %vm4037_vm6 = vmor %vm3901_vm7, %vm891_vm4  ;;  %vm766_vm4 = vcmp.eq.s32.totalorder %v2774_v35, %v3959_v2  ;;  %vm761_vm14 = vcmp.eq.s32.totalorder %v2768_v31, %v715_v37  ;;  %v6842_v49 = vmov 0 }
 0x143   :  { %1239 = vperm.xlu1 %2532, %v1074_v40   ;;  %1236 = vperm.xlu0 %2531, %v1073_v57   ;;  %v1090_v57 = vld [vmem:[%s6171_s2 + $0x52] sm:$0xff]  ;;  %6736 = vst [vmem:[#allocation51_spill] sm:$0xff] %v6735_v29  ;;  %v6738_v7 = vsel %vm4037_vm6, 4294967295, %v6737_v7  ;;  %vm4043_vm12 = vmor %vm6740_vm0, %vm892_vm11  ;;  %vm765_vm11 = vcmp.eq.s32.totalorder %v2771_v34, %v3959_v2  ;;  %vm668_vm0 = vcmp.eq.s32.totalorder %v2768_v31, %v3696_v39  ;;  %v6750_v2 = vmov 0 }
 0x144   :  { %v1106_v36 = vadd.s32 352, %v1090_v57  ;;  %6739 = vst [vmem:[#allocation52_spill] sm:$0xff] %v6738_v7  ;;  %v6742_v41 = vsel %vm4043_vm12, 4294967295, %v6741_v41  ;;  %v4047_v42 = vpop.permute.xlu2 %1113  ;;  %vm669_vm6 = vcmp.eq.s32.totalorder %v2771_v34, %v3696_v39  ;;  %vm4080_vm7 = vmor %vm668_vm0, %vm764_vm5  ;;  %vm670_vm12 = vcmp.eq.s32.totalorder %v2774_v35, %v3696_v39  ;;  %v1634_v29 = vld [vmem:[%s6172_s3 + $0x150] sm:$0xff] }
 0x145   :  { %v727_v56 = vpop.permute.xlu1 %726  ;;  %6743 = vst [vmem:[#allocation53_spill] sm:$0xff] %v6742_v41  ;;  %v6748_v15 = vsel %vm4080_vm7, 4294967295, %v6747_v15  ;;  %vm4087_vm9 = vmor %vm669_vm6, %vm765_vm11  ;;  %v6753_v57 = vmov 0  ;;  %vm763_vm0 = vcmp.eq.s32.totalorder %v2774_v35, %v715_v37  ;;  %vm666_vm6 = vcmp.eq.s32.totalorder %v2771_v34, %v3588_v54  ;;  %v1605_v41 = vld [vmem:[%s6172_s3 + $0x68] sm:$0xff] }
 0x146   :  { %6749 = vst [vmem:[#allocation54_spill] sm:$0xff] %v6748_v15  ;;  %v6751_v2 = vsel %vm4087_vm9, 4294967295, %v6750_v2  ;;  %vm4094_vm5 = vmor %vm670_vm12, %vm766_vm4  ;;  %v6756_v39 = vmov 0  ;;  %vm773_vm9 = vcmp.eq.s32.totalorder %v2768_v31, %v727_v56  ;;  %vm667_vm12 = vcmp.eq.s32.totalorder %v2774_v35, %v3588_v54 }
 0x147   :  { %6752 = vst [vmem:[#allocation55_spill] sm:$0xff] %v6751_v2  ;;  %v6754_v57 = vsel %vm4094_vm5, 4294967295, %v6753_v57  ;;  %vm4101_vm11 = vmor %vm665_vm2, %vm761_vm14  ;;  %v6759_v2 = vmov 0  ;;  %vm774_vm5 = vcmp.eq.s32.totalorder %v2771_v34, %v727_v56  ;;  %vm677_vm7 = vcmp.eq.s32.totalorder %v2768_v31, %v3725_v45 }
 0x148   :  { %6755 = vst [vmem:[#allocation56_spill] sm:$0xff] %v6754_v57  ;;  %v6757_v39 = vsel %vm4101_vm11, 4294967295, %v6756_v39  ;;  %vm4108_vm4 = vmor %vm666_vm6, %vm762_vm13  ;;  %v6762_v37 = vmov 0  ;;  %vm775_vm2 = vcmp.eq.s32.totalorder %v2774_v35, %v727_v56  ;;  %vm678_vm14 = vcmp.eq.s32.totalorder %v2771_v34, %v3725_v45  ;;  %v1060_v57 = vld [vmem:[%s6170_s1 + $0x62] sm:$0xff] }
 0x149   :  { %6758 = vst [vmem:[#allocation57_spill] sm:$0xff] %v6757_v39  ;;  %v6760_v2 = vsel %vm4108_vm4, 4294967295, %v6759_v2  ;;  %vm4115_vm10 = vmor %vm667_vm12, %vm763_vm0  ;;  %v6765_v54 = vmov 0  ;;  %vm679_vm0 = vcmp.eq.s32.totalorder %v2774_v35, %v3725_v45  ;;  %v6771_v45 = vmov 0 }
 0x14a   :  { %1146 = vperm.xlu2 %2533, %v1043_v61   ;;  %v724_v61 = vpop.permute.xlu0 %723  ;;  %6761 = vst [vmem:[#allocation58_spill] sm:$0xff] %v6760_v2  ;;  %v6763_v37 = vsel %vm4115_vm10, 4294967295, %v6762_v37  ;;  %vm4122_vm11 = vmor %vm677_vm7, %vm773_vm9  ;;  %vm674_vm7 = vcmp.eq.s32.totalorder %v2768_v31, %v3613_v5  ;;  %vm676_vm10 = vcmp.eq.s32.totalorder %v2774_v35, %v3613_v5  ;;  %v6777_v56 = vmov 0 }
 0x14b   :  { %858 = vperm.xlu1 %2532, %v579_v3   ;;  %1383 = vperm.xlu0 %2531, %v1106_v36   ;;  %v1059_v36 = vld [vmem:[%s6170_s1 + $0x5a] sm:$0x3f]  ;;  %v1107_v3 = vadd.s32 352, %v1091_v23  ;;  %6764 = vst [vmem:[#allocation59_spill] sm:$0xff] %v6763_v37  ;;  %v6766_v54 = vsel %vm4122_vm11, 4294967295, %v6765_v54  ;;  %vm770_vm13 = vcmp.eq.s32.totalorder %v2768_v31, %v724_v61  ;;  %vm4134_vm6 = vmor %vm678_vm14, %vm774_vm5  ;;  %vm771_vm9 = vcmp.eq.s32.totalorder %v2771_v34, %v724_v61 }
 0x14c   :  { %v1075_v15 = vadd.s32 320, %v1059_v36  ;;  %6767 = vst [vmem:[#allocation60_spill] sm:$0xff] %v6766_v54  ;;  %v4127_v23 = vpop.permute.xlu2 %1212  ;;  %v1029_v36 = vld [vmem:[%s6169_s0 + $0x6a] sm:$0x3f]  ;;  %v1028_v54 = vld [vmem:[%s6169_s0 + $0x62] sm:$0xff]  ;;  %vm4149_vm12 = vmor %vm679_vm0, %vm775_vm2  ;;  %vm772_vm5 = vcmp.eq.s32.totalorder %v2774_v35, %v724_v61  ;;  %vm675_vm14 = vcmp.eq.s32.totalorder %v2771_v34, %v3613_v5  ;;  %v6780_v2 = vmov 0 }
 0x14d   :  { %v832_v19 = vpop.permute.xlu1 %831  ;;  %v6772_v45 = vsel %vm4149_vm12, 4294967295, %v6771_v45  ;;  %vm4163_vm4 = vmor %vm675_vm14, %vm771_vm9  ;;  %vm6786_vm9 = vnez %v6680_v24  ;;  %v6787_v5 = vmov 0  ;;  %v6810_v7 = vmov 0 }
 0x14e   :  { %6773 = vst [vmem:[#allocation62_spill] sm:$0xff] %v6772_v45  ;;  %vm878_vm11 = vcmp.eq.s32.totalorder %v2768_v31, %v832_v19  ;;  %v6778_v56 = vsel %vm4163_vm4, 4294967295, %v6777_v56  ;;  %vm879_vm2 = vcmp.eq.s32.totalorder %v2771_v34, %v832_v19  ;;  %v1044_v45 = vadd.s32 256, %v1028_v54  ;;  %vm4168_vm0 = vmor %vm676_vm10, %vm772_vm5 }
 0x14f   :  { %6779 = vst [vmem:[#allocation64_spill] sm:$0xff] %v6778_v56  ;;  %v6781_v2 = vsel %vm4168_vm0, 4294967295, %v6780_v2  ;;  %vm4181_vm14 = vmor %vm6786_vm9, %vm879_vm2  ;;  %vm6789_vm10 = vnez %v6682_v48  ;;  %v4204_v48 = vld [vmem:[%s6172_s3 + $0xf8] sm:$0xff]  ;;  %vm6795_vm0 = vnez %v6630_v46  ;;  %v1061_v56 = vld [vmem:[%s6170_s1 + $0x6a] sm:$0x3f]  ;;  %v6846_v40 = vmov 0 }
 0x150   :  { %6782 = vst [vmem:[#allocation65_spill] sm:$0xff] %v6781_v2  ;;  %v6788_v5 = vsel %vm4181_vm14, 4294967295, %v6787_v5  ;;  %2084 = vmatpush.msra.mxu1 %v4204_v48  ;;  %v1077_v39 = vadd.s32 320, %v1061_v56  ;;  %v1076_v56 = vadd.s32 320, %v1060_v57  ;;  %v4293_v57 = vld [vmem:[%s6172_s3 + $0xe0] sm:$0xff] }
 0x152   :  { %861 = vperm.xlu2 %2533, %v580_v21   ;;  %v6768_v21 = vmov 0  ;;  %v829_v61 = vpop.permute.xlu0 %828 }
 0x153   :  { %1386 = vperm.xlu1 %2532, %v1107_v3   ;;  %1242 = vperm.xlu0 %2531, %v1075_v15   ;;  %v6769_v21 = vsel %vm4134_vm6, 4294967295, %v6768_v21  ;;  %v565_v15 = vld [vmem:[%s6171_s2 + $0x69] sm:$0x3f]  ;;  %vm4156_vm6 = vmor %vm674_vm7, %vm770_vm13  ;;  %v6774_v3 = vmov 0  ;;  %vm880_vm13 = vcmp.eq.s32.totalorder %v2774_v35, %v832_v19  ;;  %vm6783_vm7 = vnez %v6678_v32  ;;  %v1607_v32 = vld [vmem:[%s6172_s3 + $0x78] sm:$0xff] }
 0x154   :  { %6770 = vst [vmem:[#allocation61_spill] sm:$0xff] %v6769_v21  ;;  %v6775_v3 = vsel %vm4156_vm6, 4294967295, %v6774_v3  ;;  %v1045_v21 = vadd.s32 256, %v1029_v36  ;;  %v581_v37 = vadd.s32 224, %v565_v15  ;;  %vm4175_vm6 = vmor %vm6783_vm7, %vm878_vm11  ;;  %v6784_v36 = vmov 0  ;;  %v4211_v24 = vpop.permute.xlu2 %1119  ;;  %2025 = vmatpush.msra.mxu0 %v1607_v32  ;;  %v1639_v19 = vld [vmem:[%s6172_s3 + $0x178] sm:$0xff]  ;;  %2481 = vmatpush.msra.mxu3 %v1607_v32 }
 0x155   :  { %6776 = vst [vmem:[#allocation63_spill] sm:$0xff] %v6775_v3  ;;  %v6785_v36 = vsel %vm4175_vm6, 4294967295, %v6784_v36  ;;  %v4185_v54 = vpop.permute.xlu1 %840  ;;  %vm4189_vm5 = vmor %vm6789_vm10, %vm880_vm13  ;;  %v6790_v15 = vmov 0  ;;  %vm875_vm2 = vcmp.eq.s32.totalorder %v2768_v31, %v829_v61  ;;  %2143 = vmatpush.msra.mxu2 %v1639_v19  ;;  %v1092_v19 = vld [vmem:[%s6171_s2 + $0x62] sm:$0xff]  ;;  %vm6798_vm9 = vcmp.eq.s32.totalorder %v2771_v34, %v829_v61 }
 0x156   :  { %v6791_v15 = vsel %vm4189_vm5, 4294967295, %v6790_v15  ;;  %vm4237_vm4 = vmor %vm6795_vm0, %vm875_vm2  ;;  %vm6799_vm10 = vnez %v6632_v25  ;;  %v1108_v3 = vadd.s32 352, %v1092_v19  ;;  %vm6802_vm0 = vcmp.eq.s32.totalorder %v2774_v35, %v829_v61  ;;  %v4275_v19 = vld [vmem:[%s6172_s3 + $0xe8] sm:$0xff]  ;;  %v4307_v61 = vld [vmem:[%s6172_s3 + $0x58] sm:$0xff] }
 0x157   :  { %vm4252_vm12 = vmor %vm6799_vm10, %vm6798_vm9  ;;  %vm6803_vm2 = vnez %v6634_v55  ;;  %v6804_v25 = vmov 0  ;;  %v1637_v32 = vld [vmem:[%s6172_s3 + $0x168] sm:$0xff]  ;;  %vm6806_vm10 = vnez %v6523_v59  ;;  %v1604_v55 = vld [vmem:[%s6172_s3 + $0x60] sm:$0xff]  ;;  %vm6807_vm5 = vnez %v6526_v16 }
 0x158   :  { %vm4266_vm9 = vmor %vm6803_vm2, %vm6802_vm0  ;;  %vm6809_vm2 = vcmp.eq.s32.totalorder %v2768_v31, %v4185_v54  ;;  %vm6813_vm0 = vcmp.eq.s32.totalorder %v2771_v34, %v4185_v54  ;;  %vm6818_vm13 = vnez %v6706_v38  ;;  %v582_v38 = vadd.s32 224, %v566_v33  ;;  %v4401_v33 = vld [vmem:[%s6172_s3 + $0xc8] sm:$0xff] }
 0x159   :  { %v6805_v25 = vsel %vm4266_vm9, 4294967295, %v6804_v25  ;;  %vm4330_vm14 = vmor %vm3915_vm15, %vm6809_vm2  ;;  %vm6817_vm2 = vcmp.eq.s32.totalorder %v2774_v35, %v4185_v54  ;;  %v1093_v54 = vld [vmem:[%s6171_s2 + $0x6a] sm:$0x3f]  ;;  %vm6832_vm11 = vnez %v6640_v13  ;;  %v1600_v13 = vld [vmem:[%s6172_s3 + $0x40] sm:$0xff]  ;;  %v2568_v59 = vmov 0.0  }
 0x15a   :  { %1152 = vperm.xlu2 %2533, %v1045_v21   ;;  %v4228_v21 = vld [vmem:[%s6172_s3 + $0xf0] sm:$0xff]  ;;  %v6811_v7 = vsel %vm4330_vm14, 4294967295, %v6810_v7  ;;  %vm4350_vm15 = vmor %vm3922_vm8, %vm6813_vm0  ;;  %v1109_v63 = vadd.s32 352, %v1093_v54 }
 0x15b   :  { %1149 = vperm.xlu1 %2532, %v1044_v45   ;;  %864 = vperm.xlu0 %2531, %v581_v37   ;;  %v1606_v37 = vld [vmem:[%s6172_s3 + $0x70] sm:$0xff]  ;;  %6812 = vst [vmem:[#allocation66_spill] sm:$0xff] %v6811_v7  ;;  %v6815_v10 = vsel %vm4350_vm15, 4294967295, %v6814_v10  ;;  %vm4365_vm6 = vmor %vm6818_vm13, %vm6817_vm2  ;;  %vm6826_vm2 = vnez %v6636_v50  ;;  %vm6829_vm13 = vnez %v6638_v44  ;;  %v6833_v50 = vmov 0 }
 0x15c   :  { %v1638_v45 = vld [vmem:[%s6172_s3 + $0x170] sm:$0xff]  ;;  %2026 = vmatpush.msra.mxu0 %v1606_v37  ;;  %2085 = vmatpush.msra.mxu1 %v4228_v21  ;;  %6816 = vst [vmem:[#allocation67_spill] sm:$0xff] %v6815_v10  ;;  %v6820_v43 = vsel %vm4365_vm6, 4294967295, %v6819_v43  ;;  %v6880_v7 = vmov 0 }
 0x15d   :  { %2144 = vmatpush.msra.mxu2 %v1638_v45  ;;  %v4270_v45 = vpop.permute.xlu0 %837  ;;  %v4315_v4 = vpop.permute.xlu1 %849  ;;  %2482 = vmatpush.msra.mxu3 %v1606_v37  ;;  %6821 = vst [vmem:[#allocation68_spill] sm:$0xff] %v6820_v43  ;;  %v4511_v43 = vld [vmem:[%s6172_s3 + $0x30] sm:$0xff] }
 0x15e   :  { %2027 = vmatpush.msra.mxu0 %v1605_v41  ;;  %2086 = vmatpush.msra.mxu1 %v4275_v19  ;;  %v4369_v37 = vpop.permute.xlu2 %1122  ;;  %vm885_vm9 = vcmp.eq.s32.totalorder %v2771_v34, %v4270_v45  ;;  %vm886_vm0 = vcmp.eq.s32.totalorder %v2774_v35, %v4270_v45  ;;  %vm6825_vm15 = vcmp.eq.s32.totalorder %v2768_v31, %v4270_v45  ;;  %v1632_v45 = vld [vmem:[%s6172_s3 + $0x140] sm:$0xff] }
 0x15f   :  { %2145 = vmatpush.msra.mxu2 %v1637_v32  ;;  %v4338_v32 = vld [vmem:[%s6172_s3 + $0x50] sm:$0xff]  ;;  %2483 = vmatpush.msra.mxu3 %v1605_v41  ;;  %v1633_v41 = vld [vmem:[%s6172_s3 + $0x148] sm:$0xff]  ;;  %vm4417_vm14 = vmor %vm6826_vm2, %vm6825_vm15 }
 0x160   :  { %2028 = vmatpush.msra.mxu0 %v1604_v55  ;;  %2087 = vmatpush.msra.mxu1 %v4293_v57  ;;  %vm4425_vm6 = vmor %vm6829_vm13, %vm885_vm9  ;;  %vm897_vm9 = vcmp.eq.s32.totalorder %v2771_v34, %v4315_v4 }
 0x161   :  { %vm4433_vm15 = vmor %vm6832_vm11, %vm886_vm0  ;;  %2484 = vmatpush.msra.mxu3 %v1604_v55  ;;  %v4472_v55 = vld [vmem:[%s6172_s3 + $0x38] sm:$0xff]  ;;  %vm6838_vm0 = vcmp.eq.s32.totalorder %v2768_v31, %v4315_v4 }
 0x162   :  { %1389 = vperm.xlu2 %2533, %v1108_v3   ;;  %v1636_v3 = vld [vmem:[%s6172_s3 + $0x160] sm:$0xff]  ;;  %2029 = vmatpush.msra.mxu0 %v4307_v61  ;;  %v6834_v50 = vsel %vm4433_vm15, 4294967295, %v6833_v50  ;;  %vm4485_vm8 = vmor %vm4004_vm3, %vm6838_vm0 }
 0x163   :  { %1248 = vperm.xlu1 %2532, %v1077_v39   ;;  %1245 = vperm.xlu0 %2531, %v1076_v56   ;;  %v4320_v39 = vld [vmem:[%s6172_s3 + $0xd8] sm:$0xff]  ;;  %vm4504_vm3 = vmor %vm4019_vm1, %vm897_vm9  ;;  %vm6845_vm1 = vnez %v6733_v9 }
 0x164   :  { %v1635_v56 = vld [vmem:[%s6172_s3 + $0x158] sm:$0xff]  ;;  %2146 = vmatpush.msra.mxu2 %v1636_v3  ;;  %2088 = vmatpush.msra.mxu1 %v4320_v39  ;;  %v1046_v3 = vadd.s32 256, %v1030_v0  ;;  %v4396_v0 = vld [vmem:[%s6172_s3 + $0x48] sm:$0xff]  ;;  %v6843_v49 = vsel %vm4504_vm3, 4294967295, %v6842_v49 }
 0x165   :  { %2030 = vmatpush.msra.mxu0 %v4338_v32  ;;  %v4421_v54 = vpop.permute.xlu0 %846  ;;  %v4443_v44 = vpop.permute.xlu1 %1209  ;;  %2485 = vmatpush.msra.mxu3 %v4307_v61  ;;  %v567_v61 = vld [vmem:[%s6171_s2 + $0x79] sm:$0x3f]  ;;  %6844 = vst [vmem:[#allocation70_spill] sm:$0xff] %v6843_v49  ;;  %v1629_v49 = vld [vmem:[%s6172_s3 + $0x128] sm:$0xff] }
 0x166   :  { %2147 = vmatpush.msra.mxu2 %v1635_v56  ;;  %2089 = vmatpush.msra.mxu1 %v4343_v8  ;;  %v6827_v56 = vmov 0  ;;  %v583_v10 = vadd.s32 224, %v567_v61  ;;  %v1062_v9 = vld [vmem:[%s6170_s1 + $0x72] sm:$0xff]  ;;  %v4548_v61 = vld [vmem:[%s6172_s3 + $0x28] sm:$0xff]  ;;  %vm895_vm3 = vcmp.eq.s32.totalorder %v2774_v35, %v4421_v54  ;;  %vm6852_vm15 = vcmp.eq.s32.totalorder %v2768_v31, %v4421_v54 }
 0x167   :  { %v6828_v56 = vsel %vm4417_vm14, 4294967295, %v6827_v56  ;;  %2031 = vmatpush.msra.mxu0 %v4396_v0  ;;  %vm898_vm14 = vcmp.eq.s32.totalorder %v2774_v35, %v4315_v4  ;;  %2486 = vmatpush.msra.mxu3 %v4338_v32  ;;  %v1094_v32 = vld [vmem:[%s6171_s2 + $0x72] sm:$0xff] }
 0x168   :  { %2148 = vmatpush.msra.mxu2 %v1634_v29  ;;  %v6830_v29 = vmov 0  ;;  %2090 = vmatpush.msra.mxu1 %v4401_v33  ;;  %vm4524_vm9 = vmor %vm6845_vm1, %vm898_vm14  ;;  %v1110_v4 = vadd.s32 352, %v1094_v32  ;;  %v4562_v32 = vld [vmem:[%s6172_s3 + $0xa8] sm:$0xff]  ;;  %vm6857_vm1 = vcmp.eq.s32.totalorder %v2771_v34, %v4421_v54  ;;  %v6863_v54 = vmov 0 }
 0x169   :  { %v6831_v29 = vsel %vm4425_vm6, 4294967295, %v6830_v29  ;;  %2032 = vmatpush.msra.mxu0 %v1600_v13  ;;  %v6847_v40 = vsel %vm4524_vm9, 4294967295, %v6846_v40  ;;  %2487 = vmatpush.msra.mxu3 %v4396_v0  ;;  %v4587_v0 = vld [vmem:[%s6172_s3 + $0x20] sm:$0xff]  ;;  %vm6862_vm9 = vnez %v6646_v53  ;;  %v1627_v53 = vld [vmem:[%s6172_s3 + $0x118] sm:$0xff] }
 0x16a   :  { %1155 = vperm.xlu2 %2533, %v1046_v3   ;;  %2149 = vmatpush.msra.mxu2 %v1633_v41  ;;  %v4477_v3 = vld [vmem:[%s6172_s3 + $0xb8] sm:$0xff]  ;;  %v4489_v41 = vpop.permute.xlu2 %1221  ;;  %6848 = vst [vmem:[#allocation71_spill] sm:$0xff] %v6847_v40  ;;  %vm4612_vm14 = vmor %vm6862_vm9, %vm895_vm3  ;;  %vm1260_vm9 = vcmp.eq.s32.totalorder %v2771_v34, %v4127_v23  ;;  %vm6872_vm3 = vcmp.eq.s32.totalorder %v2768_v31, %v4443_v44 }
 0x16b   :  { %867 = vperm.xlu1 %2532, %v582_v38   ;;  %1392 = vperm.xlu0 %2531, %v1109_v63   ;;  %v4451_v63 = vld [vmem:[%s6172_s3 + $0xc0] sm:$0xff]  ;;  %v6839_v38 = vmov 0  ;;  %v6864_v54 = vsel %vm4612_vm14, 4294967295, %v6863_v54  ;;  %v4624_v40 = vld [vmem:[%s6172_s3 + $0x98] sm:$0xff]  ;;  %vm1161_vm14 = vcmp.eq.s32.totalorder %v2771_v34, %v4047_v42 }
 0x16c   :  { %2091 = vmatpush.msra.mxu1 %v4451_v63  ;;  %2150 = vmatpush.msra.mxu2 %v1632_v45  ;;  %v6840_v38 = vsel %vm4485_vm8, 4294967295, %v6839_v38  ;;  %v1631_v45 = vld [vmem:[%s6172_s3 + $0x138] sm:$0xff]  ;;  %vm6853_vm8 = vnez %v6642_v20  ;;  %v6859_v20 = vmov 0  ;;  %6865 = vst [vmem:[#allocation74_spill] sm:$0xff] %v6864_v54  ;;  %v4677_v54 = vld [vmem:[%s6172_s3 + $0x8] sm:$0xff] }
 0x16d   :  { %6841 = vst [vmem:[#allocation69_spill] sm:$0xff] %v6840_v38  ;;  %2033 = vmatpush.msra.mxu0 %v4472_v55  ;;  %vm4580_vm0 = vmor %vm6853_vm8, %vm6852_vm15  ;;  %vm6858_vm8 = vnez %v6644_v17  ;;  %v4619_v17 = vld [vmem:[%s6172_s3 + $0x18] sm:$0xff]  ;;  %2488 = vmatpush.msra.mxu3 %v1600_v13 }
 0x16e   :  { %2092 = vmatpush.msra.mxu1 %v4477_v3  ;;  %2151 = vmatpush.msra.mxu2 %v1631_v45  ;;  %v1630_v45 = vld [vmem:[%s6172_s3 + $0x130] sm:$0xff]  ;;  %vm4599_vm15 = vmor %vm6858_vm8, %vm6857_vm1  ;;  %v1063_v13 = vld [vmem:[%s6170_s1 + $0x7a] sm:$0x3f]  ;;  %vm6873_vm8 = vcmp.eq.s32.totalorder %v2768_v31, %v4047_v42 }
 0x16f   :  { %2034 = vmatpush.msra.mxu0 %v4511_v43  ;;  %v6860_v20 = vsel %vm4599_vm15, 4294967295, %v6859_v20  ;;  %2489 = vmatpush.msra.mxu3 %v4472_v55  ;;  %v1079_v55 = vadd.s32 320, %v1063_v13  ;;  %v4689_v13 = vld [vmem:[%s6172_s3 + $0x88] sm:$0xff]  ;;  %vm1259_vm15 = vcmp.eq.s32.totalorder %v2768_v31, %v4127_v23 }
 0x170   :  { %2093 = vmatpush.msra.mxu1 %v4516_v22  ;;  %2152 = vmatpush.msra.mxu2 %v1630_v45  ;;  %v4556_v45 = vpop.permute.xlu0 %1116  ;;  %6861 = vst [vmem:[#allocation73_spill] sm:$0xff] %v6860_v20  ;;  %v1592_v20 = vld [vmem:[%s6172_s3] sm:$0xff] }
 0x171   :  { %2035 = vmatpush.msra.mxu0 %v4548_v61  ;;  %2490 = vmatpush.msra.mxu3 %v4511_v43  ;;  %v4708_v43 = vld [vmem:[%s6172_s3 + $0x80] sm:$0xff]  ;;  %vm6876_vm1 = vcmp.eq.s32.totalorder %v2768_v31, %v4556_v45  ;;  %vm6882_vm6 = vcmp.eq.s32.totalorder %v2771_v34, %v4556_v45 }
 0x172   :  { %870 = vperm.xlu2 %2533, %v583_v10   ;;  %v1078_v10 = vadd.s32 320, %v1062_v9  ;;  %2094 = vmatpush.msra.mxu1 %v4562_v32  ;;  %v6854_v9 = vmov 0  ;;  %vm4727_vm13 = vmor %vm6876_vm1, %vm1259_vm15  ;;  %vm6879_vm15 = vcmp.eq.s32.totalorder %v2771_v34, %v4443_v44 }
 0x173   :  { %1395 = vperm.xlu1 %2532, %v1110_v4   ;;  %v6855_v9 = vsel %vm4580_vm0, 4294967295, %v6854_v9  ;;  %2153 = vmatpush.msra.mxu2 %v1629_v49  ;;  %v4592_v4 = vld [vmem:[%s6172_s3 + $0xa0] sm:$0xff]  ;;  %v4603_v49 = vpop.permute.xlu1 %1356  ;;  %vm4720_vm0 = vmor %vm6873_vm8, %vm6872_vm3  ;;  %vm1162_vm3 = vcmp.eq.s32.totalorder %v2774_v35, %v4047_v42  ;;  %vm1261_vm8 = vcmp.eq.s32.totalorder %v2774_v35, %v4127_v23  ;;  %v6884_v42 = vmov 0 }
 0x174   :  { %6856 = vst [vmem:[#allocation72_spill] sm:$0xff] %v6855_v9  ;;  %1251 = vperm.xlu0 %2531, %v1078_v10   ;;  %2036 = vmatpush.msra.mxu0 %v4587_v0  ;;  %v1628_v10 = vld [vmem:[%s6172_s3 + $0x120] sm:$0xff]  ;;  %v4642_v9 = vpop.permute.xlu2 %1128  ;;  %vm4743_vm1 = vmor %vm1161_vm14, %vm6879_vm15  ;;  %vm1404_vm2 = vcmp.eq.s32.totalorder %v2771_v34, %v4603_v49  ;;  %vm6886_vm14 = vcmp.eq.s32.totalorder %v2774_v35, %v4556_v45 }
 0x175   :  { %2095 = vmatpush.msra.mxu1 %v4592_v4  ;;  %2154 = vmatpush.msra.mxu2 %v1628_v10  ;;  %v1095_v10 = vld [vmem:[%s6171_s2 + $0x7a] sm:$0x3f]  ;;  %v6881_v7 = vsel %vm4743_vm1, 4294967295, %v6880_v7  ;;  %vm1308_vm11 = vmor %vm6882_vm6, %vm1260_vm9  ;;  %vm1405_vm6 = vcmp.eq.s32.totalorder %v2774_v35, %v4603_v49  ;;  %vm6887_vm9 = vcmp.eq.s32.totalorder %v2768_v31, %v4603_v49  ;;  %vm6346_vm1 = vcmask 1043456  }
 0x176   :  { %2037 = vmatpush.msra.mxu0 %v4619_v17  ;;  %v1111_v38 = vadd.s32 352, %v1095_v10  ;;  %v1031_v10 = vld [vmem:[%s6169_s0 + $0x7a] sm:$0x3f]  ;;  %vm1309_vm15 = vmor %vm6886_vm14, %vm1261_vm8  ;;  %2491 = vmatpush.msra.mxu3 %v4548_v61 }
 0x177   :  { %2096 = vmatpush.msra.mxu1 %v4624_v40  ;;  %2155 = vmatpush.msra.mxu2 %v1627_v53  ;;  %v1626_v53 = vld [vmem:[%s6172_s3 + $0x110] sm:$0xff]  ;;  %vm6888_vm8 = vmor %vm6806_vm10, %vm4237_vm4  ;;  %vm6892_vm4 = vnez %v6529_v58  ;;  %vm6893_vm10 = vnez %v6805_v25 }
 0x178   :  { %2038 = vmatpush.msra.mxu0 %v4647_v52  ;;  %2492 = vmatpush.msra.mxu3 %v4587_v0 }
 0x179   :  { %2097 = vmatpush.msra.mxu1 %v4652_v11  ;;  %2156 = vmatpush.msra.mxu2 %v1626_v53  ;;  %v1625_v53 = vld [vmem:[%s6172_s3 + $0x108] sm:$0xff] }
 0x17a   :  { %1398 = vperm.xlu2 %2533, %v1111_v38   ;;  %v1047_v38 = vadd.s32 256, %v1031_v10  ;;  %2039 = vmatpush.msra.mxu0 %v4677_v54  ;;  %v1354_v10 = vpop.permute.xlu0 %1353 }
 0x17b   :  { %1254 = vperm.xlu1 %2532, %v1079_v55   ;;  %2098 = vmatpush.msra.mxu1 %v4689_v13  ;;  %v6874_v55 = vmov 0  ;;  %v4765_v23 = vpop.permute.xlu1 %1359 }
 0x17c   :  { %v6875_v55 = vsel %vm4720_vm0, 4294967295, %v6874_v55  ;;  %1158 = vperm.xlu0 %2531, %v1047_v38   ;;  %2157 = vmatpush.msra.mxu2 %v1625_v53  ;;  %vm6883_vm0 = vcmp.eq.s32.totalorder %v2774_v35, %v4443_v44  ;;  %v4774_v44 = vpop.permute.xlu2 %1227 }
 0x17d   :  { %2040 = vmatpush.msra.mxu0 %v1592_v20  ;;  %2099 = vmatpush.msra.mxu1 %v4708_v43  ;;  %vm4756_vm7 = vmor %vm1162_vm3, %vm6883_vm0 }
 0x17e   :  { %v6885_v42 = vsel %vm4756_vm7, 4294967295, %v6884_v42  ;;  %2158 = vmatpush.msra.mxu2 %v1624_v12  ;;  %vm1451_vm0 = vmor %vm4727_vm13, %vm6887_vm9  ;;  %2493 = vmatpush.msra.mxu3 %v4619_v17  ;;  %vm6347_vm9 = vcmask 1045508   ;;  %vm1402_vm13 = vcmp.eq.s32.totalorder %v2774_v35, %v1354_v10 }
 0x17f   :  { %vm1452_vm3 = vmor %vm1308_vm11, %vm1404_vm2 }
 0x180   :  { %vm1453_vm7 = vmor %vm1309_vm15, %vm1405_vm6  ;;  %vm1401_vm15 = vcmp.eq.s32.totalorder %v2771_v34, %v1354_v10  ;;  %vm6348_vm6 = vcmask 1043458   ;;  %2494 = vmatpush.msra.mxu3 %v4647_v52 }
 0x181   :  { %vm4781_vm14 = vmor %vm6888_vm8, %vm1451_vm0 }
 0x182   :  { %vm6891_vm2 = vmor %vm6807_vm5, %vm4252_vm12  ;;  %vm6345_vm12 = vcmask 1045506   ;;  %vm6895_vm5 = vcmp.eq.s32.totalorder %v2768_v31, %v1354_v10  ;;  %v1216_v58 = vpop.permute.xlu0 %1215  ;;  %v1547_v46 = vsel %vm4781_vm14, 1.0, %v2568_v59  ;;  %2495 = vmatpush.msra.mxu3 %v4677_v54  ;;  %vm6901_vm14 = vnez %v6885_v42 }
 0x183   :  { %vm1500_vm11 = vmor %vm6891_vm2, %vm1452_vm3  ;;  %vm6896_vm3 = vnez %v6875_v55  ;;  %v4842_v53 = vpop.permute.xlu1 %1218 }
 0x184   :  { %vm6894_vm0 = vmor %vm6892_vm4, %vm6893_vm10  ;;  %v1548_v60 = vsel %vm1500_vm11, 1.0, %v2568_v59  ;;  %vm6900_vm4 = vcmask 1041408   ;;  %2496 = vmatpush.msra.mxu3 %v1592_v20  ;;  %v6915_v20 = vld [vmem:[#allocation44_spill] sm:$0xff] }
 0x185   :  { %vm1501_vm8 = vmor %vm6894_vm0, %vm1453_vm7  ;;  %v1690_v2 = vrot.slane %v1548_v60, 6  ;;  %vm6897_vm7 = vnez %v6881_v7  ;;  %vm6905_vm0 = vnez %v6684_v47  ;;  %v6913_v47 = vld [vmem:[#allocation2_spill] sm:$0xff]  ;;  %v4880_v60 = vpop.permute.xlu2 %1134 }
 0x186   :  { %v1549_v16 = vsel %vm1501_vm8, 1.0, %v2568_v59  ;;  %vm1448_vm2 = vmor %vm6896_vm3, %vm6895_vm5  ;;  %vm1166_vm3 = vcmp.eq.s32.totalorder %v2768_v31, %v4211_v24  ;;  %2497 = vmatpush.msrb.mxu3 %v4204_v48 }
 0x187   :  { %v1691_v25 = vrot.slane %v1549_v16, 4  ;;  %vm4813_vm11 = vmor %vm6897_vm7, %vm1401_vm15  ;;  %v1737_v61 = vsel %vm6900_vm4, %v1547_v46, %v1690_v2  ;;  %v1739_v45 = vsel %vm6348_vm6, %v1547_v46, %v1690_v2  ;;  %v1742_v0 = vsel %vm6347_vm9, %v1547_v46, %v1690_v2 }
 0x188   :  { %vm4825_vm10 = vmor %vm6901_vm14, %vm1402_vm13  ;;  %vm6904_vm15 = vnez %v6420_v18  ;;  %vm1262_vm13 = vcmp.eq.s32.totalorder %v2768_v31, %v1216_v58  ;;  %vm6909_vm7 = vnez %v6422_v6  ;;  %v6910_v18 = vld [vmem:[#allocation43_spill] sm:$0xff]  ;;  %2498 = vmatpush.msrb.mxu3 %v4228_v21 }
 0x189   :  { %v1738_v7 = vsel %vm6346_vm1, %v1737_v61, %v1691_v25  ;;  %v1740_v17 = vsel %vm6345_vm12, %v1739_v45, %v1691_v25  ;;  %v1743_v54 = vsel %vm6346_vm1, %v1691_v25, %v1742_v0  ;;  %vm6906_vm8 = vmor %vm6904_vm15, %vm6905_vm0  ;;  %vm1263_vm15 = vcmp.eq.s32.totalorder %v2771_v34, %v1216_v58 }
 0x18a   :  { %vm4837_vm5 = vmor %vm6906_vm8, %vm1448_vm2  ;;  %v1741_v10 = vrot.slane %v1740_v17, 2  ;;  %v1744_v55 = vrot.slane %v1743_v54, 4  ;;  %1886 = vst [vmem:[#allocation1 + $0x20] ss:$4 sm:$0xff] %v1738_v7  ;;  %vm6911_vm2 = vnez %v6910_v18  ;;  %vm1167_vm0 = vcmp.eq.s32.totalorder %v2771_v34, %v4211_v24  ;;  %2499 = vmatpush.msrb.mxu3 %v4275_v19  ;;  %v1126_v19 = vpop.permute.xlu0 %1125  ;;  %v6994_v54 = vld [vmem:[#allocation46_spill] sm:$0xff] }
 0x18b   :  { %vm6912_vm4 = vmor %vm6909_vm7, %vm6911_vm2  ;;  %vm6349_vm8 = vcmask 1045504   ;;  %vm6914_vm12 = vnez %v6913_v47  ;;  %vm6916_vm1 = vnez %v6915_v20  ;;  %vm1168_vm7 = vcmp.eq.s32.totalorder %v2774_v35, %v4211_v24 }
 0x18c   :  { %vm1497_vm14 = vmor %vm6912_vm4, %vm4813_vm11  ;;  %vm1264_vm11 = vcmp.eq.s32.totalorder %v2774_v35, %v1216_v58  ;;  %1888 = vst [vmem:[#allocation1 + $0x21] ss:$4 sm:$0xff] %v1741_v10  ;;  %vm1406_vm2 = vcmp.eq.s32.totalorder %v2768_v31, %v4765_v23  ;;  %v1544_v16 = vsel %vm4837_vm5, 1.0, %v2568_v59  ;;  %vm6924_vm5 = vcmask 1045508   ;;  %2500 = vmatpush.msrb.mxu3 %v4293_v57 }
 0x18d   :  { %vm6917_vm9 = vmor %vm6914_vm12, %vm6916_vm1  ;;  %v1545_v6 = vsel %vm1497_vm14, 1.0, %v2568_v59  ;;  %1890 = vst [vmem:[#allocation1 + $0x22] ss:$4 sm:$0xff] %v1744_v55  ;;  %vm6925_vm4 = vcmask 1043456   ;;  %vm6926_vm14 = vcmask 1045506   ;;  %v4970_v57 = vpop.permute.xlu2 %1233 }
 0x18e   :  { %vm1498_vm6 = vmor %vm6917_vm9, %vm4825_vm10  ;;  %v1688_v42 = vrot.slane %v1545_v6, 6  ;;  %vm1408_vm9 = vcmp.eq.s32.totalorder %v2774_v35, %v4765_v23  ;;  %vm6922_vm10 = vcmask 1041408   ;;  %2501 = vmatpush.msrb.mxu3 %v4320_v39 }
 0x18f   :  { %v1546_v48 = vsel %vm1498_vm6, 1.0, %v2568_v59  ;;  %vm4876_vm1 = vmor %vm1166_vm3, %vm1262_vm13  ;;  %vm1407_vm6 = vcmp.eq.s32.totalorder %v2771_v34, %v4765_v23  ;;  %vm6923_vm13 = vcmask 1043458  }
 0x190   :  { %v1689_v2 = vrot.slane %v1546_v48, 4  ;;  %vm4895_vm12 = vmor %vm1167_vm0, %vm1263_vm15  ;;  %v1721_v21 = vsel %vm6922_vm10, %v1544_v16, %v1688_v42  ;;  %v1725_v25 = vsel %vm6923_vm13, %v1544_v16, %v1688_v42  ;;  %v1730_v52 = vsel %vm6924_vm5, %v1544_v16, %v1688_v42  ;;  %2502 = vmatpush.msrb.mxu3 %v4343_v8  ;;  %v7017_v48 = vld [vmem:[#allocation8_spill] sm:$0xff] }
 0x191   :  { %v1734_v61 = vsel %vm6349_vm8, %v1688_v42, %v1544_v16  ;;  %vm1312_vm3 = vmor %vm1168_vm7, %vm1264_vm11  ;;  %vm6930_vm13 = vnez %v6785_v36 }
 0x192   :  { %v1723_v45 = vsel %vm6925_vm4, %v1721_v21, %v1689_v2  ;;  %v1727_v0 = vsel %vm6926_vm14, %v1725_v25, %v1689_v2  ;;  %vm6927_vm15 = vmmov %vm6925_vm4  ;;  %2503 = vmatpush.msrb.mxu3 %v4401_v33  ;;  %v7039_v21 = vld [vmem:[#allocation52_spill] sm:$0xff] }
 0x193   :  { %v1731_v49 = vsel %vm6927_vm15, %v1689_v2, %v1730_v52  ;;  %vm6928_vm0 = vmmov %vm6926_vm14  ;;  %v1728_v58 = vrot.slane %v1727_v0, 2  ;;  %1878 = vst [vmem:[#allocation1] ss:$4 sm:$0xff] %v1723_v45  ;;  %vm6935_vm14 = vnez %v6788_v5 }
 0x194   :  { %v1735_v7 = vsel %vm6928_vm0, %v1689_v2, %v1734_v61  ;;  %vm1454_vm10 = vmor %vm4876_vm1, %vm1406_vm2  ;;  %v1732_v17 = vrot.slane %v1731_v49, 4  ;;  %vm1169_vm2 = vcmp.eq.s32.totalorder %v2768_v31, %v4369_v37  ;;  %vm6929_vm1 = vnez %v6514_v28  ;;  %v1366_v28 = vpop.permute.xlu1 %1365  ;;  %2504 = vmatpush.msrb.mxu3 %v4451_v63  ;;  %v1363_v63 = vpop.permute.xlu0 %1362  ;;  %v7044_v61 = vld [vmem:[#allocation53_spill] sm:$0xff] }
 0x195   :  { %v1736_v24 = vrot.slane %v1735_v7, 6  ;;  %vm1455_vm11 = vmor %vm4895_vm12, %vm1407_vm6  ;;  %1880 = vst [vmem:[#allocation1 + $0x1] ss:$4 sm:$0xff] %v1728_v58  ;;  %vm1265_vm12 = vcmp.eq.s32.totalorder %v2768_v31, %v4842_v53  ;;  %vm1266_vm6 = vcmp.eq.s32.totalorder %v2771_v34, %v4842_v53  ;;  %v6983_v7 = vld [vmem:[#allocation45_spill] sm:$0xff] }
 0x196   :  { %vm1456_vm7 = vmor %vm1312_vm3, %vm1408_vm9  ;;  %vm1268_vm9 = vcmp.eq.s32.totalorder %v2768_v31, %v4489_v41  ;;  %1882 = vst [vmem:[#allocation1 + $0x2] ss:$4 sm:$0xff] %v1732_v17  ;;  %vm6934_vm3 = vnez %v6517_v26  ;;  %2505 = vmatpush.msrb.mxu3 %v4477_v3  ;;  %v7028_v3 = vmov 0 }
 0x197   :  { %vm6931_vm5 = vmor %vm6929_vm1, %vm6930_vm13  ;;  %1884 = vst [vmem:[#allocation1 + $0x3] ss:$4 sm:$0xff] %v1736_v24  ;;  %vm6938_vm1 = vnez %v6791_v15 }
 0x198   :  { %vm4934_vm4 = vmor %vm6931_vm5, %vm1454_vm10  ;;  %vm6937_vm10 = vnez %v6520_v51  ;;  %2506 = vmatpush.msrb.mxu3 %v4516_v22  ;;  %v853_v22 = vpop.permute.xlu2 %852 }
 0x199   :  { %vm6936_vm15 = vmor %vm6934_vm3, %vm6935_vm14  ;;  %vm1172_vm3 = vcmp.eq.s32.totalorder %v2768_v31, %v1126_v19  ;;  %vm1173_vm14 = vcmp.eq.s32.totalorder %v2771_v34, %v1126_v19  ;;  %v1550_v51 = vsel %vm4934_vm4, 1.0, %v2568_v59  ;;  %vm6944_vm4 = vcmask 1045506  }
 0x19a   :  { %vm1503_vm0 = vmor %vm6936_vm15, %vm1455_vm11  ;;  %vm1267_vm11 = vcmp.eq.s32.totalorder %v2774_v35, %v4842_v53  ;;  %vm1412_vm15 = vcmp.eq.s32.totalorder %v2768_v31, %v1366_v28  ;;  %2507 = vmatpush.msrb.mxu3 %v4562_v32 }
 0x19b   :  { %vm6939_vm13 = vmor %vm6937_vm10, %vm6938_vm1  ;;  %v1551_v36 = vsel %vm1503_vm0, 1.0, %v2568_v59  ;;  %vm6940_vm0 = vcmask 1041408   ;;  %vm6941_vm10 = vcmask 1043458   ;;  %vm6942_vm1 = vcmask 1045508  }
 0x19c   :  { %vm1504_vm5 = vmor %vm6939_vm13, %vm1456_vm7  ;;  %v1692_v5 = vrot.slane %v1551_v36, 6  ;;  %vm6943_vm13 = vcmask 1043456   ;;  %v5077_v32 = vpop.permute.xlu1 %1224  ;;  %2508 = vmatpush.msrb.mxu3 %v4592_v4  ;;  %v6997_v36 = vld [vmem:[#allocation4_spill] sm:$0xff] }
 0x19d   :  { %v1552_v26 = vsel %vm1504_vm5, 1.0, %v2568_v59  ;;  %vm6945_vm5 = vmmov %vm6943_vm13 }
 0x19e   :  { %v1693_v15 = vrot.slane %v1552_v26, 4  ;;  %v1745_v39 = vsel %vm6940_vm0, %v1550_v51, %v1692_v5  ;;  %v1747_v23 = vsel %vm6941_vm10, %v1550_v51, %v1692_v5  ;;  %v1750_v38 = vsel %vm6942_vm1, %v1550_v51, %v1692_v5  ;;  %vm6946_vm7 = vmmov %vm6944_vm4  ;;  %v1894_v2 = vld.sshfl [vmem:[#allocation1 + $0x8] sm:$0xff pattern:$0x73625140]  ;;  %2509 = vmatpush.msrb.mxu3 %v4624_v40  ;;  %v6999_v26 = vld [vmem:[#allocation47_spill] sm:$0xff] }
 0x19f   :  { %v1753_v10 = vsel %vm6349_vm8, %v1692_v5, %v1550_v51  ;;  %vm4988_vm0 = vmor %vm1169_vm2, %vm1265_vm12  ;;  %vm1270_vm1 = vcmp.eq.s32.totalorder %v2774_v35, %v4489_v41  ;;  %vm6951_vm2 = vcmp.eq.s32.totalorder %v2771_v34, %v4369_v37  ;;  %v1895_v53 = vld.sshfl [vmem:[#allocation1 + $0x10] sm:$0xff pattern:$0x73625140]  ;;  %2100 = vmatmul.f32.vlgmr.msra.gmra.mxu1 %v1894_v2  ;;  %vm1410_vm8 = vcmp.eq.s32.totalorder %v2771_v34, %v1363_v63 }
 0x1a0   :  { %v1746_v8 = vsel %vm6943_vm13, %v1745_v39, %v1693_v15  ;;  %v1748_v55 = vsel %vm6944_vm4, %v1747_v23, %v1693_v15  ;;  %v1751_v18 = vsel %vm6945_vm5, %v1693_v15, %v1750_v38  ;;  %v1754_v47 = vsel %vm6946_vm7, %v1693_v15, %v1753_v10  ;;  %vm4997_vm10 = vmor %vm1172_vm3, %vm1268_vm9  ;;  %2159 = vmatmul.f32.vlgmr.msra.gmra.mxu2 %v1895_v53  ;;  %v7002_v15 = vld [vmem:[#allocation48_spill] sm:$0xff]  ;;  %v1132_v23 = vpop.permute.xlu0 %1131 }
 0x1a1   :  { %vm1171_vm7 = vcmp.eq.s32.totalorder %v2774_v35, %v4369_v37  ;;  %v1749_v6 = vrot.slane %v1748_v55, 2  ;;  %1892 = vst [vmem:[#allocation1 + $0x23] ss:$4 sm:$0xff] %v1746_v8  ;;  %vm5011_vm12 = vmor %vm6951_vm2, %vm1266_vm6  ;;  %vm6954_vm9 = vcmp.eq.s32.totalorder %v2771_v34, %v4489_v41  ;;  %vm1413_vm13 = vcmp.eq.s32.totalorder %v2771_v34, %v1366_v28  ;;  %v1893_v41 = vld.sshfl [vmem:[#allocation1] sm:$0xff pattern:$0x73625140]  ;;  %2510 = vmatpush.msrb.mxu3 %v4652_v11 }
 0x1a2   :  { %vm5020_vm3 = vmor %vm1173_vm14, %vm6954_vm9  ;;  %v1752_v12 = vrot.slane %v1751_v18, 4  ;;  %v1755_v16 = vrot.slane %v1754_v47, 6  ;;  %v6957_v37 = vmov 0  ;;  %vm6959_vm4 = vcmp.eq.s32.totalorder %v2774_v35, %v1126_v19  ;;  %2041 = vmatmul.f32.vlgmr.msra.gmra.mxu0 %v1893_v41  ;;  %v7006_v8 = vld [vmem:[#allocation49_spill] sm:$0xff]  ;;  %v7010_v18 = vld [vmem:[#allocation50_spill] sm:$0xff] }
 0x1a3   :  { %vm5029_vm6 = vmor %vm1171_vm7, %vm1267_vm11  ;;  %vm1414_vm14 = vcmp.eq.s32.totalorder %v2774_v35, %v1366_v28  ;;  %1899 = vst [vmem:[#allocation1] ss:$4 sm:$0xff] %v1749_v6  ;;  %v7004_v39 = vmov 0  ;;  %v7008_v11 = vmov 0  ;;  %2511 = vmatpush.msrb.mxu3 %v4689_v13  ;;  %v7012_v47 = vmov 0 }
 0x1a4   :  { %v6958_v37 = vsel %vm5029_vm6, 4294967295, %v6957_v37  ;;  %vm1318_vm5 = vmor %vm6959_vm4, %vm1270_vm1  ;;  %1900 = vst [vmem:[#allocation1 + $0x1] ss:$4 sm:$0xff] %v1752_v12  ;;  %vm6960_vm1 = vnez %v6553_v14  ;;  %vm1409_vm4 = vcmp.eq.s32.totalorder %v2768_v31, %v1363_v63  ;;  %vm6968_vm6 = vnez %v6559_v30 }
 0x1a5   :  { %vm1460_vm2 = vmor %vm4997_vm10, %vm1412_vm15  ;;  %vm6961_vm15 = vnez %v6828_v56  ;;  %1901 = vst [vmem:[#allocation1 + $0x2] ss:$4 sm:$0xff] %v1755_v16  ;;  %2512 = vmatpush.msrb.mxu3 %v4708_v43  ;;  %v7022_v16 = vld [vmem:[#allocation9_spill] sm:$0xff]  ;;  %v5187_v43 = vpop.permute.xlu2 %1143  ;;  %v7026_v53 = vmov 0 }
 0x1a6   :  { %vm1461_vm11 = vmor %vm5020_vm3, %vm1413_vm13  ;;  %vm6965_vm3 = vnez %v6556_v27  ;;  %vm6966_vm13 = vnez %v6831_v29 }
 0x1a7   :  { %vm1462_vm7 = vmor %vm1318_vm5, %vm1414_vm14 }
 0x1a8   :  { %vm6962_vm10 = vmor %vm6960_vm1, %vm6961_vm15  ;;  %v1896_v14 = vld.sshfl [vmem:[#allocation1 + $0x20] sm:$0xff pattern:$0x73625140]  ;;  %v1897_v30 = vld.sshfl [vmem:[#allocation1 + $0x28] sm:$0xff pattern:$0x73625140] }
 0x1a9   :  { %vm5051_vm9 = vmor %vm6962_vm10, %vm1460_vm2  ;;  %vm6969_vm2 = vnez %v6834_v50  ;;  %vm1411_vm10 = vcmp.eq.s32.totalorder %v2774_v35, %v1363_v63  ;;  %v1898_v25 = vld.sshfl [vmem:[#allocation1 + $0x30] sm:$0xff pattern:$0x73625140]  ;;  %2103 = vmatmul.f32.gmra.mxu1 %v1897_v30  ;;  %v7024_v63 = vld [vmem:[#allocation10_spill] sm:$0xff] }
 0x1aa   :  { %vm6967_vm5 = vmor %vm6965_vm3, %vm6966_vm13  ;;  %v1556_v52 = vsel %vm5051_vm9, 1.0, %v2568_v59  ;;  %vm900_vm3 = vcmp.eq.s32.totalorder %v2771_v34, %v853_v22  ;;  %vm6980_vm13 = vcmask 1045508   ;;  %vm6982_vm9 = vnez %v6439_v1  ;;  %2044 = vmatmul.f32.gmra.mxu0 %v1896_v14  ;;  %v6992_v1 = vld [vmem:[#allocation3_spill] sm:$0xff]  ;;  %2162 = vmatmul.f32.gmra.mxu2 %v1898_v25  ;;  %v7032_v30 = vld [vmem:[#allocation5_spill] sm:$0xff] }
 0x1ab   :  { %vm1509_vm14 = vmor %vm6967_vm5, %vm1461_vm11  ;;  %vm6981_vm5 = vcmask 1045504  }
 0x1ac   :  { %vm6970_vm1 = vmor %vm6968_vm6, %vm6969_vm2  ;;  %v1557_v27 = vsel %vm1509_vm14, 1.0, %v2568_v59  ;;  %vm6984_vm14 = vnez %v6983_v7 }
 0x1ad   :  { %vm1510_vm15 = vmor %vm6970_vm1, %vm1462_vm7  ;;  %v1696_v50 = vrot.slane %v1557_v27, 6  ;;  %v7030_v27 = vmov 0  ;;  %v5238_v25 = vpop.permute.xlu2 %1380 }
 0x1ae   :  { %v1558_v56 = vsel %vm1510_vm15, 1.0, %v2568_v59  ;;  %vm5073_vm11 = vmor %vm4988_vm0, %vm1409_vm4  ;;  %vm6975_vm0 = vnez %v6958_v37  ;;  %vm899_vm4 = vcmp.eq.s32.totalorder %v2768_v31, %v853_v22  ;;  %vm6988_vm15 = vcmask 1043456   ;;  %v1372_v37 = vpop.permute.xlu1 %1371 }
 0x1af   :  { %v1697_v46 = vrot.slane %v1558_v56, 4  ;;  %vm5082_vm6 = vmor %vm5011_vm12, %vm1410_vm8  ;;  %vm6978_vm8 = vcmask 1041408   ;;  %vm6979_vm12 = vcmask 1043458   ;;  %v1769_v0 = vsel %vm6980_vm13, %v1556_v52, %v1696_v50 }
 0x1b0   :  { %vm5091_vm7 = vmor %vm6975_vm0, %vm1411_vm10  ;;  %v1764_v4 = vsel %vm6978_vm8, %v1556_v52, %v1696_v50  ;;  %v1766_v45 = vsel %vm6979_vm12, %v1556_v52, %v1696_v50  ;;  %v1772_v49 = vsel %vm6981_vm5, %v1696_v50, %v1556_v52  ;;  %vm6989_vm10 = vcmask 1045506   ;;  %v7034_v50 = vld [vmem:[#allocation51_spill] sm:$0xff] }
 0x1b1   :  { %vm6985_vm2 = vmor %vm6982_vm9, %vm6984_vm14  ;;  %v1765_v40 = vsel %vm6988_vm15, %v1764_v4, %v1697_v46  ;;  %v1767_v17 = vsel %vm6989_vm10, %v1766_v45, %v1697_v46  ;;  %vm6993_vm12 = vnez %v6992_v1  ;;  %vm6998_vm9 = vnez %v6997_v36  ;;  %v7042_v52 = vld [vmem:[#allocation7_spill] sm:$0xff] }
 0x1b2   :  { %vm5109_vm1 = vmor %vm6985_vm2, %vm5073_vm11  ;;  %vm6995_vm11 = vnez %v6994_v54  ;;  %v1768_v28 = vrot.slane %v1767_v17, 2  ;;  %1905 = vst [vmem:[#allocation1 + $0x22] ss:$4 sm:$0xff] %v1765_v40  ;;  %vm7000_vm14 = vnez %v6999_v26 }
 0x1b3   :  { %vm6990_vm0 = vmmov %vm6988_vm15  ;;  %v1553_v55 = vsel %vm5109_vm1, 1.0, %v2568_v59  ;;  %vm7019_vm1 = vcmask 1043456  }
 0x1b4   :  { %v5116_v24 = vsel %vm6990_vm0, %v1697_v46, %v1769_v0  ;;  %vm6991_vm8 = vmmov %vm6989_vm10  ;;  %vm901_vm10 = vcmp.eq.s32.totalorder %v2774_v35, %v853_v22  ;;  %1906 = vst [vmem:[#allocation1 + $0x23] ss:$4 sm:$0xff] %v1768_v28  ;;  %v1369_v22 = vpop.permute.xlu0 %1368 }
 0x1b5   :  { %v5119_v19 = vsel %vm6991_vm8, %v1697_v46, %v1772_v49  ;;  %vm6996_vm13 = vmor %vm6993_vm12, %vm6995_vm11  ;;  %vm7014_vm11 = vcmask 1041408   ;;  %v1771_v14 = vrot.slane %v5116_v24, 4  ;;  %v7037_v46 = vld [vmem:[#allocation6_spill] sm:$0xff] }
 0x1b6   :  { %vm1506_vm5 = vmor %vm6996_vm13, %vm5082_vm6  ;;  %vm7003_vm6 = vnez %v7002_v15  ;;  %vm7015_vm13 = vcmask 1043458   ;;  %v1774_v29 = vrot.slane %v5119_v19, 6 }
 0x1b7   :  { %vm7001_vm2 = vmor %vm6998_vm9, %vm7000_vm14  ;;  %v1554_v5 = vsel %vm1506_vm5, 1.0, %v2568_v59  ;;  %vm7020_vm14 = vcmask 1045506   ;;  %vm1275_vm9 = vcmp.eq.s32.totalorder %v2771_v34, %v4774_v44 }
 0x1b8   :  { %vm1507_vm15 = vmor %vm7001_vm2, %vm5091_vm7  ;;  %v1694_v38 = vrot.slane %v1554_v5, 6  ;;  %vm7007_vm7 = vnez %v7006_v8 }
 0x1b9   :  { %v1555_v51 = vsel %vm1507_vm15, 1.0, %v2568_v59  ;;  %vm5143_vm0 = vmor %vm7003_vm6, %vm899_vm4  ;;  %vm7011_vm4 = vnez %v7010_v18  ;;  %vm1177_vm15 = vcmp.eq.s32.totalorder %v2774_v35, %v4642_v9 }
 0x1ba   :  { %v7005_v39 = vsel %vm5143_vm0, 4294967295, %v7004_v39  ;;  %v1695_v10 = vrot.slane %v1555_v51, 4  ;;  %vm5151_vm8 = vmor %vm7007_vm7, %vm900_vm3  ;;  %v1756_v20 = vsel %vm7014_vm11, %v1553_v55, %v1694_v38  ;;  %v1758_v33 = vsel %vm7015_vm13, %v1553_v55, %v1694_v38 }
 0x1bb   :  { %v7009_v11 = vsel %vm5151_vm8, 4294967295, %v7008_v11  ;;  %vm5161_vm12 = vmor %vm7011_vm4, %vm901_vm10  ;;  %vm7016_vm3 = vcmask 1045508   ;;  %vm1271_vm4 = vcmp.eq.s32.totalorder %v2768_v31, %v5077_v32  ;;  %vm1178_vm11 = vcmp.eq.s32.totalorder %v2768_v31, %v1132_v23 }
 0x1bc   :  { %v7013_v47 = vsel %vm5161_vm12, 4294967295, %v7012_v47  ;;  %v1761_v6 = vsel %vm7016_vm3, %v1553_v55, %v1694_v38  ;;  %v1757_v13 = vsel %vm7019_vm1, %v1756_v20, %v1695_v10  ;;  %v1759_v42 = vsel %vm7020_vm14, %v1758_v33, %v1695_v10  ;;  %vm7021_vm2 = vmmov %vm7019_vm1  ;;  %v1138_v36 = vpop.permute.xlu0 %1137  ;;  %v7072_v20 = vld [vmem:[#allocation67_spill] sm:$0xff]  ;;  %v7075_v33 = vld [vmem:[#allocation18_spill] sm:$0xff] }
 0x1bd   :  { %v1762_v12 = vsel %vm7021_vm2, %v1695_v10, %v1761_v6  ;;  %v1760_v41 = vrot.slane %v1759_v42, 2  ;;  %1902 = vst [vmem:[#allocation1 + $0x3] ss:$4 sm:$0xff] %v1757_v13  ;;  %vm1272_vm13 = vcmp.eq.s32.totalorder %v2771_v34, %v5077_v32  ;;  %vm1179_vm3 = vcmp.eq.s32.totalorder %v2771_v34, %v1132_v23  ;;  %v7065_v10 = vld [vmem:[#allocation66_spill] sm:$0xff]  ;;  %v7077_v6 = vld [vmem:[#allocation68_spill] sm:$0xff] }
 0x1be   :  { %v1763_v2 = vrot.slane %v1762_v12, 4  ;;  %vm1175_vm1 = vcmp.eq.s32.totalorder %v2768_v31, %v4642_v9  ;;  %vm1274_vm14 = vcmp.eq.s32.totalorder %v2768_v31, %v4774_v44  ;;  %vm1273_vm2 = vcmp.eq.s32.totalorder %v2774_v35, %v5077_v32  ;;  %v5224_v32 = vpop.permute.xlu1 %1230 }
 0x1bf   :  { %1903 = vst [vmem:[#allocation1 + $0x20] ss:$4 sm:$0xff] %v1760_v41  ;;  %vm1180_vm7 = vcmp.eq.s32.totalorder %v2774_v35, %v1132_v23  ;;  %vm1176_vm10 = vcmp.eq.s32.totalorder %v2771_v34, %v4642_v9  ;;  %vm5203_vm12 = vmor %vm1175_vm1, %vm1271_vm4  ;;  %vm1418_vm8 = vcmp.eq.s32.totalorder %v2768_v31, %v1372_v37  ;;  %vm1276_vm0 = vcmp.eq.s32.totalorder %v2774_v35, %v4774_v44 }
 0x1c0   :  { %1904 = vst [vmem:[#allocation1 + $0x21] ss:$4 sm:$0xff] %v1763_v2  ;;  %v7027_v53 = vsel %vm5203_vm12, 4294967295, %v7026_v53  ;;  %vm1322_vm6 = vmor %vm1178_vm11, %vm1274_vm14  ;;  %vm1419_vm4 = vcmp.eq.s32.totalorder %v2771_v34, %v1372_v37  ;;  %vm1420_vm14 = vcmp.eq.s32.totalorder %v2774_v35, %v1372_v37 }
 0x1c1   :  { %vm5212_vm5 = vmor %vm1176_vm10, %vm1272_vm13 }
 0x1c2   :  { %v7029_v3 = vsel %vm5212_vm5, 4294967295, %v7028_v3  ;;  %vm1323_vm1 = vmor %vm1179_vm3, %vm1275_vm9 }
 0x1c3   :  { %vm5218_vm12 = vmor %vm1177_vm15, %vm1273_vm2  ;;  %vm7033_vm15 = vnez %v7032_v30  ;;  %vm1415_vm2 = vcmp.eq.s32.totalorder %v2768_v31, %v1369_v22 }
 0x1c4   :  { %v7031_v27 = vsel %vm5218_vm12, 4294967295, %v7030_v27  ;;  %vm1324_vm11 = vmor %vm1180_vm7, %vm1276_vm0  ;;  %v1907_v9 = vld.sshfl [vmem:[#allocation1] sm:$0xff pattern:$0x73625140]  ;;  %vm7035_vm0 = vnez %v7034_v50  ;;  %vm7045_vm12 = vnez %v7044_v61  ;;  %v7088_v50 = vmov 0 }
 0x1c5   :  { %v1908_v56 = vld.sshfl [vmem:[#allocation1 + $0x8] sm:$0xff pattern:$0x73625140]  ;;  %vm1466_vm10 = vmor %vm1322_vm6, %vm1418_vm8  ;;  %v1909_v44 = vld.sshfl [vmem:[#allocation1 + $0x10] sm:$0xff pattern:$0x73625140]  ;;  %2047 = vmatmul.f32.gmra.mxu0 %v1907_v9  ;;  %vm7038_vm8 = vnez %v7037_v46  ;;  %vm7040_vm6 = vnez %v7039_v21 }
 0x1c6   :  { %vm1467_vm13 = vmor %vm1323_vm1, %vm1419_vm4  ;;  %2106 = vmatmul.f32.gmra.mxu1 %v1908_v56  ;;  %1913 = vst [vmem:[#allocation1] ss:$4 sm:$0xff] %v1771_v14  ;;  %2165 = vmatmul.f32.gmra.mxu2 %v1909_v44  ;;  %v1378_v37 = vpop.permute.xlu1 %1377  ;;  %v5329_v14 = vpop.permute.xlu2 %1146  ;;  %v7086_v44 = vmov 0  ;;  %v7091_v46 = vmov 0  ;;  %v7093_v21 = vld [vmem:[#allocation19_spill] sm:$0xff]  ;;  %v7103_v61 = vld [vmem:[#allocation21_spill] sm:$0xff] }
 0x1c7   :  { %vm1468_vm9 = vmor %vm1324_vm11, %vm1420_vm14  ;;  %1914 = vst [vmem:[#allocation1 + $0x1] ss:$4 sm:$0xff] %v1774_v29  ;;  %vm1416_vm11 = vcmp.eq.s32.totalorder %v2771_v34, %v1369_v22  ;;  %vm7043_vm14 = vnez %v7042_v52  ;;  %v1910_v17 = vld.sshfl [vmem:[#allocation1 + $0x20] sm:$0xff pattern:$0x73625140]  ;;  %v7100_v52 = vld [vmem:[#allocation70_spill] sm:$0xff] }
 0x1c8   :  { %vm7036_vm7 = vmor %vm7033_vm15, %vm7035_vm0  ;;  %vm7047_vm0 = vnez %v7027_v53  ;;  %v1911_v26 = vld.sshfl [vmem:[#allocation1 + $0x28] sm:$0xff pattern:$0x73625140]  ;;  %v1912_v5 = vld.sshfl [vmem:[#allocation1 + $0x30] sm:$0xff pattern:$0x73625140] }
 0x1c9   :  { %vm1514_vm3 = vmor %vm7036_vm7, %vm1466_vm10  ;;  %vm1417_vm10 = vcmp.eq.s32.totalorder %v2774_v35, %v1369_v22  ;;  %vm1181_vm7 = vcmp.eq.s32.totalorder %v2768_v31, %v4880_v60 }
 0x1ca   :  { %vm7041_vm1 = vmor %vm7038_vm8, %vm7040_vm6  ;;  %v1562_v7 = vsel %vm1514_vm3, 1.0, %v2568_v59  ;;  %vm7054_vm8 = vcmask 1043458   ;;  %vm7056_vm6 = vcmask 1045504   ;;  %vm7060_vm3 = vcmask 1043456  }
 0x1cb   :  { %vm1515_vm4 = vmor %vm7041_vm1, %vm1467_vm13  ;;  %vm7057_vm1 = vnez %v7031_v27 }
 0x1cc   :  { %vm7046_vm5 = vmor %vm7043_vm14, %vm7045_vm12  ;;  %v1563_v4 = vsel %vm1515_vm4, 1.0, %v2568_v59  ;;  %vm7050_vm12 = vnez %v7029_v3 }
 0x1cd   :  { %vm1516_vm15 = vmor %vm7046_vm5, %vm1468_vm9  ;;  %v1700_v0 = vrot.slane %v1563_v4, 6  ;;  %vm7053_vm9 = vcmask 1041408   ;;  %2050 = vmatmul.f32.gmra.mxu0 %v1910_v17  ;;  %v7105_v4 = vld [vmem:[#allocation71_spill] sm:$0xff] }
 0x1ce   :  { %v1564_v45 = vsel %vm1516_vm15, 1.0, %v2568_v59  ;;  %vm5250_vm13 = vmor %vm7047_vm0, %vm1415_vm2  ;;  %vm7055_vm2 = vcmask 1045508   ;;  %vm7064_vm0 = vnez %v6542_v62  ;;  %v7070_v62 = vld [vmem:[#allocation17_spill] sm:$0xff]  ;;  %2109 = vmatmul.f32.gmra.mxu1 %v1911_v26  ;;  %2168 = vmatmul.f32.gmra.mxu2 %v1912_v5  ;;  %v862_v40 = vpop.permute.xlu2 %861  ;;  %v7117_v5 = vld [vmem:[#allocation22_spill] sm:$0xff]  ;;  %v5437_v8 = vpop.permute.xlu1 %1140 }
 0x1cf   :  { %v1701_v58 = vrot.slane %v1564_v45, 4  ;;  %vm5259_vm5 = vmor %vm7050_vm12, %vm1416_vm11  ;;  %v1783_v24 = vsel %vm7053_vm9, %v1562_v7, %v1700_v0  ;;  %v1785_v19 = vsel %vm7054_vm8, %v1562_v7, %v1700_v0  ;;  %v1788_v1 = vsel %vm7055_vm2, %v1562_v7, %v1700_v0 }
 0x1d0   :  { %v1791_v54 = vsel %vm7056_vm6, %v1700_v0, %v1562_v7  ;;  %vm5269_vm4 = vmor %vm7057_vm1, %vm1417_vm10  ;;  %vm7061_vm11 = vcmask 1045506   ;;  %vm7066_vm10 = vnez %v7065_v10  ;;  %vm1182_vm8 = vcmp.eq.s32.totalorder %v2771_v34, %v4880_v60  ;;  %v7126_v10 = vld [vmem:[#allocation73_spill] sm:$0xff] }
 0x1d1   :  { %v1784_v51 = vsel %vm7060_vm3, %v1783_v24, %v1701_v58  ;;  %v1786_v15 = vsel %vm7061_vm11, %v1785_v19, %v1701_v58  ;;  %vm7062_vm14 = vmmov %vm7060_vm3  ;;  %vm7071_vm6 = vnez %v7070_v62  ;;  %vm7073_vm1 = vnez %v7072_v20  ;;  %v7131_v62 = vld [vmem:[#allocation74_spill] sm:$0xff] }
 0x1d2   :  { %v1789_v23 = vsel %vm7062_vm14, %v1701_v58, %v1788_v1  ;;  %vm7063_vm15 = vmmov %vm7061_vm11  ;;  %v1787_v55 = vrot.slane %v1786_v15, 2  ;;  %1918 = vst [vmem:[#allocation1 + $0x21] ss:$4 sm:$0xff] %v1784_v51  ;;  %vm1280_vm11 = vcmp.eq.s32.totalorder %v2768_v31, %v4970_v57  ;;  %vm1281_vm14 = vcmp.eq.s32.totalorder %v2771_v34, %v4970_v57  ;;  %v7119_v51 = vld [vmem:[#allocation72_spill] sm:$0xff]  ;;  %v7178_v15 = vld [vmem:[#allocation30_spill] sm:$0xff] }
 0x1d3   :  { %v5277_v38 = vsel %vm7063_vm15, %v1701_v58, %v1791_v54  ;;  %vm7067_vm12 = vmor %vm7064_vm0, %vm7066_vm10  ;;  %v1790_v18 = vrot.slane %v1789_v23, 4  ;;  %vm7076_vm15 = vnez %v7075_v33  ;;  %vm7078_vm0 = vnez %v7077_v6 }
 0x1d4   :  { %vm5286_vm9 = vmor %vm7067_vm12, %vm5250_vm13  ;;  %1919 = vst [vmem:[#allocation1 + $0x22] ss:$4 sm:$0xff] %v1787_v55  ;;  %v1793_v0 = vrot.slane %v5277_v38, 6  ;;  %v7124_v38 = vld [vmem:[#allocation23_spill] sm:$0xff]  ;;  %v7168_v19 = vmov 0 }
 0x1d5   :  { %vm7074_vm13 = vmor %vm7071_vm6, %vm7073_vm1  ;;  %vm1278_vm6 = vcmp.eq.s32.totalorder %v2771_v34, %v5224_v32  ;;  %vm1184_vm1 = vcmp.eq.s32.totalorder %v2768_v31, %v1138_v36  ;;  %1920 = vst [vmem:[#allocation1 + $0x23] ss:$4 sm:$0xff] %v1790_v18  ;;  %v1559_v41 = vsel %vm5286_vm9, 1.0, %v2568_v59  ;;  %v7129_v18 = vld [vmem:[#allocation24_spill] sm:$0xff] }
 0x1d6   :  { %vm1512_vm3 = vmor %vm7074_vm13, %vm5259_vm5  ;;  %vm1277_vm5 = vcmp.eq.s32.totalorder %v2768_v31, %v5224_v32  ;;  %vm1185_vm13 = vcmp.eq.s32.totalorder %v2771_v34, %v1138_v36 }
 0x1d7   :  { %vm7079_vm10 = vmor %vm7076_vm15, %vm7078_vm0  ;;  %v1560_v13 = vsel %vm1512_vm3, 1.0, %v2568_v59  ;;  %vm7080_vm3 = vcmask 1041408   ;;  %vm7081_vm15 = vcmask 1043458  }
 0x1d8   :  { %vm1513_vm12 = vmor %vm7079_vm10, %vm5269_vm4  ;;  %v1698_v12 = vrot.slane %v1560_v13, 6  ;;  %vm1279_vm4 = vcmp.eq.s32.totalorder %v2774_v35, %v5224_v32  ;;  %vm1186_vm10 = vcmp.eq.s32.totalorder %v2774_v35, %v1138_v36  ;;  %v7095_v32 = vld [vmem:[#allocation69_spill] sm:$0xff] }
 0x1d9   :  { %v1561_v42 = vsel %vm1513_vm12, 1.0, %v2568_v59  ;;  %vm7082_vm0 = vmmov %vm7055_vm2  ;;  %vm7083_vm12 = vcmask 1043456   ;;  %vm7084_vm2 = vcmask 1045506  }
 0x1da   :  { %v1699_v2 = vrot.slane %v1561_v42, 4  ;;  %v1775_v53 = vsel %vm7080_vm3, %v1559_v41, %v1698_v12  ;;  %v1777_v3 = vsel %vm7081_vm15, %v1559_v41, %v1698_v12  ;;  %v1780_v22 = vsel %vm7082_vm0, %v1559_v41, %v1698_v12  ;;  %vm7085_vm9 = vmmov %vm7083_vm12 }
 0x1db   :  { %vm5340_vm3 = vmor %vm1181_vm7, %vm1277_vm5  ;;  %vm1282_vm0 = vcmp.eq.s32.totalorder %v2774_v35, %v4970_v57  ;;  %vm1425_vm5 = vcmp.eq.s32.totalorder %v2771_v34, %v1378_v37  ;;  %v1375_v57 = vpop.permute.xlu0 %1374 }
 0x1dc   :  { %v1776_v27 = vsel %vm7083_vm12, %v1775_v53, %v1699_v2  ;;  %v1778_v9 = vsel %vm7084_vm2, %v1777_v3, %v1699_v2  ;;  %v1781_v56 = vsel %vm7085_vm9, %v1699_v2, %v1780_v22  ;;  %v7087_v44 = vsel %vm5340_vm3, 4294967295, %v7086_v44  ;;  %vm1328_vm15 = vmor %vm1184_vm1, %vm1280_vm11  ;;  %v7138_v2 = vld [vmem:[#allocation54_spill] sm:$0xff] }
 0x1dd   :  { %vm1424_vm2 = vcmp.eq.s32.totalorder %v2768_v31, %v1378_v37  ;;  %v1779_v29 = vrot.slane %v1778_v9, 2  ;;  %v1782_v30 = vrot.slane %v1781_v56, 4  ;;  %1915 = vst [vmem:[#allocation1 + $0x2] ss:$4 sm:$0xff] %v1776_v27  ;;  %vm5358_vm7 = vmor %vm1182_vm8, %vm1278_vm6  ;;  %vm7090_vm1 = vcmp.eq.s32.totalorder %v2774_v35, %v4880_v60  ;;  %v7098_v60 = vld [vmem:[#allocation20_spill] sm:$0xff]  ;;  %v7142_v56 = vld [vmem:[#allocation55_spill] sm:$0xff] }
 0x1de   :  { %v7089_v50 = vsel %vm5358_vm7, 4294967295, %v7088_v50  ;;  %vm1329_vm11 = vmor %vm1185_vm13, %vm1281_vm14  ;;  %vm1426_vm6 = vcmp.eq.s32.totalorder %v2774_v35, %v1378_v37  ;;  %vm7094_vm7 = vnez %v7093_v21  ;;  %vm7096_vm3 = vnez %v7095_v32  ;;  %v7150_v21 = vld [vmem:[#allocation11_spill] sm:$0xff] }
 0x1df   :  { %vm5374_vm12 = vmor %vm7090_vm1, %vm1279_vm4  ;;  %1916 = vst [vmem:[#allocation1 + $0x3] ss:$4 sm:$0xff] %v1779_v29  ;;  %v7140_v53 = vmov 0 }
 0x1e0   :  { %v7092_v46 = vsel %vm5374_vm12, 4294967295, %v7091_v46  ;;  %vm1330_vm8 = vmor %vm1186_vm10, %vm1282_vm0  ;;  %1917 = vst [vmem:[#allocation1 + $0x20] ss:$4 sm:$0xff] %v1782_v30  ;;  %vm1421_vm12 = vcmp.eq.s32.totalorder %v2768_v31, %v1375_v57  ;;  %vm7099_vm0 = vnez %v7098_v60  ;;  %vm7101_vm10 = vnez %v7100_v52 }
 0x1e1   :  { %vm1472_vm9 = vmor %vm1328_vm15, %vm1424_vm2 }
 0x1e2   :  { %vm1473_vm14 = vmor %vm1329_vm11, %vm1425_vm5  ;;  %vm1422_vm5 = vcmp.eq.s32.totalorder %v2771_v34, %v1375_v57  ;;  %vm7104_vm11 = vnez %v7103_v61  ;;  %v7155_v61 = vld [vmem:[#allocation12_spill] sm:$0xff] }
 0x1e3   :  { %vm1474_vm13 = vmor %vm1330_vm8, %vm1426_vm6  ;;  %vm7106_vm8 = vnez %v7105_v4  ;;  %v856_v33 = vpop.permute.xlu0 %855 }
 0x1e4   :  { %vm7097_vm1 = vmor %vm7094_vm7, %vm7096_vm3  ;;  %vm1423_vm7 = vcmp.eq.s32.totalorder %v2774_v35, %v1375_v57 }
 0x1e5   :  { %vm1520_vm4 = vmor %vm7097_vm1, %vm1472_vm9  ;;  %vm7108_vm9 = vnez %v7087_v44  ;;  %vm7109_vm1 = vnez %v7089_v50  ;;  %v7144_v44 = vmov 0  ;;  %v7146_v50 = vld [vmem:[#allocation56_spill] sm:$0xff] }
 0x1e6   :  { %vm7102_vm2 = vmor %vm7099_vm0, %vm7101_vm10  ;;  %v1568_v49 = vsel %vm1520_vm4, 1.0, %v2568_v59  ;;  %v1921_v17 = vld.sshfl [vmem:[#allocation1] sm:$0xff pattern:$0x73625140]  ;;  %vm7112_vm0 = vcmask 1041408   ;;  %vm7113_vm10 = vcmask 1043458  }
 0x1e7   :  { %vm1521_vm15 = vmor %vm7102_vm2, %vm1473_vm14  ;;  %v1922_v24 = vld.sshfl [vmem:[#allocation1 + $0x8] sm:$0xff pattern:$0x73625140]  ;;  %v1923_v1 = vld.sshfl [vmem:[#allocation1 + $0x10] sm:$0xff pattern:$0x73625140]  ;;  %2053 = vmatmul.f32.gmra.mxu0 %v1921_v17 }
 0x1e8   :  { %vm7107_vm6 = vmor %vm7104_vm11, %vm7106_vm8  ;;  %v1569_v45 = vsel %vm1521_vm15, 1.0, %v2568_v59  ;;  %vm7114_vm4 = vcmask 1045508   ;;  %vm7115_vm2 = vcmask 1045504   ;;  %vm7120_vm11 = vnez %v7119_v51  ;;  %2112 = vmatmul.f32.gmra.mxu1 %v1922_v24  ;;  %2171 = vmatmul.f32.gmra.mxu2 %v1923_v1  ;;  %1927 = vst [vmem:[#allocation1] ss:$4 sm:$0xff] %v1793_v0  ;;  %v7166_v24 = vld [vmem:[#allocation38_spill] sm:$0xff] }
 0x1e9   :  { %vm1522_vm3 = vmor %vm7107_vm6, %vm1474_vm13  ;;  %v1704_v58 = vrot.slane %v1569_v45, 6  ;;  %v1924_v55 = vld.sshfl [vmem:[#allocation1 + $0x20] sm:$0xff pattern:$0x73625140]  ;;  %v7164_v17 = vmov 0  ;;  %v7170_v1 = vld [vmem:[#allocation39_spill] sm:$0xff] }
 0x1ea   :  { %v1570_v7 = vsel %vm1522_vm3, 1.0, %v2568_v59  ;;  %vm1469_vm14 = vmor %vm7108_vm9, %vm1421_vm12  ;;  %vm7116_vm12 = vnez %v7092_v46  ;;  %vm908_vm3 = vcmp.eq.s32.totalorder %v2768_v31, %v862_v40  ;;  %vm7127_vm9 = vnez %v7126_v10  ;;  %v1925_v6 = vld.sshfl [vmem:[#allocation1 + $0x28] sm:$0xff pattern:$0x73625140]  ;;  %v7176_v51 = vld [vmem:[#allocation29_spill] sm:$0xff] }
 0x1eb   :  { %vm5407_vm13 = vmor %vm7109_vm1, %vm1422_vm5  ;;  %v1802_v54 = vsel %vm7112_vm0, %v1568_v49, %v1704_v58  ;;  %v1804_v28 = vsel %vm7113_vm10, %v1568_v49, %v1704_v58  ;;  %v1807_v36 = vsel %vm7114_vm4, %v1568_v49, %v1704_v58  ;;  %v1810_v26 = vsel %vm7115_vm2, %v1704_v58, %v1568_v49  ;;  %v1926_v13 = vld.sshfl [vmem:[#allocation1 + $0x30] sm:$0xff pattern:$0x73625140]  ;;  %v7160_v49 = vld [vmem:[#allocation13_spill] sm:$0xff] }
 0x1ec   :  { %vm1471_vm15 = vmor %vm7116_vm12, %vm1423_vm7  ;;  %vm7118_vm5 = vnez %v7117_v5  ;;  %v1705_v23 = vrot.slane %v1570_v7, 4  ;;  %vm7125_vm7 = vnez %v7124_v38  ;;  %vm909_vm10 = vcmp.eq.s32.totalorder %v2771_v34, %v862_v40  ;;  %v1237_v5 = vpop.permute.xlu0 %1236 }
 0x1ed   :  { %vm7121_vm8 = vmor %vm7118_vm5, %vm7120_vm11  ;;  %vm7132_vm4 = vnez %v7131_v62  ;;  %vm910_vm5 = vcmp.eq.s32.totalorder %v2774_v35, %v862_v40  ;;  %vm7134_vm11 = vcmask 1043456   ;;  %v7148_v46 = vmov 0  ;;  %v7162_v40 = vld [vmem:[#allocation37_spill] sm:$0xff] }
 0x1ee   :  { %vm5424_vm6 = vmor %vm7121_vm8, %vm1469_vm14  ;;  %vm7130_vm14 = vnez %v7129_v18  ;;  %v1803_v42 = vsel %vm7134_vm11, %v1802_v54, %v1705_v23  ;;  %v7172_v54 = vmov 0  ;;  %v7180_v62 = vmov 0 }
 0x1ef   :  { %vm7128_vm1 = vmor %vm7125_vm7, %vm7127_vm9  ;;  %vm7139_vm9 = vnez %v7138_v2  ;;  %1931 = vst [vmem:[#allocation1 + $0x20] ss:$4 sm:$0xff] %v1803_v42  ;;  %v1565_v57 = vsel %vm5424_vm6, 1.0, %v2568_v59  ;;  %2056 = vmatmul.f32.gmra.mxu0 %v1924_v55 }
 0x1f0   :  { %vm1518_vm0 = vmor %vm7128_vm1, %vm5407_vm13  ;;  %vm7135_vm13 = vcmask 1045506   ;;  %vm7143_vm1 = vnez %v7142_v56  ;;  %2115 = vmatmul.f32.gmra.mxu1 %v1925_v6  ;;  %2174 = vmatmul.f32.gmra.mxu2 %v1926_v13  ;;  %v7197_v6 = vld [vmem:[#allocation57_spill] sm:$0xff]  ;;  %v7199_v13 = vmov 0 }
 0x1f1   :  { %vm7133_vm2 = vmor %vm7130_vm14, %vm7132_vm4  ;;  %v1566_v20 = vsel %vm1518_vm0, 1.0, %v2568_v59  ;;  %v1805_v12 = vsel %vm7135_vm13, %v1804_v28, %v1705_v23  ;;  %v1240_v28 = vpop.permute.xlu1 %1239  ;;  %vm1283_vm4 = vcmp.eq.s32.totalorder %v2768_v31, %v1237_v5 }
 0x1f2   :  { %vm1519_vm12 = vmor %vm7133_vm2, %vm1471_vm15  ;;  %v1806_v3 = vrot.slane %v1805_v12, 2  ;;  %v1702_v29 = vrot.slane %v1566_v20, 6  ;;  %vm902_vm2 = vcmp.eq.s32.totalorder %v2768_v31, %v856_v33  ;;  %v7187_v20 = vmov 0  ;;  %v7202_v12 = vld [vmem:[#allocation58_spill] sm:$0xff] }
 0x1f3   :  { %vm7136_vm8 = vmmov %vm7134_vm11  ;;  %v1567_v9 = vsel %vm1519_vm12, 1.0, %v2568_v59  ;;  %vm903_vm12 = vcmp.eq.s32.totalorder %v2771_v34, %v856_v33  ;;  %vm904_vm11 = vcmp.eq.s32.totalorder %v2774_v35, %v856_v33 }
 0x1f4   :  { %v1808_v37 = vsel %vm7136_vm8, %v1705_v23, %v1807_v36  ;;  %vm7137_vm7 = vmmov %vm7135_vm13  ;;  %v1703_v30 = vrot.slane %v1567_v9, 4  ;;  %1932 = vst [vmem:[#allocation1 + $0x21] ss:$4 sm:$0xff] %v1806_v3  ;;  %vm7153_vm13 = vcmask 1043458   ;;  %vm7154_vm8 = vcmask 1045508   ;;  %v7174_v36 = vld [vmem:[#allocation28_spill] sm:$0xff]  ;;  %v1384_v18 = vpop.permute.xlu0 %1383 }
 0x1f5   :  { %v1811_v41 = vsel %vm7137_vm7, %v1705_v23, %v1810_v26  ;;  %vm5454_vm15 = vmor %vm7139_vm9, %vm908_vm3  ;;  %v1809_v22 = vrot.slane %v1808_v37, 4  ;;  %vm7147_vm3 = vnez %v7146_v50  ;;  %v1796_v60 = vsel %vm7153_vm13, %v1565_v57, %v1702_v29  ;;  %v5527_v26 = vpop.permute.xlu2 %1152 }
 0x1f6   :  { %v7141_v53 = vsel %vm5454_vm15, 4294967295, %v7140_v53  ;;  %v1812_v27 = vrot.slane %v1811_v41, 6  ;;  %vm5463_vm0 = vmor %vm7143_vm1, %vm909_vm10  ;;  %v1799_v52 = vsel %vm7154_vm8, %v1565_v57, %v1702_v29  ;;  %vm7157_vm9 = vcmask 1043456  }
 0x1f7   :  { %v7145_v44 = vsel %vm5463_vm0, 4294967295, %v7144_v44  ;;  %vm5471_vm14 = vmor %vm7147_vm3, %vm910_vm5  ;;  %1933 = vst [vmem:[#allocation1 + $0x22] ss:$4 sm:$0xff] %v1809_v22  ;;  %vm7152_vm5 = vcmask 1041408   ;;  %vm7163_vm8 = vnez %v7162_v40  ;;  %vm1188_vm0 = vcmp.eq.s32.totalorder %v2771_v34, %v5437_v8  ;;  %v7209_v22 = vld [vmem:[#allocation59_spill] sm:$0xff] }
 0x1f8   :  { %v7149_v46 = vsel %vm5471_vm14, 4294967295, %v7148_v46  ;;  %v1794_v32 = vsel %vm7152_vm5, %v1565_v57, %v1702_v29  ;;  %1934 = vst [vmem:[#allocation1 + $0x23] ss:$4 sm:$0xff] %v1812_v27  ;;  %vm7158_vm1 = vmmov %vm7137_vm7  ;;  %vm1284_vm14 = vcmp.eq.s32.totalorder %v2771_v34, %v1237_v5  ;;  %vm1285_vm5 = vcmp.eq.s32.totalorder %v2774_v35, %v1237_v5 }
 0x1f9   :  { %v1795_v4 = vsel %vm7157_vm9, %v1794_v32, %v1703_v30  ;;  %v1797_v45 = vsel %vm7158_vm1, %v1796_v60, %v1703_v30  ;;  %vm7159_vm3 = vmmov %vm7157_vm9  ;;  %vm7167_vm9 = vnez %v7166_v24  ;;  %v859_v55 = vpop.permute.xlu1 %858  ;;  %v7204_v37 = vmov 0  ;;  %v7218_v32 = vld [vmem:[#allocation26_spill] sm:$0xff]  ;;  %v7220_v60 = vld [vmem:[#allocation27_spill] sm:$0xff] }
 0x1fa   :  { %v1800_v0 = vsel %vm7159_vm3, %v1703_v30, %v1799_v52  ;;  %v1798_v7 = vrot.slane %v1797_v45, 2  ;;  %1928 = vst [vmem:[#allocation1 + $0x1] ss:$4 sm:$0xff] %v1795_v4  ;;  %vm5503_vm7 = vmor %vm7163_vm8, %vm902_vm2  ;;  %vm7171_vm3 = vnez %v7170_v1  ;;  %vm1187_vm8 = vcmp.eq.s32.totalorder %v2768_v31, %v5437_v8  ;;  %v7216_v30 = vld [vmem:[#allocation25_spill] sm:$0xff] }
 0x1fb   :  { %v1801_v58 = vrot.slane %v1800_v0, 4  ;;  %v7165_v17 = vsel %vm5503_vm7, 4294967295, %v7164_v17  ;;  %vm5511_vm1 = vmor %vm7167_vm9, %vm903_vm12  ;;  %vm1189_vm9 = vcmp.eq.s32.totalorder %v2774_v35, %v5437_v8  ;;  %vm7182_vm12 = vnez %v7017_v48 }
 0x1fc   :  { %v7169_v19 = vsel %vm5511_vm1, 4294967295, %v7168_v19  ;;  %1929 = vst [vmem:[#allocation1 + $0x2] ss:$4 sm:$0xff] %v1798_v7  ;;  %vm5519_vm13 = vmor %vm7171_vm3, %vm904_vm11  ;;  %vm1427_vm3 = vcmp.eq.s32.totalorder %v2768_v31, %v5238_v25  ;;  %vm1286_vm11 = vcmp.eq.s32.totalorder %v2768_v31, %v1240_v28  ;;  %vm905_vm2 = vcmp.eq.s32.totalorder %v2768_v31, %v859_v55  ;;  %v1243_v4 = vpop.permute.xlu0 %1242 }
 0x1fd   :  { %v7173_v54 = vsel %vm5519_vm13, 4294967295, %v7172_v54  ;;  %1930 = vst [vmem:[#allocation1 + $0x3] ss:$4 sm:$0xff] %v1801_v58  ;;  %vm1331_vm6 = vmor %vm1187_vm8, %vm1283_vm4  ;;  %vm1428_vm13 = vcmp.eq.s32.totalorder %v2771_v34, %v5238_v25  ;;  %vm1429_vm4 = vcmp.eq.s32.totalorder %v2774_v35, %v5238_v25  ;;  %v5554_v8 = vpop.permute.xlu2 %1389  ;;  %vm1288_vm8 = vcmp.eq.s32.totalorder %v2774_v35, %v1240_v28 }
 0x1fe   :  { %vm1332_vm15 = vmor %vm1188_vm0, %vm1284_vm14  ;;  %vm1287_vm0 = vcmp.eq.s32.totalorder %v2771_v34, %v1240_v28  ;;  %v7185_v25 = vmov 0  ;;  %v7211_v27 = vmov 0  ;;  %v7287_v45 = vmov 0 }
 0x1ff   :  { %vm1333_vm10 = vmor %vm1189_vm9, %vm1285_vm5  ;;  %vm1190_vm5 = vcmp.eq.s32.totalorder %v2768_v31, %v5187_v43  ;;  %v1940_v42 = vld.sshfl [vmem:[#allocation1 + $0x30] sm:$0xff pattern:$0x73625140] }
 0x200   :  { %vm1475_vm1 = vmor %vm1331_vm6, %vm1427_vm3  ;;  %vm1191_vm6 = vcmp.eq.s32.totalorder %v2771_v34, %v5187_v43 }
 0x201   :  { %vm1476_vm14 = vmor %vm1332_vm15, %vm1428_vm13  ;;  %vm7183_vm15 = vnez %v7005_v39  ;;  %v1938_v39 = vld.sshfl [vmem:[#allocation1 + $0x20] sm:$0xff pattern:$0x73625140]  ;;  %v1387_v0 = vpop.permute.xlu1 %1386 }
 0x202   :  { %vm1477_vm9 = vmor %vm1333_vm10, %vm1429_vm4  ;;  %vm1192_vm10 = vcmp.eq.s32.totalorder %v2774_v35, %v5187_v43 }
 0x203   :  { %vm5561_vm3 = vmor %vm1190_vm5, %vm1286_vm11  ;;  %vm7189_vm11 = vnez %v7022_v16  ;;  %vm7190_vm5 = vnez %v7009_v11  ;;  %v1939_v11 = vld.sshfl [vmem:[#allocation1 + $0x28] sm:$0xff pattern:$0x73625140] }
 0x204   :  { %v1935_v23 = vld.sshfl [vmem:[#allocation1] sm:$0xff pattern:$0x73625140]  ;;  %v1936_v38 = vld.sshfl [vmem:[#allocation1 + $0x8] sm:$0xff pattern:$0x73625140]  ;;  %vm7184_vm13 = vmor %vm7182_vm12, %vm7183_vm15 }
 0x205   :  { %v1937_v10 = vld.sshfl [vmem:[#allocation1 + $0x10] sm:$0xff pattern:$0x73625140]  ;;  %2059 = vmatmul.f32.gmra.mxu0 %v1935_v23  ;;  %2118 = vmatmul.f32.gmra.mxu1 %v1936_v38  ;;  %v7181_v62 = vsel %vm5561_vm3, 4294967295, %v7180_v62  ;;  %vm5570_vm7 = vmor %vm7184_vm13, %vm1475_vm1  ;;  %vm906_vm1 = vcmp.eq.s32.totalorder %v2771_v34, %v859_v55  ;;  %vm7194_vm13 = vnez %v7024_v63  ;;  %v5641_v52 = vpop.permute.xlu2 %1155 }
 0x206   :  { %2177 = vmatmul.f32.gmra.mxu2 %v1937_v10  ;;  %v7186_v25 = vsel %vm5570_vm7, 4294967295, %v7185_v25  ;;  %vm5577_vm4 = vmor %vm1191_vm6, %vm1287_vm0  ;;  %vm7195_vm0 = vnez %v7013_v47 }
 0x207   :  { %v7188_v20 = vsel %vm5577_vm4, 4294967295, %v7187_v20  ;;  %vm7191_vm3 = vmor %vm7189_vm11, %vm7190_vm5  ;;  %vm907_vm4 = vcmp.eq.s32.totalorder %v2774_v35, %v859_v55  ;;  %vm7208_vm11 = vcmask 1045508   ;;  %vm7210_vm5 = vnez %v7209_v22 }
 0x208   :  { %vm1524_vm12 = vmor %vm7191_vm3, %vm1476_vm14  ;;  %vm7198_vm14 = vnez %v7197_v6  ;;  %vm7201_vm3 = vnez %v7186_v25  ;;  %v7261_v6 = vld [vmem:[#allocation61_spill] sm:$0xff] }
 0x209   :  { %vm5587_vm15 = vmor %vm1192_vm10, %vm1288_vm8  ;;  %v1572_v43 = vsel %vm1524_vm12, 1.0, %v2568_v59  ;;  %v1571_v47 = vsel %vm7201_vm3, 1.0, %v2568_v59  ;;  %vm1430_vm3 = vcmp.eq.s32.totalorder %v2768_v31, %v1384_v18 }
 0x20a   :  { %vm7196_vm6 = vmor %vm7194_vm13, %vm7195_vm0  ;;  %v1706_v33 = vrot.slane %v1572_v43, 6  ;;  %vm7213_vm13 = vcmask 1043456   ;;  %v7257_v43 = vld [vmem:[#allocation60_spill] sm:$0xff] }
 0x20b   :  { %vm1525_vm7 = vmor %vm7196_vm6, %vm1477_vm9  ;;  %vm7203_vm9 = vnez %v7202_v12  ;;  %vm1291_vm6 = vcmp.eq.s32.totalorder %v2774_v35, %v1243_v4 }
 0x20c   :  { %v1573_v16 = vsel %vm1525_vm7, 1.0, %v2568_v59  ;;  %vm5601_vm8 = vmor %vm7198_vm14, %vm905_vm2  ;;  %vm7206_vm7 = vcmask 1041408   ;;  %vm7207_vm2 = vcmask 1043458   ;;  %v1818_v3 = vsel %vm7208_vm11, %v1571_v47, %v1706_v33 }
 0x20d   :  { %v7200_v13 = vsel %vm5601_vm8, 4294967295, %v7199_v13  ;;  %v1707_v63 = vrot.slane %v1573_v16, 4  ;;  %vm5610_vm10 = vmor %vm7203_vm9, %vm906_vm1  ;;  %2062 = vmatmul.f32.gmra.mxu0 %v1938_v39  ;;  %2121 = vmatmul.f32.gmra.mxu1 %v1939_v11  ;;  %v1813_v41 = vsel %vm7206_vm7, %v1571_v47, %v1706_v33  ;;  %v1815_v2 = vsel %vm7207_vm2, %v1571_v47, %v1706_v33  ;;  %v871_v38 = vpop.permute.xlu2 %870 }
 0x20e   :  { %v7205_v37 = vsel %vm5610_vm10, 4294967295, %v7204_v37  ;;  %vm5619_vm12 = vmor %vm7210_vm5, %vm907_vm4  ;;  %2180 = vmatmul.f32.gmra.mxu2 %v1940_v42  ;;  %vm7214_vm1 = vcmask 1045506   ;;  %vm1431_vm7 = vcmp.eq.s32.totalorder %v2771_v34, %v1384_v18  ;;  %vm1432_vm5 = vcmp.eq.s32.totalorder %v2774_v35, %v1384_v18 }
 0x20f   :  { %v7212_v27 = vsel %vm5619_vm12, 4294967295, %v7211_v27  ;;  %v1814_v9 = vsel %vm7213_vm13, %v1813_v41, %v1707_v63  ;;  %v1816_v56 = vsel %vm7214_vm1, %v1815_v2, %v1707_v63  ;;  %vm7215_vm0 = vmmov %vm7213_vm13  ;;  %vm7222_vm13 = vnez %v7181_v62  ;;  %v1150_v62 = vpop.permute.xlu1 %1149  ;;  %v7268_v41 = vld [vmem:[#allocation62_spill] sm:$0xff] }
 0x210   :  { %v1819_v29 = vsel %vm7215_vm0, %v1707_v63, %v1818_v3  ;;  %v1817_v50 = vrot.slane %v1816_v56, 2  ;;  %1941 = vst [vmem:[#allocation1] ss:$4 sm:$0xff] %v1814_v9  ;;  %vm1478_vm1 = vmor %vm7222_vm13, %vm1430_vm3  ;;  %vm7223_vm0 = vnez %v7188_v20  ;;  %vm7224_vm10 = vnez %v7174_v36  ;;  %v865_v20 = vpop.permute.xlu0 %864  ;;  %v7275_v56 = vld [vmem:[#allocation14_spill] sm:$0xff] }
 0x211   :  { %v1820_v57 = vrot.slane %v1819_v29, 4  ;;  %vm1479_vm9 = vmor %vm7223_vm0, %vm1431_vm7  ;;  %vm7225_vm11 = vnez %v7165_v17  ;;  %vm1289_vm3 = vcmp.eq.s32.totalorder %v2768_v31, %v1243_v4  ;;  %vm7229_vm13 = vnez %v7176_v51 }
 0x212   :  { %1942 = vst [vmem:[#allocation1 + $0x1] ss:$4 sm:$0xff] %v1817_v50  ;;  %vm1480_vm14 = vmor %vm5587_vm15, %vm1432_vm5  ;;  %vm7230_vm4 = vnez %v7169_v19  ;;  %vm1290_vm15 = vcmp.eq.s32.totalorder %v2771_v34, %v1243_v4  ;;  %vm1193_vm5 = vcmp.eq.s32.totalorder %v2768_v31, %v5329_v14  ;;  %v7259_v11 = vmov 0  ;;  %v7277_v50 = vld [vmem:[#allocation15_spill] sm:$0xff]  ;;  %v7285_v4 = vld [vmem:[#allocation41_spill] sm:$0xff] }
 0x213   :  { %1943 = vst [vmem:[#allocation1 + $0x2] ss:$4 sm:$0xff] %v1820_v57  ;;  %vm7226_vm12 = vmor %vm7224_vm10, %vm7225_vm11  ;;  %vm1194_vm10 = vcmp.eq.s32.totalorder %v2771_v34, %v5329_v14  ;;  %vm7233_vm11 = vnez %v7173_v54  ;;  %v7270_v2 = vmov 0  ;;  %v7279_v57 = vld [vmem:[#allocation16_spill] sm:$0xff] }
 0x214   :  { %vm5654_vm2 = vmor %vm7226_vm12, %vm1478_vm1  ;;  %vm7232_vm12 = vnez %v7178_v15 }
 0x215   :  { %vm7231_vm7 = vmor %vm7229_vm13, %vm7230_vm4  ;;  %vm1195_vm4 = vcmp.eq.s32.totalorder %v2774_v35, %v5329_v14  ;;  %v1574_v24 = vsel %vm5654_vm2, 1.0, %v2568_v59 }
 0x216   :  { %vm1527_vm0 = vmor %vm7231_vm7, %vm1479_vm9  ;;  %vm1433_vm9 = vcmp.eq.s32.totalorder %v2768_v31, %v1387_v0 }
 0x217   :  { %vm7234_vm1 = vmor %vm7232_vm12, %vm7233_vm11  ;;  %v1575_v7 = vsel %vm1527_vm0, 1.0, %v2568_v59  ;;  %vm7242_vm12 = vcmask 1045504   ;;  %vm7243_vm11 = vcmask 1043456  }
 0x218   :  { %vm1528_vm8 = vmor %vm7234_vm1, %vm1480_vm14  ;;  %v1708_v40 = vrot.slane %v1575_v7, 6  ;;  %vm1434_vm14 = vcmp.eq.s32.totalorder %v2771_v34, %v1387_v0  ;;  %vm7244_vm1 = vcmask 1045506   ;;  %v7291_v7 = vmov 0  ;;  %v1246_v17 = vpop.permute.xlu0 %1245 }
 0x219   :  { %v1576_v58 = vsel %vm1528_vm8, 1.0, %v2568_v59  ;;  %vm5680_vm13 = vmor %vm1193_vm5, %vm1289_vm3  ;;  %vm7239_vm8 = vcmask 1041408   ;;  %vm7240_vm3 = vcmask 1043458   ;;  %vm7241_vm5 = vcmask 1045508  }
 0x21a   :  { %v1709_v19 = vrot.slane %v1576_v58, 4  ;;  %vm5691_vm0 = vmor %vm1194_vm10, %vm1290_vm15  ;;  %v1821_v1 = vsel %vm7239_vm8, %v1574_v24, %v1708_v40  ;;  %v1823_v54 = vsel %vm7240_vm3, %v1574_v24, %v1708_v40  ;;  %v1826_v28 = vsel %vm7241_vm5, %v1574_v24, %v1708_v40  ;;  %v1249_v58 = vpop.permute.xlu1 %1248 }
 0x21b   :  { %v1829_v36 = vsel %vm7242_vm12, %v1708_v40, %v1574_v24  ;;  %vm1339_vm2 = vmor %vm1195_vm4, %vm1291_vm6  ;;  %vm7247_vm4 = vcmp.eq.s32.totalorder %v2774_v35, %v1387_v0  ;;  %vm7248_vm8 = vnez %v7216_v30  ;;  %vm7249_vm3 = vnez %v7200_v13  ;;  %v7289_v0 = vld [vmem:[#allocation42_spill] sm:$0xff]  ;;  %v7295_v24 = vld [vmem:[#allocation35_spill] sm:$0xff] }
 0x21c   :  { %v1822_v5 = vsel %vm7243_vm11, %v1821_v1, %v1709_v19  ;;  %v1824_v51 = vsel %vm7244_vm1, %v1823_v54, %v1709_v19  ;;  %vm7245_vm7 = vmmov %vm7243_vm11  ;;  %vm7251_vm12 = vnez %v7218_v32  ;;  %vm7252_vm11 = vnez %v7205_v37  ;;  %v7281_v32 = vld [vmem:[#allocation40_spill] sm:$0xff]  ;;  %v7293_v40 = vld [vmem:[#allocation34_spill] sm:$0xff] }
 0x21d   :  { %v1827_v15 = vsel %vm7245_vm7, %v1709_v19, %v1826_v28  ;;  %vm7246_vm15 = vmmov %vm7244_vm1  ;;  %v1825_v10 = vrot.slane %v1824_v51, 2  ;;  %1944 = vst [vmem:[#allocation1 + $0x3] ss:$4 sm:$0xff] %v1822_v5  ;;  %v7263_v13 = vmov 0  ;;  %v7297_v1 = vld [vmem:[#allocation36_spill] sm:$0xff]  ;;  %v7299_v5 = vmov 0 }
 0x21e   :  { %v1830_v23 = vsel %vm7246_vm15, %v1709_v19, %v1829_v36  ;;  %vm1481_vm10 = vmor %vm5680_vm13, %vm1433_vm9  ;;  %v1828_v55 = vrot.slane %v1827_v15, 4  ;;  %vm917_vm13 = vcmp.eq.s32.totalorder %v2768_v31, %v871_v38  ;;  %v7316_v51 = vmov 0 }
 0x21f   :  { %v1831_v18 = vrot.slane %v1830_v23, 6  ;;  %vm1482_vm6 = vmor %vm5691_vm0, %vm1434_vm14  ;;  %1945 = vst [vmem:[#allocation1 + $0x20] ss:$4 sm:$0xff] %v1825_v10  ;;  %vm918_vm14 = vcmp.eq.s32.totalorder %v2771_v34, %v871_v38  ;;  %vm7254_vm0 = vnez %v7220_v60  ;;  %v7283_v60 = vmov 0  ;;  %v7318_v23 = vld [vmem:[#allocation64_spill] sm:$0xff] }
 0x220   :  { %vm1483_vm7 = vmor %vm1339_vm2, %vm7247_vm4  ;;  %1946 = vst [vmem:[#allocation1 + $0x21] ss:$4 sm:$0xff] %v1828_v55  ;;  %vm7255_vm2 = vnez %v7212_v27  ;;  %v1393_v36 = vpop.permute.xlu0 %1392 }
 0x221   :  { %vm7250_vm5 = vmor %vm7248_vm8, %vm7249_vm3  ;;  %1947 = vst [vmem:[#allocation1 + $0x22] ss:$4 sm:$0xff] %v1831_v18 }
 0x222   :  { %vm1529_vm9 = vmor %vm7250_vm5, %vm1481_vm10  ;;  %vm919_vm10 = vcmp.eq.s32.totalorder %v2774_v35, %v871_v38  ;;  %vm7262_vm5 = vnez %v7261_v6  ;;  %v868_v28 = vpop.permute.xlu1 %867 }
 0x223   :  { %vm7253_vm1 = vmor %vm7251_vm12, %vm7252_vm11  ;;  %v1577_v16 = vsel %vm1529_vm9, 1.0, %v2568_v59  ;;  %vm7265_vm12 = vcmask 1041408   ;;  %vm7266_vm11 = vcmask 1043458   ;;  %vm911_vm9 = vcmp.eq.s32.totalorder %v2768_v31, %v865_v20 }
 0x224   :  { %vm1530_vm15 = vmor %vm7253_vm1, %vm1482_vm6  ;;  %vm7258_vm6 = vnez %v7257_v43  ;;  %v1949_v42 = vld.sshfl [vmem:[#allocation1] sm:$0xff pattern:$0x73625140]  ;;  %v1950_v47 = vld.sshfl [vmem:[#allocation1 + $0x8] sm:$0xff pattern:$0x73625140] }
 0x225   :  { %vm7256_vm4 = vmor %vm7254_vm0, %vm7255_vm2  ;;  %v1578_v25 = vsel %vm1530_vm15, 1.0, %v2568_v59  ;;  %vm7267_vm1 = vcmask 1045508   ;;  %v1951_v3 = vld.sshfl [vmem:[#allocation1 + $0x10] sm:$0xff pattern:$0x73625140]  ;;  %vm7273_vm0 = vcmask 1045506   ;;  %2065 = vmatmul.f32.gmra.mxu0 %v1949_v42  ;;  %2124 = vmatmul.f32.gmra.mxu1 %v1950_v47 }
 0x226   :  { %vm1531_vm8 = vmor %vm7256_vm4, %vm1483_vm7  ;;  %v1710_v48 = vrot.slane %v1578_v25, 6  ;;  %2183 = vmatmul.f32.gmra.mxu2 %v1951_v3  ;;  %v7328_v25 = vmov 0  ;;  %v7336_v47 = vld [vmem:[#allocation32_spill] sm:$0xff] }
 0x227   :  { %v1579_v39 = vsel %vm1531_vm8, 1.0, %v2568_v59  ;;  %vm5737_vm3 = vmor %vm7258_vm6, %vm917_vm13  ;;  %vm7269_vm13 = vnez %v7268_v41  ;;  %vm1292_vm8 = vcmp.eq.s32.totalorder %v2768_v31, %v1246_v17 }
 0x228   :  { %v7260_v11 = vsel %vm5737_vm3, 4294967295, %v7259_v11  ;;  %v1711_v33 = vrot.slane %v1579_v39, 4  ;;  %vm5744_vm7 = vmor %vm7262_vm5, %vm918_vm14  ;;  %v1832_v63 = vsel %vm7265_vm12, %v1577_v16, %v1710_v48  ;;  %v1834_v12 = vsel %vm7266_vm11, %v1577_v16, %v1710_v48 }
 0x229   :  { %v7264_v13 = vsel %vm5744_vm7, 4294967295, %v7263_v13  ;;  %v1837_v37 = vsel %vm7267_vm1, %v1577_v16, %v1710_v48  ;;  %vm5753_vm15 = vmor %vm7269_vm13, %vm919_vm10  ;;  %vm7272_vm14 = vcmask 1043456   ;;  %vm912_vm5 = vcmp.eq.s32.totalorder %v2771_v34, %v865_v20  ;;  %v7334_v16 = vld [vmem:[#allocation31_spill] sm:$0xff] }
 0x22a   :  { %v7271_v2 = vsel %vm5753_vm15, 4294967295, %v7270_v2  ;;  %v1833_v22 = vsel %vm7272_vm14, %v1832_v63, %v1711_v33  ;;  %v1835_v27 = vsel %vm7273_vm0, %v1834_v12, %v1711_v33  ;;  %vm7274_vm2 = vmmov %vm7272_vm14  ;;  %vm913_vm1 = vcmp.eq.s32.totalorder %v2774_v35, %v865_v20  ;;  %v7338_v63 = vld [vmem:[#allocation33_spill] sm:$0xff]  ;;  %v1396_v12 = vpop.permute.xlu1 %1395 }
 0x22b   :  { %v1838_v9 = vsel %vm7274_vm2, %v1711_v33, %v1837_v37  ;;  %v1836_v29 = vrot.slane %v1835_v27, 2  ;;  %1948 = vst [vmem:[#allocation1 + $0x23] ss:$4 sm:$0xff] %v1833_v22  ;;  %vm7282_vm13 = vnez %v7281_v32  ;;  %vm7286_vm0 = vnez %v7285_v4  ;;  %v1252_v37 = vpop.permute.xlu0 %1251 }
 0x22c   :  { %v1839_v30 = vrot.slane %v1838_v9, 4  ;;  %vm5779_vm14 = vmor %vm7282_vm13, %vm911_vm9  ;;  %vm7290_vm11 = vnez %v7289_v0  ;;  %vm1293_vm13 = vcmp.eq.s32.totalorder %v2771_v34, %v1246_v17  ;;  %vm1196_vm15 = vcmp.eq.s32.totalorder %v2768_v31, %v1150_v62  ;;  %v2554_v9 = vld [vmem:[%s6172_s3 + $0x160] sm:$0xff] }
 0x22d   :  { %1955 = vst [vmem:[#allocation1] ss:$4 sm:$0xff] %v1836_v29  ;;  %v7284_v60 = vsel %vm5779_vm14, 4294967295, %v7283_v60  ;;  %vm5785_vm2 = vmor %vm7286_vm0, %vm912_vm5  ;;  %vm1294_vm12 = vcmp.eq.s32.totalorder %v2774_v35, %v1246_v17  ;;  %vm1197_vm0 = vcmp.eq.s32.totalorder %v2771_v34, %v1150_v62  ;;  %vm1198_vm10 = vcmp.eq.s32.totalorder %v2774_v35, %v1150_v62  ;;  %v7326_v62 = vld [vmem:[#allocation65_spill] sm:$0xff] }
 0x22e   :  { %1956 = vst [vmem:[#allocation1 + $0x1] ss:$4 sm:$0xff] %v1839_v30  ;;  %v7288_v45 = vsel %vm5785_vm2, 4294967295, %v7287_v45  ;;  %vm5791_vm6 = vmor %vm7290_vm11, %vm913_vm1  ;;  %vm1436_vm1 = vcmp.eq.s32.totalorder %v2768_v31, %v5554_v8  ;;  %vm1295_vm11 = vcmp.eq.s32.totalorder %v2768_v31, %v1249_v58  ;;  %vm1438_vm5 = vcmp.eq.s32.totalorder %v2774_v35, %v5554_v8 }
 0x22f   :  { %v7292_v7 = vsel %vm5791_vm6, 4294967295, %v7291_v7  ;;  %vm1340_vm7 = vmor %vm1196_vm15, %vm1292_vm8  ;;  %vm1437_vm6 = vcmp.eq.s32.totalorder %v2771_v34, %v5554_v8  ;;  %vm1296_vm14 = vcmp.eq.s32.totalorder %v2771_v34, %v1249_v58  ;;  %vm1199_vm8 = vcmp.eq.s32.totalorder %v2768_v31, %v5527_v26 }
 0x230   :  { %vm1341_vm3 = vmor %vm1197_vm0, %vm1293_vm13  ;;  %vm1297_vm13 = vcmp.eq.s32.totalorder %v2774_v35, %v1249_v58  ;;  %v7304_v8 = vmov 0 }
 0x231   :  { %vm1342_vm4 = vmor %vm1198_vm10, %vm1294_vm12  ;;  %vm1200_vm12 = vcmp.eq.s32.totalorder %v2771_v34, %v5527_v26 }
 0x232   :  { %v1952_v19 = vld.sshfl [vmem:[#allocation1 + $0x20] sm:$0xff pattern:$0x73625140]  ;;  %v1953_v14 = vld.sshfl [vmem:[#allocation1 + $0x28] sm:$0xff pattern:$0x73625140]  ;;  %vm1484_vm2 = vmor %vm1340_vm7, %vm1436_vm1  ;;  %vm7301_vm7 = vnez %v7150_v21  ;;  %vm7302_vm1 = vnez %v7141_v53 }
 0x233   :  { %v1954_v54 = vld.sshfl [vmem:[#allocation1 + $0x30] sm:$0xff pattern:$0x73625140]  ;;  %2068 = vmatmul.f32.gmra.mxu0 %v1952_v19  ;;  %2127 = vmatmul.f32.gmra.mxu1 %v1953_v14  ;;  %vm1485_vm15 = vmor %vm1341_vm3, %vm1437_vm6  ;;  %vm914_vm6 = vcmp.eq.s32.totalorder %v2768_v31, %v868_v28  ;;  %v1159_v58 = vpop.permute.xlu0 %1158 }
 0x234   :  { %2186 = vmatmul.f32.gmra.mxu2 %v1954_v54  ;;  %vm1486_vm10 = vmor %vm1342_vm4, %vm1438_vm5  ;;  %vm1201_vm4 = vcmp.eq.s32.totalorder %v2774_v35, %v5527_v26  ;;  %v7314_v26 = vld [vmem:[#allocation63_spill] sm:$0xff]  ;;  %v2101_v54 = vpop.f32.mrf.mxu1 }
 0x235   :  { %vm5826_vm0 = vmor %vm1199_vm8, %vm1295_vm11  ;;  %vm7306_vm11 = vnez %v7155_v61  ;;  %vm7307_vm8 = vnez %v7145_v44 }
 0x236   :  { %v7300_v5 = vsel %vm5826_vm0, 4294967295, %v7299_v5  ;;  %vm7303_vm9 = vmor %vm7301_vm7, %vm7302_vm1  ;;  %vm915_vm7 = vcmp.eq.s32.totalorder %v2771_v34, %v868_v28 }
 0x237   :  { %vm1532_vm3 = vmor %vm7303_vm9, %vm1484_vm2  ;;  %vm7311_vm9 = vnez %v7160_v49 }
 0x238   :  { %vm5838_vm5 = vmor %vm1200_vm12, %vm1296_vm14  ;;  %vm7312_vm12 = vnez %v7149_v46  ;;  %v1580_v15 = vsel %vm1532_vm3, 1.0, %v2568_v59  ;;  %v7320_v46 = vmov 0 }
 0x239   :  { %v7305_v8 = vsel %vm5838_vm5, 4294967295, %v7304_v8  ;;  %vm7308_vm0 = vmor %vm7306_vm11, %vm7307_vm8  ;;  %vm916_vm8 = vcmp.eq.s32.totalorder %v2774_v35, %v868_v28  ;;  %vm7322_vm11 = vcmask 1041408  }
 0x23a   :  { %vm1533_vm1 = vmor %vm7308_vm0, %vm1485_vm15  ;;  %vm7315_vm15 = vnez %v7314_v26 }
 0x23b   :  { %vm5848_vm2 = vmor %vm1201_vm4, %vm1297_vm13  ;;  %v1581_v21 = vsel %vm1533_vm1, 1.0, %v2568_v59  ;;  %vm7319_vm13 = vnez %v7318_v23  ;;  %vm7324_vm1 = vcmask 1045508  }
 0x23c   :  { %vm7313_vm14 = vmor %vm7311_vm9, %vm7312_vm12  ;;  %v1712_v61 = vrot.slane %v1581_v21, 6  ;;  %vm7327_vm9 = vnez %v7326_v62  ;;  %vm7331_vm12 = vcmask 1045506  }
 0x23d   :  { %vm1534_vm5 = vmor %vm7313_vm14, %vm1486_vm10  ;;  %vm1439_vm10 = vcmp.eq.s32.totalorder %v2768_v31, %v1393_v36 }
 0x23e   :  { %v1582_v44 = vsel %vm1534_vm5, 1.0, %v2568_v59  ;;  %vm5862_vm0 = vmor %vm7315_vm15, %vm914_vm6  ;;  %v1840_v38 = vsel %vm7322_vm11, %v1580_v15, %v1712_v61  ;;  %vm7323_vm5 = vcmask 1043458   ;;  %v1845_v55 = vsel %vm7324_vm1, %v1580_v15, %v1712_v61 }
 0x23f   :  { %v7317_v51 = vsel %vm5862_vm0, 4294967295, %v7316_v51  ;;  %v1713_v49 = vrot.slane %v1582_v44, 4  ;;  %vm5869_vm4 = vmor %vm7319_vm13, %vm915_vm7  ;;  %v1842_v10 = vsel %vm7323_vm5, %v1580_v15, %v1712_v61  ;;  %vm7325_vm6 = vcmask 1045504  }
 0x240   :  { %v7321_v46 = vsel %vm5869_vm4, 4294967295, %v7320_v46  ;;  %v1848_v18 = vsel %vm7325_vm6, %v1712_v61, %v1580_v15  ;;  %vm5880_vm3 = vmor %vm7327_vm9, %vm916_vm8  ;;  %vm7330_vm7 = vcmask 1043456   ;;  %vm1440_vm1 = vcmp.eq.s32.totalorder %v2771_v34, %v1393_v36 }
 0x241   :  { %v7329_v25 = vsel %vm5880_vm3, 4294967295, %v7328_v25  ;;  %v1841_v20 = vsel %vm7330_vm7, %v1840_v38, %v1713_v49  ;;  %v1843_v39 = vsel %vm7331_vm12, %v1842_v10, %v1713_v49  ;;  %vm7332_vm14 = vmmov %vm7330_vm7  ;;  %vm1441_vm7 = vcmp.eq.s32.totalorder %v2774_v35, %v1393_v36  ;;  %v1399_v36 = vpop.permute.xlu2 %1398 }
 0x242   :  { %v1846_v48 = vsel %vm7332_vm14, %v1713_v49, %v1845_v55  ;;  %vm7333_vm15 = vmmov %vm7331_vm12  ;;  %v1844_v33 = vrot.slane %v1843_v39, 2  ;;  %1957 = vst [vmem:[#allocation1 + $0x2] ss:$4 sm:$0xff] %v1841_v20  ;;  %vm7340_vm12 = vnez %v7300_v5  ;;  %vm7342_vm9 = vnez %v7293_v40 }
 0x243   :  { %v1849_v43 = vsel %vm7333_vm15, %v1713_v49, %v1848_v18  ;;  %v1847_v6 = vrot.slane %v1846_v48, 4  ;;  %vm1487_vm14 = vmor %vm7340_vm12, %vm1439_vm10  ;;  %vm7341_vm15 = vnez %v7305_v8  ;;  %vm7343_vm3 = vnez %v7284_v60  ;;  %v2160_v8 = vpop.f32.mrf.mxu2 }
 0x244   :  { %v1850_v42 = vrot.slane %v1849_v43, 6  ;;  %1958 = vst [vmem:[#allocation1 + $0x3] ss:$4 sm:$0xff] %v1844_v33  ;;  %vm1488_vm5 = vmor %vm7341_vm15, %vm1440_vm1  ;;  %vm1298_vm8 = vcmp.eq.s32.totalorder %v2768_v31, %v1252_v37  ;;  %vm7345_vm0 = vnez %v7295_v24  ;;  %vm7346_vm10 = vnez %v7288_v45  ;;  %v2104_v43 = vpop.f32.mrf.mxu1  ;;  %v2552_v33 = vld [vmem:[%s6172_s3 + $0x170] sm:$0xff] }
 0x245   :  { %1959 = vst [vmem:[#allocation1 + $0x20] ss:$4 sm:$0xff] %v1847_v6  ;;  %vm1489_vm11 = vmor %vm5848_vm2, %vm1441_vm7  ;;  %vm1299_vm1 = vcmp.eq.s32.totalorder %v2771_v34, %v1252_v37  ;;  %vm1202_vm15 = vcmp.eq.s32.totalorder %v2768_v31, %v5641_v52  ;;  %vm1203_vm2 = vcmp.eq.s32.totalorder %v2771_v34, %v5641_v52  ;;  %vm7348_vm7 = vnez %v7297_v1  ;;  %v2042_v1 = vpop.f32.mrf.mxu0 }
 0x246   :  { %1960 = vst [vmem:[#allocation1 + $0x21] ss:$4 sm:$0xff] %v1850_v42  ;;  %vm7344_vm6 = vmor %vm7342_vm9, %vm7343_vm3  ;;  %vm7349_vm3 = vnez %v7292_v7  ;;  %v1255_v7 = vpop.permute.xlu1 %1254 }
 0x247   :  { %vm1535_vm4 = vmor %vm7344_vm6, %vm1487_vm14  ;;  %vm1300_vm14 = vcmp.eq.s32.totalorder %v2774_v35, %v1252_v37  ;;  %v2553_v37 = vld [vmem:[%s6172_s3 + $0x168] sm:$0xff] }
 0x248   :  { %vm7347_vm12 = vmor %vm7345_vm0, %vm7346_vm10  ;;  %v1583_v3 = vsel %vm1535_vm4, 1.0, %v2568_v59  ;;  %vm1442_vm0 = vcmp.eq.s32.totalorder %v2768_v31, %v1396_v12  ;;  %vm1204_vm10 = vcmp.eq.s32.totalorder %v2774_v35, %v5641_v52 }
 0x249   :  { %vm1536_vm13 = vmor %vm7347_vm12, %vm1488_vm5  ;;  %vm7356_vm12 = vcmask 1043458  }
 0x24a   :  { %vm7350_vm6 = vmor %vm7348_vm7, %vm7349_vm3  ;;  %v1584_v41 = vsel %vm1536_vm13, 1.0, %v2568_v59  ;;  %vm1443_vm13 = vcmp.eq.s32.totalorder %v2771_v34, %v1396_v12  ;;  %vm7359_vm3 = vcmask 1045506  }
 0x24b   :  { %vm1537_vm9 = vmor %vm7350_vm6, %vm1489_vm11  ;;  %v1714_v27 = vrot.slane %v1584_v41, 6  ;;  %v1963_v29 = vld.sshfl [vmem:[#allocation1] sm:$0xff pattern:$0x73625140]  ;;  %vm1444_vm11 = vcmp.eq.s32.totalorder %v2774_v35, %v1396_v12  ;;  %v2163_v6 = vpop.f32.mrf.mxu2 }
 0x24c   :  { %v1585_v22 = vsel %vm1537_vm9, 1.0, %v2568_v59  ;;  %vm5936_vm5 = vmor %vm1202_vm15, %vm1298_vm8  ;;  %v1964_v30 = vld.sshfl [vmem:[#allocation1 + $0x8] sm:$0xff pattern:$0x73625140]  ;;  %vm7355_vm8 = vcmask 1041408   ;;  %vm7357_vm15 = vcmask 1045508   ;;  %2071 = vmatmul.f32.gmra.mxu0 %v1963_v29 }
 0x24d   :  { %vm5946_vm4 = vmor %vm1203_vm2, %vm1299_vm1  ;;  %v1965_v60 = vld.sshfl [vmem:[#allocation1 + $0x10] sm:$0xff pattern:$0x73625140]  ;;  %v1715_v4 = vrot.slane %v1585_v22, 4  ;;  %v1851_v45 = vsel %vm7355_vm8, %v1583_v3, %v1714_v27  ;;  %v1853_v0 = vsel %vm7356_vm12, %v1583_v3, %v1714_v27  ;;  %v1856_v52 = vsel %vm7357_vm15, %v1583_v3, %v1714_v27  ;;  %2130 = vmatmul.f32.gmra.mxu1 %v1964_v30 }
 0x24e   :  { %vm1348_vm7 = vmor %vm1204_vm10, %vm1300_vm14  ;;  %2189 = vmatmul.f32.gmra.mxu2 %v1965_v60  ;;  %vm7358_vm2 = vcmask 1043456   ;;  %vm1207_vm12 = vcmp.eq.s32.totalorder %v2774_v35, %v1159_v58  ;;  %v2107_v60 = vpop.f32.mrf.mxu1 }
 0x24f   :  { %vm1490_vm1 = vmor %vm5936_vm5, %vm1442_vm0  ;;  %v1852_v40 = vsel %vm7358_vm2, %v1851_v45, %v1715_v4  ;;  %v1854_v17 = vsel %vm7359_vm3, %v1853_v0, %v1715_v4  ;;  %vm7361_vm0 = vnez %v7334_v16  ;;  %vm7362_vm5 = vnez %v7317_v51 }
 0x250   :  { %vm7360_vm6 = vmmov %vm7358_vm2  ;;  %v1855_v19 = vrot.slane %v1854_v17, 2  ;;  %1961 = vst [vmem:[#allocation1 + $0x22] ss:$4 sm:$0xff] %v1852_v40  ;;  %vm1302_vm2 = vcmp.eq.s32.totalorder %v2771_v34, %v1255_v7  ;;  %vm1206_vm3 = vcmp.eq.s32.totalorder %v2771_v34, %v1159_v58  ;;  %v2102_v16 = vadd.f32 %v2101_v54, %v2042_v1  ;;  %v2558_v54 = vld [vmem:[%s6172_s3 + $0x140] sm:$0xff] }
 0x251   :  { %v1857_v24 = vsel %vm7360_vm6, %v1715_v4, %v1856_v52  ;;  %vm1491_vm9 = vmor %vm5946_vm4, %vm1443_vm13  ;;  %vm1205_vm13 = vcmp.eq.s32.totalorder %v2768_v31, %v1159_v58  ;;  %vm7366_vm4 = vnez %v7336_v47  ;;  %vm7370_vm6 = vnez %v7329_v25  ;;  %v2555_v58 = vld [vmem:[%s6172_s3 + $0x158] sm:$0xff] }
 0x252   :  { %v1858_v14 = vrot.slane %v1857_v24, 4  ;;  %vm1492_vm14 = vmor %vm1348_vm7, %vm1444_vm11  ;;  %1962 = vst [vmem:[#allocation1 + $0x23] ss:$4 sm:$0xff] %v1855_v19  ;;  %vm7367_vm11 = vnez %v7321_v46  ;;  %v2556_v24 = vld [vmem:[%s6172_s3 + $0x150] sm:$0xff]  ;;  %v2557_v19 = vld [vmem:[%s6172_s3 + $0x148] sm:$0xff] }
 0x253   :  { %vm7363_vm10 = vmor %vm7361_vm0, %vm7362_vm5  ;;  %v2166_v40 = vpop.f32.mrf.mxu2 }
 0x254   :  { %vm5973_vm8 = vmor %vm7363_vm10, %vm1490_vm1  ;;  %1969 = vst [vmem:[#allocation1] ss:$4 sm:$0xff] %v1858_v14  ;;  %vm7369_vm1 = vnez %v7338_v63  ;;  %vm1303_vm10 = vcmp.eq.s32.totalorder %v2774_v35, %v1255_v7 }
 0x255   :  { %vm7368_vm15 = vmor %vm7366_vm4, %vm7367_vm11  ;;  %vm1445_vm11 = vcmp.eq.s32.totalorder %v2768_v31, %v1399_v36  ;;  %v1586_v61 = vsel %vm5973_vm8, 1.0, %v2568_v59  ;;  %vm7382_vm8 = vcmask 1045506  }
 0x256   :  { %vm1539_vm7 = vmor %vm7368_vm15, %vm1491_vm9  ;;  %vm7372_vm9 = vcmp.eq.s32.totalorder %v2768_v31, %v1255_v7 }
 0x257   :  { %vm7371_vm0 = vmor %vm7369_vm1, %vm7370_vm6  ;;  %v1587_v5 = vsel %vm1539_vm7, 1.0, %v2568_v59  ;;  %vm7377_vm7 = vcmask 1041408   ;;  %vm7379_vm1 = vcmask 1045508   ;;  %vm7380_vm6 = vcmask 1045504  }
 0x258   :  { %vm1540_vm5 = vmor %vm7371_vm0, %vm1492_vm14  ;;  %v1716_v21 = vrot.slane %v1587_v5, 6  ;;  %vm1446_vm14 = vcmp.eq.s32.totalorder %v2771_v34, %v1399_v36  ;;  %v2045_v34 = vpop.f32.mrf.mxu0 }
 0x259   :  { %v1588_v53 = vsel %vm1540_vm5, 1.0, %v2568_v59  ;;  %vm5997_vm4 = vmor %vm1205_vm13, %vm7372_vm9  ;;  %vm7378_vm13 = vcmask 1043458   ;;  %vm7381_vm5 = vcmask 1043456   ;;  %v1966_v20 = vld.sshfl [vmem:[#allocation1 + $0x20] sm:$0xff pattern:$0x73625140]  ;;  %v2105_v7 = vadd.f32 %v2104_v43, %v2045_v34 }
 0x25a   :  { %v1717_v26 = vrot.slane %v1588_v53, 4  ;;  %vm6008_vm15 = vmor %vm1206_vm3, %vm1302_vm2  ;;  %v1859_v15 = vsel %vm7377_vm7, %v1586_v61, %v1716_v21  ;;  %v1861_v49 = vsel %vm7378_vm13, %v1586_v61, %v1716_v21  ;;  %v1864_v23 = vsel %vm7379_vm1, %v1586_v61, %v1716_v21  ;;  %v6029_v39 = vld.sshfl [vmem:[#allocation1 + $0x28] sm:$0xff pattern:$0x73625140]  ;;  %2074 = vmatmul.f32.vlgmr.msra.gmra.mxu3 %v1966_v20  ;;  %v2563_v20 = vld [vmem:[%s6172_s3 + $0x118] sm:$0xff] }
 0x25b   :  { %v1867_v31 = vsel %vm7380_vm6, %v1716_v21, %v1586_v61  ;;  %vm1351_vm0 = vmor %vm1207_vm12, %vm1303_vm10  ;;  %vm1447_vm7 = vcmp.eq.s32.totalorder %v2774_v35, %v1399_v36  ;;  %v6031_v48 = vld.sshfl [vmem:[#allocation1 + $0x30] sm:$0xff pattern:$0x73625140]  ;;  %v2164_v17 = vadd.f32 %v2163_v6, %v2105_v7  ;;  %v2110_v61 = vpop.f32.mrf.mxu1 }
 0x25c   :  { %v1860_v46 = vsel %vm7381_vm5, %v1859_v15, %v1717_v26  ;;  %v1862_v38 = vsel %vm7382_vm8, %v1861_v49, %v1717_v26  ;;  %vm7383_vm9 = vmmov %vm7381_vm5  ;;  %vm7393_vm5 = vnez %v7279_v57  ;;  %v2169_v15 = vpop.f32.mrf.mxu2  ;;  %v2564_v43 = vld [vmem:[%s6172_s3 + $0x110] sm:$0xff] }
 0x25d   :  { %v1865_v10 = vsel %vm7383_vm9, %v1717_v26, %v1864_v23  ;;  %vm7384_vm2 = vmmov %vm7382_vm8  ;;  %v1863_v18 = vrot.slane %v1862_v38, 2  ;;  %1970 = vst [vmem:[#allocation1 + $0x1] ss:$4 sm:$0xff] %v1860_v46  ;;  %vm7394_vm8 = vnez %v7271_v2  ;;  %v2161_v2 = vadd.f32 %v2160_v8, %v2102_v16  ;;  %v2560_v23 = vld [vmem:[%s6172_s3 + $0x130] sm:$0xff]  ;;  %v2561_v38 = vld [vmem:[%s6172_s3 + $0x128] sm:$0xff] }
 0x25e   :  { %v1868_v55 = vsel %vm7384_vm2, %v1717_v26, %v1867_v31  ;;  %vm1493_vm3 = vmor %vm5997_vm4, %vm1445_vm11  ;;  %v1866_v62 = vrot.slane %v1865_v10, 4  ;;  %vm7385_vm4 = vnez %v7275_v56  ;;  %vm7386_vm11 = vnez %v7260_v11  ;;  %v2551_v56 = vld [vmem:[%s6172_s3 + $0x178] sm:$0xff] }
 0x25f   :  { %v1869_v25 = vrot.slane %v1868_v55, 6  ;;  %vm1494_vm12 = vmor %vm6008_vm15, %vm1446_vm14  ;;  %1971 = vst [vmem:[#allocation1 + $0x2] ss:$4 sm:$0xff] %v1863_v18  ;;  %vm7390_vm14 = vnez %v7277_v50  ;;  %vm7391_vm15 = vnez %v7264_v13  ;;  %2513 = vmatpush.msra.mxu3 %v2551_v56  ;;  %v2216_v30 = vrot.slane %v2161_v2, 2  ;;  %v2559_v26 = vld [vmem:[%s6172_s3 + $0x138] sm:$0xff]  ;;  %v2562_v55 = vld [vmem:[%s6172_s3 + $0x120] sm:$0xff] }
 0x260   :  { %vm1495_vm10 = vmor %vm1351_vm0, %vm1447_vm7  ;;  %1972 = vst [vmem:[#allocation1 + $0x3] ss:$4 sm:$0xff] %v1866_v62  ;;  %vm7397_vm7 = vcmask 1043458   ;;  %v2048_v32 = vpop.f32.mrf.mxu0  ;;  %v2217_v45 = vrot.slane %v2161_v2, 4  ;;  %v2218_v52 = vrot.slane %v2161_v2, 6  ;;  %v2219_v1 = vrot.slane %v2164_v17, 2 }
 0x261   :  { %vm7387_vm13 = vmor %vm7385_vm4, %vm7386_vm11  ;;  %1973 = vst [vmem:[#allocation1 + $0x20] ss:$4 sm:$0xff] %v1869_v25  ;;  %2514 = vmatpush.msra.mxu3 %v2552_v33  ;;  %vm7400_vm4 = vcmask 1045506   ;;  %v2108_v14 = vadd.f32 %v2107_v60, %v2048_v32  ;;  %v2220_v5 = vrot.slane %v2164_v17, 4  ;;  %v2221_v8 = vrot.slane %v2164_v17, 6  ;;  %v2566_v33 = vld [vmem:[%s6172_s3 + $0x100] sm:$0xff] }
 0x262   :  { %vm6038_vm1 = vmor %vm7387_vm13, %vm1493_vm3  ;;  %vm7396_vm3 = vcmask 1041408   ;;  %vm2354_vm13 = vcmask 259072  }
 0x263   :  { %vm7392_vm6 = vmor %vm7390_vm14, %vm7391_vm15  ;;  %v1589_v57 = vsel %vm6038_vm1, 1.0, %v2568_v59  ;;  %2515 = vmatpush.msra.mxu3 %v2553_v37  ;;  %v2167_v28 = vadd.f32 %v2166_v40, %v2108_v14  ;;  %vm2352_vm1 = vcmask 261120   ;;  %vm2455_vm14 = vcmask 1041409  }
 0x264   :  { %vm1542_vm0 = vmor %vm7392_vm6, %vm1494_vm12  ;;  %vm7398_vm12 = vcmask 1045508   ;;  %vm2458_vm15 = vcmask 1042434   ;;  %vm2461_vm6 = vcmask 1043459  }
 0x265   :  { %vm7395_vm9 = vmor %vm7393_vm5, %vm7394_vm8  ;;  %v1590_v11 = vsel %vm1542_vm0, 1.0, %v2568_v59  ;;  %2516 = vmatpush.msra.mxu3 %v2554_v9  ;;  %v2222_v51 = vrot.slane %v2167_v28, 2  ;;  %v2223_v31 = vrot.slane %v2167_v28, 4  ;;  %v2224_v18 = vrot.slane %v2167_v28, 6  ;;  %v2113_v25 = vpop.f32.mrf.mxu1 }
 0x266   :  { %vm1543_vm2 = vmor %vm7395_vm9, %vm1495_vm10  ;;  %v1718_v13 = vrot.slane %v1590_v11, 6  ;;  %vm7399_vm10 = vcmask 1043456   ;;  %vm2464_vm0 = vcmask 1044484   ;;  %vm2467_vm5 = vcmask 1045509  }
 0x267   :  { %v1591_v50 = vsel %vm1543_vm2, 1.0, %v2568_v59  ;;  %vm7401_vm11 = vmmov %vm7399_vm10  ;;  %v1977_v29 = vld.sshfl [vmem:[#allocation1] sm:$0xff pattern:$0x73625140]  ;;  %2517 = vmatpush.msra.mxu3 %v2555_v58  ;;  %vm2470_vm8 = vcmask 1046534   ;;  %vm2473_vm9 = vcmask 1047559  }
 0x268   :  { %v1719_v42 = vrot.slane %v1591_v50, 4  ;;  %v1870_v47 = vsel %vm7396_vm3, %v1589_v57, %v1718_v13  ;;  %v1872_v63 = vsel %vm7397_vm7, %v1589_v57, %v1718_v13  ;;  %v1875_v12 = vsel %vm7398_vm12, %v1589_v57, %v1718_v13  ;;  %v6075_v4 = vld.sshfl [vmem:[#allocation1 + $0x8] sm:$0xff pattern:$0x73625140]  ;;  %2077 = vmatmul.f32.gmra.mxu3 %v1977_v29  ;;  %v2051_v44 = vpop.f32.mrf.mxu0 }
 0x269   :  { %v6077_v0 = vld.sshfl [vmem:[#allocation1 + $0x10] sm:$0xff pattern:$0x73625140]  ;;  %2518 = vmatpush.msra.mxu3 %v2556_v24  ;;  %v2111_v46 = vadd.f32 %v2110_v61, %v2051_v44 }
 0x26a   :  { %v1871_v41 = vsel %vm7399_vm10, %v1870_v47, %v1719_v42  ;;  %v1873_v3 = vsel %vm7400_vm4, %v1872_v63, %v1719_v42  ;;  %v1876_v22 = vsel %vm7401_vm11, %v1719_v42, %v1875_v12  ;;  %2258 = vst [vmem:[#allocation1] ss:$4 sm:$0xff] %v2161_v2 }
 0x26b   :  { %v1874_v59 = vrot.slane %v1873_v3, 2  ;;  %v1877_v27 = vrot.slane %v1876_v22, 4  ;;  %1974 = vst [vmem:[#allocation1 + $0x21] ss:$4 sm:$0xff] %v1871_v41  ;;  %2519 = vmatpush.msra.mxu3 %v2557_v19  ;;  %v2170_v10 = vadd.f32 %v2169_v15, %v2111_v46  ;;  %v2172_v13 = vpop.f32.mrf.mxu2 }
 0x26c   :  { %2260 = vst [vmem:[#allocation1 + $0x1] ss:$4 sm:$0xff] %v2216_v30 }
 0x26d   :  { %1975 = vst [vmem:[#allocation1 + $0x22] ss:$4 sm:$0xff] %v1874_v59  ;;  %2520 = vmatpush.msra.mxu3 %v2558_v54  ;;  %v2225_v35 = vrot.slane %v2170_v10, 2  ;;  %v2226_v56 = vrot.slane %v2170_v10, 4  ;;  %v2227_v11 = vrot.slane %v2170_v10, 6  ;;  %v2116_v63 = vpop.f32.mrf.mxu1 }
 0x26e   :  { %1976 = vst [vmem:[#allocation1 + $0x23] ss:$4 sm:$0xff] %v1877_v27 }
 0x26f   :  { %2262 = vst [vmem:[#allocation1 + $0x2] ss:$4 sm:$0xff] %v2217_v45  ;;  %2521 = vmatpush.msra.mxu3 %v2559_v26 }
 0x270   :  { %2264 = vst [vmem:[#allocation1 + $0x3] ss:$4 sm:$0xff] %v2218_v52  ;;  %v2054_v62 = vpop.f32.mrf.mxu0 }
 0x271   :  { %2522 = vmatpush.msra.mxu3 %v2560_v23  ;;  %v2114_v16 = vadd.f32 %v2113_v25, %v2054_v62 }
 0x273   :  { %2523 = vmatpush.msra.mxu3 %v2561_v38  ;;  %v2173_v6 = vadd.f32 %v2172_v13, %v2114_v16  ;;  %v2175_v41 = vpop.f32.mrf.mxu2 }
 0x275   :  { %v1980_v36 = vld.sshfl [vmem:[#allocation1 + $0x20] sm:$0xff pattern:$0x73625140]  ;;  %v6091_v53 = vld.sshfl [vmem:[#allocation1 + $0x28] sm:$0xff pattern:$0x73625140]  ;;  %2524 = vmatpush.msra.mxu3 %v2562_v55 }
 0x276   :  { %v6093_v21 = vld.sshfl [vmem:[#allocation1 + $0x30] sm:$0xff pattern:$0x73625140]  ;;  %2080 = vmatmul.f32.gmra.mxu3 %v1980_v36  ;;  %v2228_v57 = vrot.slane %v2173_v6, 2  ;;  %v2229_v42 = vrot.slane %v2173_v6, 4  ;;  %v2230_v2 = vrot.slane %v2173_v6, 6 }
 0x277   :  { %2266 = vst [vmem:[#allocation1 + $0x20] ss:$4 sm:$0xff] %v2164_v17  ;;  %v6098_v49 = vld.sshfl [vmem:[#allocation1] sm:$0xff pattern:$0x73625140]  ;;  %2525 = vmatpush.msra.mxu3 %v2563_v20 }
 0x278   :  { %2268 = vst [vmem:[#allocation1 + $0x21] ss:$4 sm:$0xff] %v2219_v1  ;;  %v2057_v47 = vpop.f32.mrf.mxu0 }
 0x279   :  { %2270 = vst [vmem:[#allocation1 + $0x22] ss:$4 sm:$0xff] %v2220_v5  ;;  %2526 = vmatpush.msra.mxu3 %v2564_v43  ;;  %v2117_v37 = vadd.f32 %v2116_v63, %v2057_v47 }
 0x27a   :  { %2273 = vst [vmem:[#allocation1] ss:$4 sm:$0xff] %v2221_v8 }
 0x27b   :  { %2274 = vst [vmem:[#allocation1 + $0x1] ss:$4 sm:$0xff] %v2167_v28  ;;  %v2176_v3 = vadd.f32 %v2175_v41, %v2117_v37 }
 0x27c   :  { %2275 = vst [vmem:[#allocation1 + $0x2] ss:$4 sm:$0xff] %v2222_v51 }
 0x27d   :  { %2276 = vst [vmem:[#allocation1 + $0x3] ss:$4 sm:$0xff] %v2223_v31  ;;  %v2231_v22 = vrot.slane %v2176_v3, 2  ;;  %v2232_v59 = vrot.slane %v2176_v3, 4  ;;  %v2233_v27 = vrot.slane %v2176_v3, 6 }
 0x27e   :  { %2133 = vmatmul.f32.vlgmr.msrb.gmra.mxu3 %v6029_v39  ;;  %v2565_v39 = vld [vmem:[%s6172_s3 + $0x108] sm:$0xff] }
 0x27f   :  { %2527 = vmatpush.msra.mxu3 %v2565_v39 }
 0x280   :  { %v6113_v34 = vld.sshfl [vmem:[#allocation1 + $0x20] sm:$0xff pattern:$0x73625140] }
 0x281   :  { %2277 = vst [vmem:[#allocation1 + $0x20] ss:$4 sm:$0xff] %v2224_v18  ;;  %2528 = vmatpush.msra.mxu3 %v2566_v33 }
 0x282   :  { %2278 = vst [vmem:[#allocation1 + $0x21] ss:$4 sm:$0xff] %v2170_v10  ;;  %v2060_v29 = vpop.f32.mrf.mxu0  ;;  %v2119_v30 = vpop.f32.mrf.mxu1 }
 0x283   :  { %2279 = vst [vmem:[#allocation1 + $0x22] ss:$4 sm:$0xff] %v2225_v35  ;;  %v2120_v32 = vadd.f32 %v2119_v30, %v2060_v29 }
 0x284   :  { %v6121_v50 = vld.sshfl [vmem:[#allocation1] sm:$0xff pattern:$0x73625140] }
 0x285   :  { %2282 = vst [vmem:[#allocation1] ss:$4 sm:$0xff] %v2226_v56 }
 0x286   :  { %2136 = vmatmul.f32.gmra.mxu3 %v6075_v4  ;;  %2283 = vst [vmem:[#allocation1 + $0x1] ss:$4 sm:$0xff] %v2227_v11 }
 0x287   :  { %2284 = vst [vmem:[#allocation1 + $0x2] ss:$4 sm:$0xff] %v2173_v6 }
 0x288   :  { %2285 = vst [vmem:[#allocation1 + $0x3] ss:$4 sm:$0xff] %v2228_v57 }
 0x289   :  { %v2178_v60 = vpop.f32.mrf.mxu2 }
 0x28a   :  { %v6127_v12 = vld.sshfl [vmem:[#allocation1 + $0x20] sm:$0xff pattern:$0x73625140]  ;;  %v2179_v4 = vadd.f32 %v2178_v60, %v2120_v32  ;;  %v2063_v40 = vpop.f32.mrf.mxu0  ;;  %v2122_v17 = vpop.f32.mrf.mxu1  ;;  %v2363_v32 = vsel %vm2352_vm1, %v6121_v50, -inf }
 0x28b   :  { %2286 = vst [vmem:[#allocation1 + $0x20] ss:$4 sm:$0xff] %v2229_v42  ;;  %v2123_v24 = vadd.f32 %v2122_v17, %v2063_v40 }
 0x28c   :  { %2287 = vst [vmem:[#allocation1 + $0x21] ss:$4 sm:$0xff] %v2230_v2  ;;  %v2234_v45 = vrot.slane %v2179_v4, 2  ;;  %v2235_v52 = vrot.slane %v2179_v4, 4  ;;  %v2236_v58 = vrot.slane %v2179_v4, 6 }
 0x28d   :  { %2288 = vst [vmem:[#allocation1 + $0x22] ss:$4 sm:$0xff] %v2176_v3  ;;  %v2364_v3 = vsel %vm2354_vm13, %v6127_v12, -inf }
 0x28e   :  { %2139 = vmatmul.f32.gmra.mxu3 %v6091_v53 }
 0x28f   :  { %v6130_v9 = vld.sshfl [vmem:[#allocation1] sm:$0xff pattern:$0x73625140] }
 0x290   :  { %2291 = vst [vmem:[#allocation1] ss:$4 sm:$0xff] %v2231_v22  ;;  %v2372_v60 = vsel %vm2352_vm1, %v6130_v9, -inf  ;;  %v2355_v9 = vsel %vm2354_vm13, %v6113_v34, -inf }
 0x291   :  { %2292 = vst [vmem:[#allocation1 + $0x1] ss:$4 sm:$0xff] %v2232_v59  ;;  %v2181_v19 = vpop.f32.mrf.mxu2 }
 0x292   :  { %2293 = vst [vmem:[#allocation1 + $0x2] ss:$4 sm:$0xff] %v2233_v27  ;;  %v2182_v14 = vadd.f32 %v2181_v19, %v2123_v24 }
 0x293   :  { %2294 = vst [vmem:[#allocation1 + $0x3] ss:$4 sm:$0xff] %v2179_v4 }
 0x294   :  { %v6133_v7 = vld.sshfl [vmem:[#allocation1 + $0x20] sm:$0xff pattern:$0x73625140]  ;;  %v2237_v1 = vrot.slane %v2182_v14, 2  ;;  %v2238_v54 = vrot.slane %v2182_v14, 4  ;;  %v2239_v28 = vrot.slane %v2182_v14, 6 }
 0x295   :  { %2295 = vst [vmem:[#allocation1 + $0x20] ss:$4 sm:$0xff] %v2234_v45  ;;  %v2373_v22 = vsel %vm2354_vm13, %v6133_v7, -inf  ;;  %v2365_v45 = vmax.f32 %v2363_v32, %v2364_v3 }
 0x296   :  { %2192 = vmatmul.f32.vlgmr.msra.gmra.mxu3 %v6031_v48  ;;  %2296 = vst [vmem:[#allocation1 + $0x21] ss:$4 sm:$0xff] %v2235_v52  ;;  %v2374_v12 = vmax.f32 %v2372_v60, %v2373_v22 }
 0x297   :  { %2297 = vst [vmem:[#allocation1 + $0x22] ss:$4 sm:$0xff] %v2236_v58 }
 0x29a   :  { %v6136_v48 = vld.sshfl [vmem:[#allocation1] sm:$0xff pattern:$0x73625140] }
 0x29b   :  { %2300 = vst [vmem:[#allocation1] ss:$4 sm:$0xff] %v2182_v14  ;;  %v2381_v7 = vsel %vm2352_vm1, %v6136_v48, -inf  ;;  %v2353_v48 = vsel %vm2352_vm1, %v6098_v49, -inf }
 0x29c   :  { %2301 = vst [vmem:[#allocation1 + $0x1] ss:$4 sm:$0xff] %v2237_v1 }
 0x29d   :  { %2302 = vst [vmem:[#allocation1 + $0x2] ss:$4 sm:$0xff] %v2238_v54  ;;  %v2366_v54 = vrot.slane %v2365_v45, 4 }
 0x29e   :  { %2195 = vmatmul.f32.gmra.mxu3 %v6077_v0  ;;  %2303 = vst [vmem:[#allocation1 + $0x3] ss:$4 sm:$0xff] %v2239_v28  ;;  %v2299_v44 = vld.sshfl [vmem:[#allocation1 + $0x20] sm:$0xff pattern:$0x73625140]  ;;  %v2375_v28 = vrot.slane %v2374_v12, 4 }
 0x29f   :  { %v2382_v4 = vsel %vm2354_vm13, %v2299_v44, -inf  ;;  %v2367_v34 = vmax.f32 %v2365_v45, %v2366_v54 }
 0x2a0   :  { %v2383_v17 = vmax.f32 %v2381_v7, %v2382_v4 }
 0x2a2   :  { %v2066_v36 = vpop.f32.mrf.mxu0  ;;  %v2125_v5 = vpop.f32.mrf.mxu1  ;;  %v2384_v44 = vrot.slane %v2383_v17, 4 }
 0x2a3   :  { %v2126_v0 = vadd.f32 %v2125_v5, %v2066_v36 }
 0x2a5   :  { %v2307_v31 = vld.sshfl [vmem:[#allocation1] sm:$0xff pattern:$0x73625140] }
 0x2a6   :  { %2198 = vmatmul.f32.gmra.mxu3 %v6093_v21  ;;  %v2390_v50 = vsel %vm2352_vm1, %v2307_v31, -inf }
 0x2a9   :  { %v2184_v8 = vpop.f32.mrf.mxu2 }
 0x2aa   :  { %v2185_v53 = vadd.f32 %v2184_v8, %v2126_v0 }
 0x2ac   :  { %v2240_v61 = vrot.slane %v2185_v53, 2  ;;  %v2241_v26 = vrot.slane %v2185_v53, 4  ;;  %v2242_v51 = vrot.slane %v2185_v53, 6  ;;  %2304 = vst [vmem:[#allocation1 + $0x20] ss:$4 sm:$0xff] %v2185_v53  ;;  %v2356_v53 = vmax.f32 %v2353_v48, %v2355_v9 }
 0x2ae   :  { %2305 = vst [vmem:[#allocation1 + $0x21] ss:$4 sm:$0xff] %v2240_v61  ;;  %v2357_v31 = vrot.slane %v2356_v53, 4 }
 0x2af   :  { %2306 = vst [vmem:[#allocation1 + $0x22] ss:$4 sm:$0xff] %v2241_v26 }
 0x2b0   :  { %v2069_v15 = vpop.f32.mrf.mxu0  ;;  %v2128_v23 = vpop.f32.mrf.mxu1  ;;  %2309 = vst [vmem:[#allocation1] ss:$4 sm:$0xff] %v2242_v51  ;;  %v2376_v51 = vmax.f32 %v2374_v12, %v2375_v28 }
 0x2b1   :  { %v2129_v21 = vadd.f32 %v2128_v23, %v2069_v15 }
 0x2b6   :  { %v2308_v62 = vld.sshfl [vmem:[#allocation1 + $0x20] sm:$0xff pattern:$0x73625140] }
 0x2b7   :  { %v2187_v46 = vpop.f32.mrf.mxu2  ;;  %v2391_v52 = vsel %vm2354_vm13, %v2308_v62, -inf }
 0x2b8   :  { %v2188_v38 = vadd.f32 %v2187_v46, %v2129_v21  ;;  %v2392_v19 = vmax.f32 %v2390_v50, %v2391_v52  ;;  %v2385_v21 = vmax.f32 %v2383_v17, %v2384_v44  ;;  %v2534_v50 = vld [vmem:[%s6173_s4] ss:$0 sm:$0xff] }
 0x2ba   :  { %v2243_v10 = vrot.slane %v2188_v38, 2  ;;  %v2244_v55 = vrot.slane %v2188_v38, 4  ;;  %v2245_v18 = vrot.slane %v2188_v38, 6  ;;  %2310 = vst [vmem:[#allocation1 + $0x1] ss:$4 sm:$0xff] %v2188_v38  ;;  %v2393_v26 = vrot.slane %v2392_v19, 4 }
 0x2bc   :  { %2311 = vst [vmem:[#allocation1 + $0x2] ss:$4 sm:$0xff] %v2243_v10  ;;  %v2394_v38 = vmax.f32 %v2392_v19, %v2393_v26  ;;  %v2368_v10 = vrot.slane %v2367_v34, 2 }
 0x2bd   :  { %2312 = vst [vmem:[#allocation1 + $0x3] ss:$4 sm:$0xff] %v2244_v55  ;;  %v2377_v55 = vrot.slane %v2376_v51, 2 }
 0x2be   :  { %2313 = vst [vmem:[#allocation1 + $0x20] ss:$4 sm:$0xff] %v2245_v18 }
 0x2c4   :  { %v2316_v13 = vld.sshfl [vmem:[#allocation1] sm:$0xff pattern:$0x73625140] }
 0x2c5   :  { %v2399_v14 = vsel %vm2352_vm1, %v2316_v13, -inf  ;;  %v2395_v13 = vrot.slane %v2394_v38, 2 }
 0x2c9   :  { %v2072_v25 = vpop.f32.mrf.mxu0 }
 0x2ca   :  { %v2131_v20 = vpop.f32.mrf.mxu1 }
 0x2cb   :  { %v2132_v35 = vadd.f32 %v2131_v20, %v2072_v25 }
 0x2d1   :  { %v2190_v43 = vpop.f32.mrf.mxu2 }
 0x2d2   :  { %v2191_v56 = vadd.f32 %v2190_v43, %v2132_v35 }
 0x2d4   :  { %v2246_v11 = vrot.slane %v2191_v56, 2  ;;  %v2247_v39 = vrot.slane %v2191_v56, 4  ;;  %v2248_v16 = vrot.slane %v2191_v56, 6  ;;  %2314 = vst [vmem:[#allocation1 + $0x21] ss:$4 sm:$0xff] %v2191_v56 }
 0x2d6   :  { %2315 = vst [vmem:[#allocation1 + $0x22] ss:$4 sm:$0xff] %v2246_v11  ;;  %v2358_v11 = vmax.f32 %v2356_v53, %v2357_v31 }
 0x2d7   :  { %2318 = vst [vmem:[#allocation1] ss:$4 sm:$0xff] %v2247_v39  ;;  %v2386_v39 = vrot.slane %v2385_v21, 2 }
 0x2d8   :  { %2319 = vst [vmem:[#allocation1 + $0x1] ss:$4 sm:$0xff] %v2248_v16 }
 0x2dd   :  { %v2075_v33 = vpop.f32.mrf.mxu3  ;;  %v2317_v30 = vld.sshfl [vmem:[#allocation1 + $0x20] sm:$0xff pattern:$0x73625140] }
 0x2de   :  { %v2400_v58 = vsel %vm2354_vm13, %v2317_v30, -inf }
 0x2df   :  { %v2401_v36 = vmax.f32 %v2399_v14, %v2400_v58 }
 0x2e1   :  { %v2402_v15 = vrot.slane %v2401_v36, 4 }
 0x2e3   :  { %v2403_v18 = vmax.f32 %v2401_v36, %v2402_v15 }
 0x2eb   :  { %v2078_v6 = vpop.f32.mrf.mxu3 }
 0x2f9   :  { %v2081_v57 = vpop.f32.mrf.mxu3 }
 0x301   :  { %v2134_v42 = vpop.f32.mrf.mxu3 }
 0x302   :  { %v2135_v63 = vadd.f32 %v2134_v42, %v2075_v33  ;;  %v2369_v33 = vmax.f32 %v2367_v34, %v2368_v10  ;;  %v2378_v42 = vmax.f32 %v2376_v51, %v2377_v55 }
 0x309   :  { %v2137_v2 = vpop.f32.mrf.mxu3 }
 0x30a   :  { %v2138_v40 = vadd.f32 %v2137_v2, %v2078_v6  ;;  %v2404_v6 = vrot.slane %v2403_v18, 2  ;;  %v2359_v2 = vrot.slane %v2358_v11, 2 }
 0x30c   :  { %v2405_v3 = vmax.f32 %v2403_v18, %v2404_v6 }
 0x30e   :  { %v2406_v45 = vrot.slane %v2405_v3, 1 }
 0x311   :  { %v2140_v47 = vpop.f32.mrf.mxu3 }
 0x312   :  { %v2141_v23 = vadd.f32 %v2140_v47, %v2081_v57  ;;  %v2387_v47 = vmax.f32 %v2385_v21, %v2386_v39 }
 0x319   :  { %v2193_v37 = vpop.f32.mrf.mxu3 }
 0x31a   :  { %v2194_v41 = vadd.f32 %v2193_v37, %v2135_v63  ;;  %v2396_v37 = vmax.f32 %v2394_v38, %v2395_v13 }
 0x31c   :  { %v2249_v59 = vrot.slane %v2194_v41, 2  ;;  %v2250_v27 = vrot.slane %v2194_v41, 4  ;;  %v2251_v29 = vrot.slane %v2194_v41, 6  ;;  %2320 = vst [vmem:[#allocation1 + $0x2] ss:$4 sm:$0xff] %v2194_v41  ;;  %v2370_v41 = vrot.slane %v2369_v33, 1 }
 0x31d   :  { %v2397_v60 = vrot.slane %v2396_v37, 1 }
 0x31e   :  { %2321 = vst [vmem:[#allocation1 + $0x3] ss:$4 sm:$0xff] %v2249_v59  ;;  %v2379_v59 = vrot.slane %v2378_v42, 1  ;;  %v2371_v4 = vmax.f32 %v2369_v33, %v2370_v41 }
 0x31f   :  { %2322 = vst [vmem:[#allocation1 + $0x20] ss:$4 sm:$0xff] %v2250_v27  ;;  %v2360_v27 = vmax.f32 %v2358_v11, %v2359_v2  ;;  %v2398_v19 = vmax.f32 %v2396_v37, %v2397_v60 }
 0x320   :  { %2323 = vst [vmem:[#allocation1 + $0x21] ss:$4 sm:$0xff] %v2251_v29  ;;  %v2388_v29 = vrot.slane %v2387_v47, 1  ;;  %v2380_v52 = vmax.f32 %v2378_v42, %v2379_v59  ;;  %v2431_v14 = vadd.f32 %v2534_v50, %v2371_v4 }
 0x321   :  { %v2196_v24 = vpop.f32.mrf.mxu3  ;;  %v2361_v17 = vrot.slane %v2360_v27, 1 }
 0x322   :  { %v2197_v1 = vadd.f32 %v2196_v24, %v2138_v40  ;;  %v2389_v24 = vmax.f32 %v2387_v47, %v2388_v29  ;;  %v2432_v28 = vadd.f32 %v2534_v50, %v2380_v52  ;;  %2535 = vtanh.f32 %v2431_v14 }
 0x323   :  { %v2362_v48 = vmax.f32 %v2360_v27, %v2361_v17 }
 0x324   :  { %v2252_v5 = vrot.slane %v2197_v1, 2  ;;  %v2253_v0 = vrot.slane %v2197_v1, 4  ;;  %v2254_v8 = vrot.slane %v2197_v1, 6  ;;  %2324 = vst [vmem:[#allocation1 + $0x22] ss:$4 sm:$0xff] %v2197_v1  ;;  %v2407_v1 = vmax.f32 %v2405_v3, %v2406_v45 }
 0x325   :  { %v2325_v61 = vld.sshfl [vmem:[#allocation1] sm:$0xff pattern:$0x73625140]  ;;  %2537 = vtanh.f32 %v2432_v28  ;;  %v2430_v26 = vadd.f32 %v2534_v50, %v2362_v48 }
 0x326   :  { %2327 = vst [vmem:[#allocation1] ss:$4 sm:$0xff] %v2252_v5  ;;  %v2408_v25 = vsel %vm2352_vm1, %v2325_v61, -inf  ;;  %v2433_v5 = vadd.f32 %v2534_v50, %v2389_v24  ;;  %v2435_v53 = vadd.f32 %v2534_v50, %v2407_v1 }
 0x327   :  { %2328 = vst [vmem:[#allocation1 + $0x1] ss:$4 sm:$0xff] %v2253_v0 }
 0x328   :  { %2329 = vst [vmem:[#allocation1 + $0x2] ss:$4 sm:$0xff] %v2254_v8  ;;  %v2434_v8 = vadd.f32 %v2534_v50, %v2398_v19  ;;  %2539 = vtanh.f32 %v2433_v5  ;;  %v2536_v15 = vpop.eup %2535 }
 0x329   :  { %v2199_v46 = vpop.f32.mrf.mxu3 }
 0x32a   :  { %v2200_v49 = vadd.f32 %v2199_v46, %v2141_v23  ;;  %2541 = vtanh.f32 %v2434_v8 }
 0x32b   :  { %v2326_v62 = vld.sshfl [vmem:[#allocation1 + $0x20] sm:$0xff pattern:$0x73625140]  ;;  %2543 = vtanh.f32 %v2435_v53  ;;  %v2538_v31 = vpop.eup %2537 }
 0x32c   :  { %v2409_v20 = vsel %vm2354_vm13, %v2326_v62, -inf  ;;  %v2255_v35 = vrot.slane %v2200_v49, 2  ;;  %v2256_v43 = vrot.slane %v2200_v49, 4  ;;  %v2257_v56 = vrot.slane %v2200_v49, 6  ;;  %2330 = vst [vmem:[#allocation1 + $0x3] ss:$4 sm:$0xff] %v2200_v49 }
 0x32d   :  { %v2410_v16 = vmax.f32 %v2408_v25, %v2409_v20  ;;  %v2454_v49 = vrot.slane %v2536_v15, 7  ;;  %v2457_v55 = vrot.slane %v2538_v31, 6 }
 0x32e   :  { %2331 = vst [vmem:[#allocation1 + $0x20] ss:$4 sm:$0xff] %v2255_v35  ;;  %v2540_v21 = vpop.eup %2539 }
 0x32f   :  { %v2411_v57 = vrot.slane %v2410_v16, 4  ;;  %2332 = vst [vmem:[#allocation1 + $0x21] ss:$4 sm:$0xff] %v2256_v43  ;;  %v2460_v62 = vrot.slane %v2540_v21, 5 }
 0x330   :  { %2333 = vst [vmem:[#allocation1 + $0x22] ss:$4 sm:$0xff] %v2257_v56  ;;  %v2542_v38 = vpop.eup %2541 }
 0x331   :  { %v2412_v63 = vmax.f32 %v2410_v16, %v2411_v57  ;;  %v2544_v10 = vpop.eup %2543  ;;  %v2463_v20 = vrot.slane %v2542_v38, 4 }
 0x332   :  { %v2466_v43 = vrot.slane %v2544_v10, 3 }
 0x333   :  { %v2413_v22 = vrot.slane %v2412_v63, 2  ;;  %v2334_v32 = vld.sshfl [vmem:[#allocation1] sm:$0xff pattern:$0x73625140] }
 0x334   :  { %v2417_v58 = vsel %vm2352_vm1, %v2334_v32, -inf }
 0x335   :  { %v2414_v30 = vmax.f32 %v2412_v63, %v2413_v22 }
 0x337   :  { %v2335_v12 = vld.sshfl [vmem:[#allocation1 + $0x20] sm:$0xff pattern:$0x73625140]  ;;  %v2415_v7 = vrot.slane %v2414_v30, 1 }
 0x338   :  { %v2418_v40 = vsel %vm2354_vm13, %v2335_v12, -inf }
 0x339   :  { %v2419_v9 = vmax.f32 %v2417_v58, %v2418_v40  ;;  %v2416_v36 = vmax.f32 %v2414_v30, %v2415_v7 }
 0x33b   :  { %v2420_v54 = vrot.slane %v2419_v9, 4  ;;  %v2436_v61 = vadd.f32 %v2534_v50, %v2416_v36 }
 0x33d   :  { %v2421_v0 = vmax.f32 %v2419_v9, %v2420_v54  ;;  %2545 = vtanh.f32 %v2436_v61 }
 0x33e   :  { %2547 = vtanh.f32 %v2430_v26 }
 0x33f   :  { %v2422_v44 = vrot.slane %v2421_v0, 2 }
 0x341   :  { %v2423_v34 = vmax.f32 %v2421_v0, %v2422_v44 }
 0x343   :  { %v2424_v51 = vrot.slane %v2423_v34, 1  ;;  %v2546_v18 = vpop.eup %2545 }
 0x344   :  { %v2548_v25 = vpop.eup %2547  ;;  %v2469_v11 = vrot.slane %v2546_v18, 2 }
 0x345   :  { %v2425_v23 = vmax.f32 %v2423_v34, %v2424_v51  ;;  %v2456_v35 = vsel %vm2455_vm14, %v2454_v49, %v2548_v25 }
 0x346   :  { %v2459_v56 = vsel %vm2458_vm15, %v2457_v55, %v2456_v35 }
 0x347   :  { %v2437_v46 = vadd.f32 %v2534_v50, %v2425_v23  ;;  %v2462_v39 = vsel %vm2461_vm6, %v2460_v62, %v2459_v56 }
 0x348   :  { %v2465_v13 = vsel %vm2464_vm0, %v2463_v20, %v2462_v39 }
 0x349   :  { %2549 = vtanh.f32 %v2437_v46  ;;  %v2468_v33 = vsel %vm2467_vm5, %v2466_v43, %v2465_v13 }
 0x34a   :  { %v2471_v57 = vsel %vm2470_vm8, %v2469_v11, %v2468_v33 }
 0x34f   :  { %v2550_v16 = vpop.eup %2549 }
 0x350   :  { %v2472_v6 = vrot.slane %v2550_v16, 1 }
 0x352   :  { %v2474_v42 = vsel %vm2473_vm9, %v2472_v6, %v2471_v57 }
 0x353   :  { %2476 = vst.msk [vmem:[%s6174_s5] sm:$0xff] %vm2352_vm1, %v2474_v42 }

</bundles_post_ra>
